<compile_context>
chip_gen: v7x
topology: tpu7x:2x2x1
jax: 0.10.0
libtpu: 0.0.40
codegen_flags: <defaults>
</compile_context>

<pallas_src>
import functools

import jax
import jax.numpy as jnp
from jax.experimental import pallas as pl
from jax.experimental.pallas import tpu as pltpu


# ---------------------------------------------------------------------------
# Kernels
# ---------------------------------------------------------------------------
def _resident_kernel(x_ref, w_ref, b_ref, o_ref, *, num_layers):
    """One batch tile; the whole bf16 weight stack is VMEM-resident.

    x_ref: (TB, F)     input tile (f32)
    w_ref: (L, F, F)   stacked weights, (in, out) layout, bf16
    b_ref: (L, 1, F)   stacked biases, f32 (already 2-D broadcastable)
    o_ref: (TB, F)     output tile
    """
    # bf16 activations feed the MXU; accumulation is f32.
    h = x_ref[...].astype(jnp.bfloat16)
    for l in range(num_layers - 1):
        acc = jnp.dot(h, w_ref[l], preferred_element_type=jnp.float32) + b_ref[l]
        # Fused ReLU + bf16 downcast: only the bf16 activation stays live.
        h = jnp.maximum(acc, 0.0).astype(jnp.bfloat16)
    res = (jnp.dot(h, w_ref[num_layers - 1], preferred_element_type=jnp.float32)
           + b_ref[num_layers - 1])
    # Residual: re-read x from VMEM (cheap vld, short live range).
    o_ref[...] = (x_ref[...].astype(jnp.float32) + res).astype(o_ref.dtype)


def _staged_kernel(x_ref, w_ref, b_ref, o_ref, h_ref, *, num_layers):
    """Layer-staged variant: grid=(batch_tiles, L); one layer's weights per step.

    x_ref: (TB, F)    input tile (f32), constant across the layer axis
    w_ref: (1, F, F)  this layer's weights, bf16
    b_ref: (1, 1, F)  this layer's bias, f32
    o_ref: (TB, F)    output tile (written only on the last layer step)
    h_ref: (TB, F)    bf16 activation carried across the layer axis (scratch)
    """
    l = pl.program_id(1)

    @pl.when(l == 0)
    def _():
        h_ref[...] = x_ref[...].astype(jnp.bfloat16)

    acc = jnp.dot(h_ref[...], w_ref[0], preferred_element_type=jnp.float32) + b_ref[0]

    @pl.when(l < num_layers - 1)
    def _():
        h_ref[...] = jnp.maximum(acc, 0.0).astype(jnp.bfloat16)

    @pl.when(l == num_layers - 1)
    def _():
        o_ref[...] = (x_ref[...].astype(jnp.float32) + acc).astype(o_ref.dtype)


# ---------------------------------------------------------------------------
# Wrapper
# ---------------------------------------------------------------------------
def _vmem_limit(needed_bytes):
    # ~1.25x actual need + a little headroom for Mosaic internal scratch,
    # capped well below v7x's 64 MiB physical per-TC VMEM.
    return min(int(needed_bytes * 1.25) + 4 * 1024 * 1024, 48 * 1024 * 1024)


def nonlinear_mapping(x, weights, biases, *, block_batch=1024,
                      weight_resident_limit_bytes=24 * 1024 * 1024,
                      force_staged=False, core_parallel_batch=False):
    """x: (B, F) f32.

    weights: (L, F_in, F_out) — IMPORTANT: pre-transposed from PyTorch's
             (out, in) nn.Linear layout so that h @ weights[l] == fc(h).
    biases:  (L, F).
    """
    B, F = x.shape
    if weights.ndim != 3 or weights.shape[1:] != (F, F):
        raise ValueError(
            "weights must have shape (num_layers, F, F) in (in, out) layout "
            "(transpose PyTorch nn.Linear weights before calling).")
    L = weights.shape[0]
    if biases.shape != (L, F):
        raise ValueError("biases must have shape (num_layers, F).")
    if L == 0:
        # num_layers == 0: lin_mapping returns zeros, so out = x.
        return x

    # bf16 weights for the MXU (f32 accumulation); f32 biases as (L, 1, F)
    # so each per-layer bias is already a 2-D sublane-broadcastable tile.
    w_bf16 = weights.astype(jnp.bfloat16)
    b_f32 = biases.astype(jnp.float32).reshape(L, 1, F)

    # Batch tile: a single full-size tile when B fits (block == full dim is
    # always legal), otherwise a multiple-of-8 tile; the ragged tail (if any)
    # is handled by Pallas's partial last block — no host pad / slice.
    if B <= block_batch:
        TB = B
        num_tiles = 1
    else:
        TB = max(8, (block_batch // 8) * 8)
        num_tiles = pl.cdiv(B, TB)

    batch_sem = pltpu.CORE_PARALLEL if core_parallel_batch else "parallel"

    cost = pl.CostEstimate(
        flops=2 * B * F * F * L,
        transcendentals=0,
        bytes_accessed=2 * B * F * 4 + L * F * F * 2 + L * F * 4,
    )

    # ----- resident-weight path --------------------------------------------
    def _resident_call(single_buffer_consts):
        const_kw = {}
        if single_buffer_consts and hasattr(pl, "Buffered"):
            # Constant-index blocks are never re-DMA'd: single-buffer them.
            const_kw = dict(pipeline_mode=pl.Buffered(1))
        w_bufs = 1 if const_kw else 2
        needed = (4 * TB * F * 4                 # x + out, double buffered, f32
                  + w_bufs * L * F * F * 2       # resident bf16 weight stack
                  + w_bufs * L * F * 4           # resident f32 biases
                  + 3 * TB * F * 4)              # activation / accumulator headroom
        kernel = functools.partial(_resident_kernel, num_layers=L)
        return pl.pallas_call(
            kernel,
            out_shape=jax.ShapeDtypeStruct((B, F), x.dtype),
            grid_spec=pltpu.PrefetchScalarGridSpec(
                num_scalar_prefetch=0,
                grid=(num_tiles,),
                in_specs=[
                    pl.BlockSpec((TB, F), lambda i: (i, 0)),                 # x
                    pl.BlockSpec((L, F, F), lambda i: (0, 0, 0), **const_kw),  # W
                    pl.BlockSpec((L, 1, F), lambda i: (0, 0, 0), **const_kw),  # b
                ],
                out_specs=pl.BlockSpec((TB, F), lambda i: (i, 0)),
            ),
            compiler_params=pltpu.CompilerParams(
                dimension_semantics=(batch_sem,),
                vmem_limit_bytes=_vmem_limit(needed),
            ),
            cost_estimate=cost,
        )(x, w_bf16, b_f32)

    # ----- layer-staged path (weights streamed one layer at a time) --------
    def _staged_call():
        needed = (4 * TB * F * 4       # x + out, double buffered, f32
                  + 2 * F * F * 2      # per-layer weight, double buffered, bf16
                  + 2 * F * 4          # per-layer bias, double buffered
                  + TB * F * 2         # h scratch (bf16)
                  + 3 * TB * F * 4)    # accumulator headroom
        kernel = functools.partial(_staged_kernel, num_layers=L)
        return pl.pallas_call(
            kernel,
            out_shape=jax.ShapeDtypeStruct((B, F), x.dtype),
            grid_spec=pltpu.PrefetchScalarGridSpec(
                num_scalar_prefetch=0,
                grid=(num_tiles, L),
                in_specs=[
                    pl.BlockSpec((TB, F), lambda i, l: (i, 0)),      # x (const over l)
                    pl.BlockSpec((1, F, F), lambda i, l: (l, 0, 0)),  # W_l
                    pl.BlockSpec((1, 1, F), lambda i, l: (l, 0, 0)),  # b_l
                ],
                out_specs=pl.BlockSpec((TB, F), lambda i, l: (i, 0)),
                scratch_shapes=[pltpu.VMEM((TB, F), jnp.bfloat16)],
            ),
            compiler_params=pltpu.CompilerParams(
                dimension_semantics=(batch_sem, "arbitrary"),
                vmem_limit_bytes=_vmem_limit(needed),
            ),
            cost_estimate=cost,
        )(x, w_bf16, b_f32)

    weight_bytes = L * F * F * 2  # bf16 resident stack
    if force_staged or weight_bytes > weight_resident_limit_bytes:
        return _staged_call()

    try:
        return _resident_call(single_buffer_consts=True)
    except Exception:
        # pl.Buffered(1) not accepted by this jax/Mosaic build — fall back to
        # default double-buffered constant blocks (identical semantics).
        return _resident_call(single_buffer_consts=False)


# ---------------------------------------------------------------------------
# Init + references
# ---------------------------------------------------------------------------
def init_params(key, feat, num_layers):
    """Deterministic init mimicking nn.Linear (uniform +/- 1/sqrt(fan_in)).

    Weights are stored pre-transposed to (in, out) for the kernel.
    """
    ws, bs = [], []
    bound = 1.0 / jnp.sqrt(feat)
    for _ in range(num_layers):
        key, kw, kb = jax.random.split(key, 3)
        w = jax.random.uniform(kw, (feat, feat), jnp.float32, -bound, bound)
        b = jax.random.uniform(kb, (feat,), jnp.float32, -bound, bound)
        ws.append(w)
        bs.append(b)
    return jnp.stack(ws, axis=0), jnp.stack(bs, axis=0)


def reference_f32(x, weights, biases):
    """Pure-JAX f32 reference of the PyTorch forward."""
    L = weights.shape[0]
    h = x
    for l in range(L - 1):
        h = jnp.maximum(h @ weights[l] + biases[l], 0.0)
    return x + (h @ weights[L - 1] + biases[L - 1])


def reference_bf16(x, weights, biases):
    """Reference matching the kernel's bf16-in / f32-accumulate numerics."""
    L = weights.shape[0]
    wb = weights.astype(jnp.bfloat16)
    h = x.astype(jnp.bfloat16)
    for l in range(L - 1):
        acc = jnp.dot(h, wb[l], preferred_element_type=jnp.float32) + biases[l]
        h = jnp.maximum(acc, 0.0).astype(jnp.bfloat16)
    res = jnp.dot(h, wb[L - 1], preferred_element_type=jnp.float32) + biases[L - 1]
    return (x.astype(jnp.float32) + res).astype(x.dtype)


# ---------------------------------------------------------------------------
# Demo / self-check
# ---------------------------------------------------------------------------
if __name__ == "__main__":
    # batch=512, feat=128, num_layers=3 (2 nonlinear blocks + 1 linear).
    B, FEAT, NUM_LAYERS = 512, 128, 3
    key = jax.random.PRNGKey(0)
    key, kx = jax.random.split(key)
    x = jax.random.normal(kx, (B, FEAT), jnp.float32)
    weights, biases = init_params(key, FEAT, NUM_LAYERS)

    ref_b = reference_bf16(x, weights, biases)   # matches kernel numerics
    ref_f = reference_f32(x, weights, biases)    # PyTorch f32 semantics

    # 1) Default path: one 512-row tile, VMEM-resident bf16 weight stack.
    out = jax.block_until_ready(nonlinear_mapping(x, weights, biases))
    assert out.shape == x.shape and out.dtype == x.dtype
    assert jnp.allclose(out, ref_b, atol=1e-2, rtol=1e-2), "mismatch vs bf16 reference"
    assert jnp.allclose(out, ref_f, atol=5e-2, rtol=5e-2), "mismatch vs f32 reference"

    # 2) Multi-tile batch grid (4 x 128-row tiles) exercising the pipeline.
    out2 = jax.block_until_ready(
        nonlinear_mapping(x, weights, biases, block_batch=128))
    assert jnp.allclose(out2, ref_b, atol=1e-2, rtol=1e-2), "mismatch (multi-tile)"

    # 3) Ragged batch (B % tile != 0): no host pad / slice; Pallas partial
    #    last block handles the tail.
    xr = x[:200]
    outr = jax.block_until_ready(
        nonlinear_mapping(xr, weights, biases, block_batch=128))
    assert outr.shape == xr.shape
    assert jnp.allclose(outr, ref_b[:200], atol=1e-2, rtol=1e-2), "mismatch (ragged)"

    # 4) Layer-staged fallback path (weights streamed per layer).
    outs = jax.block_until_ready(
        nonlinear_mapping(x, weights, biases, block_batch=128, force_staged=True))
    assert jnp.allclose(outs, ref_b, atol=1e-2, rtol=1e-2), "mismatch (staged)"

    print("KERNEL_OK")
</pallas_src>

<mosaic_0001>
module attributes {stable_mosaic.version = 11 : i64} {
  func.func @_resident_kernel(%arg0: i32, %arg1: memref<512x128xf32, #tpu.memory_space<vmem>>, %arg2: memref<3x128x128xbf16, #tpu.memory_space<vmem>>, %arg3: memref<3x1x128xf32, #tpu.memory_space<vmem>>, %arg4: memref<512x128xf32, #tpu.memory_space<vmem>>) attributes {dimension_semantics = [#tpu.dimension_semantics<parallel>], iteration_bounds = array<i64: 1>, scalar_prefetch = 0 : i64, scratch_operands = 0 : i64, tpu.core_type = #tpu.core_type<tc>, window_params = [{transform_indices = @transform_0, window_bounds = array<i64: 512, 128>}, {pipeline_mode = #tpu.pipeline_mode<synchronous>, transform_indices = @transform_1, window_bounds = array<i64: 3, 128, 128>}, {pipeline_mode = #tpu.pipeline_mode<synchronous>, transform_indices = @transform_2, window_bounds = array<i64: 3, 1, 128>}, {transform_indices = @transform_3, window_bounds = array<i64: 512, 128>}]} {
    %c0 = arith.constant 0 : index
    %c0_0 = arith.constant 0 : index
    %0 = vector.load %arg1[%c0, %c0_0] : memref<512x128xf32, #tpu.memory_space<vmem>>, vector<512x128xf32>
    %1 = arith.truncf %0 : vector<512x128xf32> to vector<512x128xbf16>
    %c0_1 = arith.constant 0 : index
    %c0_2 = arith.constant 0 : index
    %c0_3 = arith.constant 0 : index
    %2 = vector.load %arg2[%c0_1, %c0_2, %c0_3] : memref<3x128x128xbf16, #tpu.memory_space<vmem>>, vector<1x128x128xbf16>
    %3 = vector.shape_cast %2 : vector<1x128x128xbf16> to vector<128x128xbf16>
    %cst = arith.constant dense<0.000000e+00> : vector<512x128xf32>
    %4 = tpu.matmul %1, %3, %cst {dimension_numbers = #tpu.dot_dimension_numbers<[1], [0], [0], [1], [0, 0, 1, 1], [], []>} : vector<512x128xbf16>, vector<128x128xbf16>, vector<512x128xf32> -> vector<512x128xf32>
    %c0_4 = arith.constant 0 : index
    %c0_5 = arith.constant 0 : index
    %c0_6 = arith.constant 0 : index
    %5 = vector.load %arg3[%c0_4, %c0_5, %c0_6] : memref<3x1x128xf32, #tpu.memory_space<vmem>>, vector<1x1x128xf32>
    %6 = vector.shape_cast %5 : vector<1x1x128xf32> to vector<1x128xf32>
    %7 = vector.broadcast %6 : vector<1x128xf32> to vector<512x128xf32>
    %8 = arith.addf %4, %7 : vector<512x128xf32>
    %cst_7 = arith.constant 0.000000e+00 : f32
    %9 = vector.broadcast %cst_7 : f32 to vector<512x128xf32>
    %10 = arith.maximumf %8, %9 : vector<512x128xf32>
    %11 = arith.truncf %10 : vector<512x128xf32> to vector<512x128xbf16>
    %c1 = arith.constant 1 : index
    %c0_8 = arith.constant 0 : index
    %c0_9 = arith.constant 0 : index
    %12 = vector.load %arg2[%c1, %c0_8, %c0_9] : memref<3x128x128xbf16, #tpu.memory_space<vmem>>, vector<1x128x128xbf16>
    %13 = vector.shape_cast %12 : vector<1x128x128xbf16> to vector<128x128xbf16>
    %cst_10 = arith.constant dense<0.000000e+00> : vector<512x128xf32>
    %14 = tpu.matmul %11, %13, %cst_10 {dimension_numbers = #tpu.dot_dimension_numbers<[1], [0], [0], [1], [0, 0, 1, 1], [], []>} : vector<512x128xbf16>, vector<128x128xbf16>, vector<512x128xf32> -> vector<512x128xf32>
    %c1_11 = arith.constant 1 : index
    %c0_12 = arith.constant 0 : index
    %c0_13 = arith.constant 0 : index
    %15 = vector.load %arg3[%c1_11, %c0_12, %c0_13] : memref<3x1x128xf32, #tpu.memory_space<vmem>>, vector<1x1x128xf32>
    %16 = vector.shape_cast %15 : vector<1x1x128xf32> to vector<1x128xf32>
    %17 = vector.broadcast %16 : vector<1x128xf32> to vector<512x128xf32>
    %18 = arith.addf %14, %17 : vector<512x128xf32>
    %cst_14 = arith.constant 0.000000e+00 : f32
    %19 = vector.broadcast %cst_14 : f32 to vector<512x128xf32>
    %20 = arith.maximumf %18, %19 : vector<512x128xf32>
    %21 = arith.truncf %20 : vector<512x128xf32> to vector<512x128xbf16>
    %c2 = arith.constant 2 : index
    %c0_15 = arith.constant 0 : index
    %c0_16 = arith.constant 0 : index
    %22 = vector.load %arg2[%c2, %c0_15, %c0_16] : memref<3x128x128xbf16, #tpu.memory_space<vmem>>, vector<1x128x128xbf16>
    %23 = vector.shape_cast %22 : vector<1x128x128xbf16> to vector<128x128xbf16>
    %cst_17 = arith.constant dense<0.000000e+00> : vector<512x128xf32>
    %24 = tpu.matmul %21, %23, %cst_17 {dimension_numbers = #tpu.dot_dimension_numbers<[1], [0], [0], [1], [0, 0, 1, 1], [], []>} : vector<512x128xbf16>, vector<128x128xbf16>, vector<512x128xf32> -> vector<512x128xf32>
    %c2_18 = arith.constant 2 : index
    %c0_19 = arith.constant 0 : index
    %c0_20 = arith.constant 0 : index
    %25 = vector.load %arg3[%c2_18, %c0_19, %c0_20] : memref<3x1x128xf32, #tpu.memory_space<vmem>>, vector<1x1x128xf32>
    %26 = vector.shape_cast %25 : vector<1x1x128xf32> to vector<1x128xf32>
    %27 = vector.broadcast %26 : vector<1x128xf32> to vector<512x128xf32>
    %28 = arith.addf %24, %27 : vector<512x128xf32>
    %c0_21 = arith.constant 0 : index
    %c0_22 = arith.constant 0 : index
    %29 = vector.load %arg1[%c0_21, %c0_22] : memref<512x128xf32, #tpu.memory_space<vmem>>, vector<512x128xf32>
    %30 = arith.addf %29, %28 : vector<512x128xf32>
    %c0_23 = arith.constant 0 : index
    %c0_24 = arith.constant 0 : index
    %31 = vector.load %arg4[%c0_23, %c0_24] : memref<512x128xf32, #tpu.memory_space<vmem>>, vector<512x128xf32>
    tpu.vector_store %arg4[%c0_23, %c0_24], %30 {strides = array<i32>} : memref<512x128xf32, #tpu.memory_space<vmem>>, vector<512x128xf32>,
    return
  }
  func.func @transform_0(%arg0: i32) -> (i32, i32) {
    %c0_i32 = arith.constant 0 : i32
    %c0_i32_0 = arith.constant 0 : i32
    return %arg0, %c0_i32 : i32, i32
  }
  func.func @transform_1(%arg0: i32) -> (i32, i32, i32) {
    %c0_i32 = arith.constant 0 : i32
    %c0_i32_0 = arith.constant 0 : i32
    %c0_i32_1 = arith.constant 0 : i32
    %c0_i32_2 = arith.constant 0 : i32
    return %c0_i32, %c0_i32_0, %c0_i32_1 : i32, i32, i32
  }
  func.func @transform_2(%arg0: i32) -> (i32, i32, i32) {
    %c0_i32 = arith.constant 0 : i32
    %c0_i32_0 = arith.constant 0 : i32
    %c0_i32_1 = arith.constant 0 : i32
    %c0_i32_2 = arith.constant 0 : i32
    return %c0_i32, %c0_i32_0, %c0_i32_1 : i32, i32, i32
  }
  func.func @transform_3(%arg0: i32) -> (i32, i32) {
    %c0_i32 = arith.constant 0 : i32
    %c0_i32_0 = arith.constant 0 : i32
    return %arg0, %c0_i32 : i32, i32
  }
}

module attributes {stable_mosaic.version = 11 : i64} {
  func.func @_resident_kernel(%arg0: i32, %arg1: memref<512x128xf32, #tpu.memory_space<vmem>>, %arg2: memref<3x128x128xbf16, #tpu.memory_space<vmem>>, %arg3: memref<3x1x128xf32, #tpu.memory_space<vmem>>, %arg4: memref<512x128xf32, #tpu.memory_space<vmem>>) attributes {dimension_semantics = [#tpu.dimension_semantics<parallel>], iteration_bounds = array<i64: 1>, scalar_prefetch = 0 : i64, scratch_operands = 0 : i64, tpu.core_type = #tpu.core_type<tc>, window_params = [{transform_indices = @transform_0, window_bounds = array<i64: 512, 128>}, {pipeline_mode = #tpu.pipeline_mode<synchronous>, transform_indices = @transform_1, window_bounds = array<i64: 3, 128, 128>}, {pipeline_mode = #tpu.pipeline_mode<synchronous>, transform_indices = @transform_2, window_bounds = array<i64: 3, 1, 128>}, {transform_indices = @transform_3, window_bounds = array<i64: 512, 128>}]} {
    %c0 = arith.constant 0 : index
    %c0_0 = arith.constant 0 : index
    %0 = vector.load %arg1[%c0, %c0_0] : memref<512x128xf32, #tpu.memory_space<vmem>>, vector<512x128xf32>
    %1 = arith.truncf %0 : vector<512x128xf32> to vector<512x128xbf16>
    %c0_1 = arith.constant 0 : index
    %c0_2 = arith.constant 0 : index
    %c0_3 = arith.constant 0 : index
    %2 = vector.load %arg2[%c0_1, %c0_2, %c0_3] : memref<3x128x128xbf16, #tpu.memory_space<vmem>>, vector<1x128x128xbf16>
    %3 = vector.shape_cast %2 : vector<1x128x128xbf16> to vector<128x128xbf16>
    %cst = arith.constant dense<0.000000e+00> : vector<512x128xf32>
    %4 = tpu.matmul %1, %3, %cst {dimension_numbers = #tpu.dot_dimension_numbers<[1], [0], [0], [1], [0, 0, 1, 1], [], []>} : vector<512x128xbf16>, vector<128x128xbf16>, vector<512x128xf32> -> vector<512x128xf32>
    %c0_4 = arith.constant 0 : index
    %c0_5 = arith.constant 0 : index
    %c0_6 = arith.constant 0 : index
    %5 = vector.load %arg3[%c0_4, %c0_5, %c0_6] : memref<3x1x128xf32, #tpu.memory_space<vmem>>, vector<1x1x128xf32>
    %6 = vector.shape_cast %5 : vector<1x1x128xf32> to vector<1x128xf32>
    %7 = vector.broadcast %6 : vector<1x128xf32> to vector<512x128xf32>
    %8 = arith.addf %4, %7 : vector<512x128xf32>
    %cst_7 = arith.constant 0.000000e+00 : f32
    %9 = vector.broadcast %cst_7 : f32 to vector<512x128xf32>
    %10 = arith.maximumf %8, %9 : vector<512x128xf32>
    %11 = arith.truncf %10 : vector<512x128xf32> to vector<512x128xbf16>
    %c1 = arith.constant 1 : index
    %c0_8 = arith.constant 0 : index
    %c0_9 = arith.constant 0 : index
    %12 = vector.load %arg2[%c1, %c0_8, %c0_9] : memref<3x128x128xbf16, #tpu.memory_space<vmem>>, vector<1x128x128xbf16>
    %13 = vector.shape_cast %12 : vector<1x128x128xbf16> to vector<128x128xbf16>
    %cst_10 = arith.constant dense<0.000000e+00> : vector<512x128xf32>
    %14 = tpu.matmul %11, %13, %cst_10 {dimension_numbers = #tpu.dot_dimension_numbers<[1], [0], [0], [1], [0, 0, 1, 1], [], []>} : vector<512x128xbf16>, vector<128x128xbf16>, vector<512x128xf32> -> vector<512x128xf32>
    %c1_11 = arith.constant 1 : index
    %c0_12 = arith.constant 0 : index
    %c0_13 = arith.constant 0 : index
    %15 = vector.load %arg3[%c1_11, %c0_12, %c0_13] : memref<3x1x128xf32, #tpu.memory_space<vmem>>, vector<1x1x128xf32>
    %16 = vector.shape_cast %15 : vector<1x1x128xf32> to vector<1x128xf32>
    %17 = vector.broadcast %16 : vector<1x128xf32> to vector<512x128xf32>
    %18 = arith.addf %14, %17 : vector<512x128xf32>
    %cst_14 = arith.constant 0.000000e+00 : f32
    %19 = vector.broadcast %cst_14 : f32 to vector<512x128xf32>
    %20 = arith.maximumf %18, %19 : vector<512x128xf32>
    %21 = arith.truncf %20 : vector<512x128xf32> to vector<512x128xbf16>
    %c2 = arith.constant 2 : index
    %c0_15 = arith.constant 0 : index
    %c0_16 = arith.constant 0 : index
    %22 = vector.load %arg2[%c2, %c0_15, %c0_16] : memref<3x128x128xbf16, #tpu.memory_space<vmem>>, vector<1x128x128xbf16>
    %23 = vector.shape_cast %22 : vector<1x128x128xbf16> to vector<128x128xbf16>
    %cst_17 = arith.constant dense<0.000000e+00> : vector<512x128xf32>
    %24 = tpu.matmul %21, %23, %cst_17 {dimension_numbers = #tpu.dot_dimension_numbers<[1], [0], [0], [1], [0, 0, 1, 1], [], []>} : vector<512x128xbf16>, vector<128x128xbf16>, vector<512x128xf32> -> vector<512x128xf32>
    %c2_18 = arith.constant 2 : index
    %c0_19 = arith.constant 0 : index
    %c0_20 = arith.constant 0 : index
    %25 = vector.load %arg3[%c2_18, %c0_19, %c0_20] : memref<3x1x128xf32, #tpu.memory_space<vmem>>, vector<1x1x128xf32>
    %26 = vector.shape_cast %25 : vector<1x1x128xf32> to vector<1x128xf32>
    %27 = vector.broadcast %26 : vector<1x128xf32> to vector<512x128xf32>
    %28 = arith.addf %24, %27 : vector<512x128xf32>
    %c0_21 = arith.constant 0 : index
    %c0_22 = arith.constant 0 : index
    %29 = vector.load %arg1[%c0_21, %c0_22] : memref<512x128xf32, #tpu.memory_space<vmem>>, vector<512x128xf32>
    %30 = arith.addf %29, %28 : vector<512x128xf32>
    %c0_23 = arith.constant 0 : index
    %c0_24 = arith.constant 0 : index
    %31 = vector.load %arg4[%c0_23, %c0_24] : memref<512x128xf32, #tpu.memory_space<vmem>>, vector<512x128xf32>
    tpu.vector_store %arg4[%c0_23, %c0_24], %30 {strides = array<i32>} : memref<512x128xf32, #tpu.memory_space<vmem>>, vector<512x128xf32>,
    return
  }
  func.func @transform_0(%arg0: i32) -> (i32, i32) {
    %c0_i32 = arith.constant 0 : i32
    %c0_i32_0 = arith.constant 0 : i32
    return %arg0, %c0_i32 : i32, i32
  }
  func.func @transform_1(%arg0: i32) -> (i32, i32, i32) {
    %c0_i32 = arith.constant 0 : i32
    %c0_i32_0 = arith.constant 0 : i32
    %c0_i32_1 = arith.constant 0 : i32
    %c0_i32_2 = arith.constant 0 : i32
    return %c0_i32, %c0_i32_0, %c0_i32_1 : i32, i32, i32
  }
  func.func @transform_2(%arg0: i32) -> (i32, i32, i32) {
    %c0_i32 = arith.constant 0 : i32
    %c0_i32_0 = arith.constant 0 : i32
    %c0_i32_1 = arith.constant 0 : i32
    %c0_i32_2 = arith.constant 0 : i32
    return %c0_i32, %c0_i32_0, %c0_i32_1 : i32, i32, i32
  }
  func.func @transform_3(%arg0: i32) -> (i32, i32) {
    %c0_i32 = arith.constant 0 : i32
    %c0_i32_0 = arith.constant 0 : i32
    return %arg0, %c0_i32 : i32, i32
  }
}

</mosaic_0001>

<bundles_post_ra>
// kernel: tpu_custom_call.1
= control target key start
LH: loop header
LB: loop body
LE: loop exit
PB: predicated region body
PF: predicated region fallthrough
CT: control target
= control target key end

     0   :  { %8 = vsyncpa [#allocation3], 0  ;;  %s2446_s0 = inlined_call_operand.hbm [shape: f32[512,128], index: 0, kind: input, shape index: {}]   ;;  %s2447_s1 = inlined_call_operand.hbm [shape: bf16[3,128,128], index: 1, kind: input, shape index: {}]   ;;  %s2448_s2 = inlined_call_operand.vmem [shape: f32[3,1,128], index: 2, kind: input, shape index: {}]   ;;  %s2449_s3 = inlined_call_operand.hbm [shape: f32[512,128], index: 3, kind: output, shape index: {}]  }
   0x1   :  { %9 = vsyncpa [#allocation6], 0 }
   0x2   :  { %10 = vsyncpa [#allocation4], 0  ;;  %s2134_s12 = smov [#allocation2]   ;;  %s2062_s16 = scalar_lea.hbm %s2446_s0, 8192 }
   0x3   :  { %s16_s13 = sshll.u32 %s2134_s12, 4  ;;  %p2063_p0 = scmp.ne.s32.totalorder %s2446_s0, %s2062_s16  ;;  %s17_s13 = int_to_ptr.vmem [resolvable:$true] %s16_s13 }
   0x4   :  { %p2066_p1 = scmp.lt.u32.totalorder %s2062_s16, %s2446_s0 }
   0x6   :  { %p2068_p2 = pnand %p2066_p1, %p2063_p0 }
   0x8   :  { %2071 = shalt.err (!%p2068_p2)
}
   0x9   :  { %s2072_s21 = scalar_lea.vmem %s17_s13, 8192  ;;  %p2077_p4 = scmp.lt.s32.totalorder %s17_s13, %s17_s13 }
   0xa   :  { %p2073_p3 = scmp.ne.s32.totalorder %s17_s13, %s2072_s21  ;;  %p2078_p5 = scmp.lt.s32.totalorder %s2072_s21, %s2072_s21 }
   0xc   :  { %p2079_p6 = por %p2078_p5, %p2077_p4 }
   0xe   :  { %p2080_p7 = pnand %p2079_p6, %p2073_p3 }
  0x10   :  { %2083 = shalt.err (!%p2080_p7)
}
  0x11   :  { %s2135_s22 = smov 128   ;;  %s2136_s23 = smov 8  }
  0x12   :  { %22 = dma.hbm_to_vmem [thread:$0]  %s2446_s0, 8192, %s17_s13, [#allocation3], %s2135_s22, %s2135_s22, %s2136_s23  }
  0x13   :  { %s2137_s26 = smov [#allocation5]   ;;  %s2084_s30 = scalar_lea.hbm %s2447_s1, 3072 }
  0x14   :  { %s28_s27 = sshll.u32 %s2137_s26, 4  ;;  %p2085_p8 = scmp.ne.s32.totalorder %s2447_s1, %s2084_s30  ;;  %s29_s27 = int_to_ptr.vmem [resolvable:$true] %s28_s27 }
  0x15   :  { %p2088_p9 = scmp.lt.u32.totalorder %s2084_s30, %s2447_s1 }
  0x17   :  { %p2090_p10 = pnand %p2088_p9, %p2085_p8 }
  0x19   :  { %2093 = shalt.err (!%p2090_p10)
}
  0x1a   :  { %s2094_s8 = scalar_lea.vmem %s29_s27, 3072  ;;  %p2099_p12 = scmp.lt.s32.totalorder %s29_s27, %s29_s27 }
  0x1b   :  { %p2095_p11 = scmp.ne.s32.totalorder %s29_s27, %s2094_s8  ;;  %p2100_p13 = scmp.lt.s32.totalorder %s2094_s8, %s2094_s8 }
  0x1d   :  { %p2101_p0 = por %p2100_p13, %p2099_p12 }
  0x1f   :  { %p2102_p1 = pnand %p2101_p0, %p2095_p11 }
  0x21   :  { %2105 = shalt.err (!%p2102_p1)
}
  0x22   :  { %s2138_s0 = smov 64   ;;  %s2139_s9 = smov 4  }
  0x23   :  { %34 = dma.hbm_to_vmem [thread:$0]  %s2447_s1, 3072, %s29_s27, [#allocation6], %s2138_s0, %s2138_s0, %s2139_s9  }
  0x24   :  { %2128 = dma.done.wait [#allocation3], 8192  }
  0x25   :  { %2129 = vsyncadd [#allocation3], 4294959104 }
  0x26   :  { %2130 = dma.done.wait [#allocation6], 3072  }
  0x27   :  { %2131 = vsyncadd [#allocation6], 4294964224  ;;  %v1974_v0 = vld [vmem:[#allocation5] sm:$0xff]   ;;  %v1975_v1 = vld [vmem:[#allocation5 + $0x8] sm:$0xff]  }
  0x28   :  { %1711 = vmatprep.subr.bf16.mxu0 %v1974_v0  ;;  %1951 = vmatprep.subr.bf16.mxu1 %v1974_v0  ;;  %v1976_v2 = vld [vmem:[#allocation5 + $0x10] sm:$0xff]   ;;  %v1977_v3 = vld [vmem:[#allocation5 + $0x18] sm:$0xff]   ;;  %v44_v4 = vld [vmem:[#allocation2] sm:$0xff] }
  0x29   :  { %1712 = vmatpush3.bf16.msra.mxu0 %v1974_v0  ;;  %1959 = vmatpush3.bf16.msra.mxu1 %v1974_v0  ;;  %v45_v5 = vld [vmem:[#allocation2 + $0x8] sm:$0xff]  ;;  %v1978_v7 = vld [vmem:[#allocation5 + $0x20] sm:$0xff]   ;;  %v1980_v11 = vld [vmem:[#allocation5 + $0x30] sm:$0xff]  }
  0x2a   :  { %1713 = vmatprep.subr.bf16.mxu0 %v1975_v1  ;;  %1952 = vmatprep.subr.bf16.mxu1 %v1975_v1  ;;  %v108_v6 = vpack.c.bf16 %v45_v5, %v44_v4  ;;  %v1979_v8 = vld [vmem:[#allocation5 + $0x28] sm:$0xff]   ;;  %v76_v9 = vld [vmem:[#allocation2 + $0x100] sm:$0xff]  ;;  %v1981_v13 = vld [vmem:[#allocation5 + $0x38] sm:$0xff]  }
  0x2b   :  { %v77_v10 = vld [vmem:[#allocation2 + $0x108] sm:$0xff]  ;;  %v46_v14 = vld [vmem:[#allocation2 + $0x10] sm:$0xff]  ;;  %v47_v15 = vld [vmem:[#allocation2 + $0x18] sm:$0xff] }
  0x2c   :  { %1727 = vmatprep.mubr.bf16.mxu0 %v108_v6  ;;  %v124_v12 = vpack.c.bf16 %v77_v10, %v76_v9  ;;  %v48_v16 = vld [vmem:[#allocation2 + $0x20] sm:$0xff]  ;;  %v49_v17 = vld [vmem:[#allocation2 + $0x28] sm:$0xff]  ;;  %v78_v18 = vld [vmem:[#allocation2 + $0x110] sm:$0xff]  ;;  %v109_v22 = vpack.c.bf16 %v47_v15, %v46_v14 }
  0x2d   :  { %1714 = vmatpush3.bf16.msra.mxu0 %v1975_v1  ;;  %1960 = vmatpush3.bf16.msra.mxu1 %v1975_v1  ;;  %v79_v19 = vld [vmem:[#allocation2 + $0x118] sm:$0xff]  ;;  %v80_v20 = vld [vmem:[#allocation2 + $0x120] sm:$0xff]  ;;  %v81_v21 = vld [vmem:[#allocation2 + $0x128] sm:$0xff]  ;;  %v110_v24 = vpack.c.bf16 %v49_v17, %v48_v16 }
  0x2e   :  { %1715 = vmatprep.subr.bf16.mxu0 %v1976_v2  ;;  %1953 = vmatprep.subr.bf16.mxu1 %v1976_v2  ;;  %v1982_v23 = vld [vmem:[#allocation5 + $0x40] sm:$0xff]   ;;  %v125_v25 = vpack.c.bf16 %v79_v19, %v78_v18  ;;  %v126_v26 = vpack.c.bf16 %v81_v21, %v80_v20  ;;  %v50_v27 = vld [vmem:[#allocation2 + $0x30] sm:$0xff]  ;;  %v51_v28 = vld [vmem:[#allocation2 + $0x38] sm:$0xff] }
  0x2f   :  { %1759 = vmatprep.mubr.bf16.mxu1 %v124_v12  ;;  %v1983_v29 = vld [vmem:[#allocation5 + $0x48] sm:$0xff]   ;;  %v52_v30 = vld [vmem:[#allocation2 + $0x40] sm:$0xff]  ;;  %v82_v32 = vld [vmem:[#allocation2 + $0x130] sm:$0xff]  ;;  %v111_v37 = vpack.c.bf16 %v51_v28, %v50_v27 }
  0x30   :  { %v53_v31 = vld [vmem:[#allocation2 + $0x48] sm:$0xff]  ;;  %v83_v33 = vld [vmem:[#allocation2 + $0x138] sm:$0xff]  ;;  %v84_v34 = vld [vmem:[#allocation2 + $0x140] sm:$0xff] }
  0x31   :  { %1716 = vmatpush3.bf16.msra.mxu0 %v1976_v2  ;;  %1961 = vmatpush3.bf16.msra.mxu1 %v1976_v2  ;;  %v85_v35 = vld [vmem:[#allocation2 + $0x148] sm:$0xff]  ;;  %v1984_v36 = vld [vmem:[#allocation5 + $0x50] sm:$0xff]   ;;  %v112_v38 = vpack.c.bf16 %v53_v31, %v52_v30  ;;  %v127_v39 = vpack.c.bf16 %v83_v33, %v82_v32  ;;  %v1985_v40 = vld [vmem:[#allocation5 + $0x58] sm:$0xff]  }
  0x32   :  { %1717 = vmatprep.subr.bf16.mxu0 %v1977_v3  ;;  %1954 = vmatprep.subr.bf16.mxu1 %v1977_v3  ;;  %v128_v41 = vpack.c.bf16 %v85_v35, %v84_v34  ;;  %v54_v42 = vld [vmem:[#allocation2 + $0x50] sm:$0xff]  ;;  %v55_v43 = vld [vmem:[#allocation2 + $0x58] sm:$0xff]  ;;  %v56_v44 = vld [vmem:[#allocation2 + $0x60] sm:$0xff] }
  0x33   :  { %v57_v45 = vld [vmem:[#allocation2 + $0x68] sm:$0xff]  ;;  %v86_v46 = vld [vmem:[#allocation2 + $0x150] sm:$0xff]  ;;  %v87_v47 = vld [vmem:[#allocation2 + $0x158] sm:$0xff]  ;;  %v113_v51 = vpack.c.bf16 %v55_v43, %v54_v42 }
  0x34   :  { %v88_v48 = vld [vmem:[#allocation2 + $0x160] sm:$0xff]  ;;  %v89_v49 = vld [vmem:[#allocation2 + $0x168] sm:$0xff]  ;;  %v114_v52 = vpack.c.bf16 %v57_v45, %v56_v44  ;;  %v129_v53 = vpack.c.bf16 %v87_v47, %v86_v46  ;;  %v58_v56 = vld [vmem:[#allocation2 + $0x70] sm:$0xff] }
  0x35   :  { %1718 = vmatpush3.bf16.msra.mxu0 %v1977_v3  ;;  %1962 = vmatpush3.bf16.msra.mxu1 %v1977_v3  ;;  %v1986_v50 = vld [vmem:[#allocation5 + $0x60] sm:$0xff]   ;;  %v130_v54 = vpack.c.bf16 %v89_v49, %v88_v48  ;;  %v1987_v55 = vld [vmem:[#allocation5 + $0x68] sm:$0xff]   ;;  %v59_v57 = vld [vmem:[#allocation2 + $0x78] sm:$0xff] }
  0x36   :  { %1719 = vmatprep.subr.bf16.mxu0 %v1978_v7  ;;  %1955 = vmatprep.subr.bf16.mxu1 %v1978_v7  ;;  %v60_v58 = vld [vmem:[#allocation2 + $0x80] sm:$0xff]  ;;  %v61_v59 = vld [vmem:[#allocation2 + $0x88] sm:$0xff]  ;;  %v90_v60 = vld [vmem:[#allocation2 + $0x170] sm:$0xff]  ;;  %v115_v1 = vpack.c.bf16 %v59_v57, %v58_v56 }
  0x37   :  { %v91_v61 = vld [vmem:[#allocation2 + $0x178] sm:$0xff]  ;;  %v92_v62 = vld [vmem:[#allocation2 + $0x180] sm:$0xff]  ;;  %v93_v63 = vld [vmem:[#allocation2 + $0x188] sm:$0xff]  ;;  %v116_v2 = vpack.c.bf16 %v61_v59, %v60_v58 }
  0x38   :  { %v1988_v0 = vld [vmem:[#allocation5 + $0x70] sm:$0xff]   ;;  %v131_v3 = vpack.c.bf16 %v91_v61, %v90_v60  ;;  %v132_v4 = vpack.c.bf16 %v93_v63, %v92_v62  ;;  %v63_v6 = vld [vmem:[#allocation2 + $0x98] sm:$0xff]  ;;  %v97_v12 = vld [vmem:[#allocation2 + $0x1a8] sm:$0xff] }
  0x39   :  { %1720 = vmatpush3.bf16.msra.mxu0 %v1978_v7  ;;  %1963 = vmatpush3.bf16.msra.mxu1 %v1978_v7  ;;  %v62_v5 = vld [vmem:[#allocation2 + $0x90] sm:$0xff]  ;;  %v64_v7 = vld [vmem:[#allocation2 + $0xa0] sm:$0xff]  ;;  %v95_v10 = vld [vmem:[#allocation2 + $0x198] sm:$0xff] }
  0x3a   :  { %1721 = vmatprep.subr.bf16.mxu0 %v1979_v8  ;;  %1956 = vmatprep.subr.bf16.mxu1 %v1979_v8  ;;  %v94_v9 = vld [vmem:[#allocation2 + $0x190] sm:$0xff]  ;;  %v67_v18 = vld [vmem:[#allocation2 + $0xb8] sm:$0xff]  ;;  %v68_v19 = vld [vmem:[#allocation2 + $0xc0] sm:$0xff] }
  0x3b   :  { %v133_v15 = vpack.c.bf16 %v95_v10, %v94_v9  ;;  %v66_v17 = vld [vmem:[#allocation2 + $0xb0] sm:$0xff]  ;;  %v69_v20 = vld [vmem:[#allocation2 + $0xc8] sm:$0xff]  ;;  %v71_v30 = vld [vmem:[#allocation2 + $0xd8] sm:$0xff] }
  0x3c   :  { %v98_v21 = vld [vmem:[#allocation2 + $0x1b0] sm:$0xff]  ;;  %v72_v31 = vld [vmem:[#allocation2 + $0xe0] sm:$0xff]  ;;  %v73_v32 = vld [vmem:[#allocation2 + $0xe8] sm:$0xff] }
  0x3d   :  { %1722 = vmatpush3.bf16.msra.mxu0 %v1979_v8  ;;  %1964 = vmatpush3.bf16.msra.mxu1 %v1979_v8  ;;  %v65_v8 = vld [vmem:[#allocation2 + $0xa8] sm:$0xff]  ;;  %v102_v33 = vld [vmem:[#allocation2 + $0x1d0] sm:$0xff]  ;;  %v103_v34 = vld [vmem:[#allocation2 + $0x1d8] sm:$0xff] }
  0x3e   :  { %1723 = vmatprep.subr.bf16.mxu0 %v1980_v11  ;;  %1957 = vmatprep.subr.bf16.mxu1 %v1980_v11  ;;  %v118_v14 = vpack.c.bf16 %v65_v8, %v64_v7  ;;  %v104_v35 = vld [vmem:[#allocation2 + $0x1e0] sm:$0xff]  ;;  %v75_v42 = vld [vmem:[#allocation2 + $0xf8] sm:$0xff]  ;;  %v106_v43 = vld [vmem:[#allocation2 + $0x1f0] sm:$0xff] }
  0x3f   :  { %v107_v44 = vld [vmem:[#allocation2 + $0x1f8] sm:$0xff]  ;;  %v2191_v48 = vld [vmem:[%s2448_s2] ss:$0 sm:$0xff]  ;;  %v1991_v62 = vld [vmem:[#allocation5 + $0x88] sm:$0xff]  }
  0x40   :  { %v139_v46 = vpack.c.bf16 %v107_v44, %v106_v43  ;;  %v1989_v47 = vld [vmem:[#allocation5 + $0x78] sm:$0xff]   ;;  %v1990_v61 = vld [vmem:[#allocation5 + $0x80] sm:$0xff]  }
  0x41   :  { %1724 = vmatpush3.bf16.msra.mxu0 %v1980_v11  ;;  %1965 = vmatpush3.bf16.msra.mxu1 %v1980_v11  ;;  %v96_v11 = vld [vmem:[#allocation2 + $0x1a0] sm:$0xff] }
  0x42   :  { %1725 = vmatprep.subr.bf16.mxu0 %v1981_v13  ;;  %1958 = vmatprep.subr.bf16.mxu1 %v1981_v13  ;;  %v134_v16 = vpack.c.bf16 %v97_v12, %v96_v11  ;;  %v1992_v12 = vld [vmem:[#allocation5 + $0x90] sm:$0xff]  }
  0x45   :  { %1726 = vmatpush3.bf16.msra.mxu0 %v1981_v13  ;;  %1966 = vmatpush3.bf16.msra.mxu1 %v1981_v13  ;;  %v117_v13 = vpack.c.bf16 %v63_v6, %v62_v5 }
  0x46   :  { %1791 = vmatprep.subr.bf16.mxu1 %v1982_v23  ;;  %1871 = vmatprep.subr.bf16.mxu0 %v1990_v61 }
  0x48   :  { %1728 = vmatmul.mubr.bf16.vlgmr.msra.gmra.mrb[0].mxu0 %v109_v22  ;;  %1760 = vmatmul.mubr.bf16.vlgmr.msra.gmra.mrb[0].mxu1 %v125_v25  ;;  %v99_v22 = vld [vmem:[#allocation2 + $0x1b8] sm:$0xff]  ;;  %v119_v25 = vpack.c.bf16 %v67_v18, %v66_v17 }
  0x49   :  { %1731 = vmatprep.mubr.bf16.mxu0 %v110_v24  ;;  %1763 = vmatprep.mubr.bf16.mxu1 %v126_v26  ;;  %v101_v24 = vld [vmem:[#allocation2 + $0x1c8] sm:$0xff]  ;;  %v120_v26 = vpack.c.bf16 %v69_v20, %v68_v19  ;;  %v135_v27 = vpack.c.bf16 %v99_v22, %v98_v21 }
  0x4a   :  { %1792 = vmatpush3.bf16.msra.mxu1 %v1982_v23  ;;  %v100_v23 = vld [vmem:[#allocation2 + $0x1c0] sm:$0xff]  ;;  %1872 = vmatpush3.bf16.msra.mxu0 %v1990_v61 }
  0x4b   :  { %1793 = vmatprep.subr.bf16.mxu1 %v1983_v29  ;;  %v136_v28 = vpack.c.bf16 %v101_v24, %v100_v23  ;;  %1873 = vmatprep.subr.bf16.mxu0 %v1991_v62 }
  0x4e   :  { %1794 = vmatpush3.bf16.msra.mxu1 %v1983_v29  ;;  %v70_v29 = vld [vmem:[#allocation2 + $0xd0] sm:$0xff]  ;;  %1874 = vmatpush3.bf16.msra.mxu0 %v1991_v62 }
  0x4f   :  { %1795 = vmatprep.subr.bf16.mxu1 %v1984_v36  ;;  %1875 = vmatprep.subr.bf16.mxu0 %v1992_v12 }
  0x50   :  { %1732 = vmatmul.mubr.bf16.gmra.mrb[4].mxu0 %v111_v37  ;;  %1764 = vmatmul.mubr.bf16.gmra.mrb[4].mxu1 %v127_v39  ;;  %v121_v37 = vpack.c.bf16 %v71_v30, %v70_v29  ;;  %v137_v39 = vpack.c.bf16 %v103_v34, %v102_v33 }
  0x51   :  { %1735 = vmatprep.mubr.bf16.mxu0 %v112_v38  ;;  %1767 = vmatprep.mubr.bf16.mxu1 %v128_v41  ;;  %v122_v38 = vpack.c.bf16 %v73_v32, %v72_v31  ;;  %v74_v41 = vld [vmem:[#allocation2 + $0xf0] sm:$0xff] }
  0x52   :  { %1796 = vmatpush3.bf16.msra.mxu1 %v1984_v36  ;;  %v105_v36 = vld [vmem:[#allocation2 + $0x1e8] sm:$0xff]  ;;  %v123_v45 = vpack.c.bf16 %v75_v42, %v74_v41  ;;  %1876 = vmatpush3.bf16.msra.mxu0 %v1992_v12  ;;  %v1994_v42 = vld [vmem:[#allocation5 + $0xa0] sm:$0xff]  }
  0x53   :  { %1797 = vmatprep.subr.bf16.mxu1 %v1985_v40 }
  0x56   :  { %1798 = vmatpush3.bf16.msra.mxu1 %v1985_v40  ;;  %v138_v40 = vpack.c.bf16 %v105_v36, %v104_v35 }
  0x57   :  { %1799 = vmatprep.subr.bf16.mxu1 %v1986_v50 }
  0x58   :  { %1736 = vmatmul.mubr.bf16.gmra.mrb[8].mxu0 %v113_v51  ;;  %1768 = vmatmul.mubr.bf16.gmra.mrb[8].mxu1 %v129_v53 }
  0x59   :  { %1739 = vmatprep.mubr.bf16.mxu0 %v114_v52  ;;  %1771 = vmatprep.mubr.bf16.mxu1 %v130_v54 }
  0x5a   :  { %1800 = vmatpush3.bf16.msra.mxu1 %v1986_v50 }
  0x5b   :  { %1801 = vmatprep.subr.bf16.mxu1 %v1987_v55 }
  0x5e   :  { %1802 = vmatpush3.bf16.msra.mxu1 %v1987_v55 }
  0x5f   :  { %1803 = vmatprep.subr.bf16.mxu1 %v1988_v0 }
  0x60   :  { %1740 = vmatmul.mubr.bf16.gmra.mrb[12].mxu0 %v115_v1  ;;  %1772 = vmatmul.mubr.bf16.gmra.mrb[12].mxu1 %v131_v3 }
  0x61   :  { %1743 = vmatprep.mubr.bf16.mxu0 %v116_v2  ;;  %1775 = vmatprep.mubr.bf16.mxu1 %v132_v4 }
  0x62   :  { %1804 = vmatpush3.bf16.msra.mxu1 %v1988_v0 }
  0x63   :  { %1805 = vmatprep.subr.bf16.mxu1 %v1989_v47 }
  0x66   :  { %1806 = vmatpush3.bf16.msra.mxu1 %v1989_v47 }
  0x68   :  { %1744 = vmatmul.mubr.bf16.gmra.mrb[16].mxu0 %v117_v13  ;;  %1776 = vmatmul.mubr.bf16.gmra.mrb[16].mxu1 %v133_v15 }
  0x69   :  { %1747 = vmatprep.mubr.bf16.mxu0 %v118_v14  ;;  %1779 = vmatprep.mubr.bf16.mxu1 %v134_v16 }
  0x70   :  { %1748 = vmatmul.mubr.bf16.gmra.mrb[20].mxu0 %v119_v25  ;;  %1780 = vmatmul.mubr.bf16.gmra.mrb[20].mxu1 %v135_v27 }
  0x71   :  { %1751 = vmatprep.mubr.bf16.mxu0 %v120_v26  ;;  %1783 = vmatprep.mubr.bf16.mxu1 %v136_v28  ;;  %v1993_v28 = vld [vmem:[#allocation5 + $0x98] sm:$0xff]  }
  0x72   :  { %1877 = vmatprep.subr.bf16.mxu0 %v1993_v28 }
  0x73   :  { %1878 = vmatpush3.bf16.msra.mxu0 %v1993_v28 }
  0x74   :  { %1879 = vmatprep.subr.bf16.mxu0 %v1994_v42 }
  0x77   :  { %1880 = vmatpush3.bf16.msra.mxu0 %v1994_v42 }
  0x78   :  { %1752 = vmatmul.mubr.bf16.gmra.mrb[24].mxu0 %v121_v37  ;;  %1784 = vmatmul.mubr.bf16.gmra.mrb[24].mxu1 %v137_v39 }
  0x79   :  { %1755 = vmatprep.mubr.bf16.mxu0 %v122_v38  ;;  %1787 = vmatprep.mubr.bf16.mxu1 %v138_v40 }
  0x80   :  { %1756 = vmatmul.mubr.bf16.gmra.mrb[28].mxu0 %v123_v45  ;;  %1788 = vmatmul.mubr.bf16.gmra.mrb[28].mxu1 %v139_v46 }
 0x11b   :  { %v1729_v49 = vpop.f32.mrb[0].mxu0  ;;  %v1761_v52 = vpop.f32.mrb[0].mxu1 }
 0x11c   :  { %v254_v50 = vadd.f32 %v1729_v49, %v2191_v48  ;;  %v245_v51 = vpop.f32.mrb[1].mxu0  ;;  %v382_v55 = vadd.f32 %v1761_v52, %v2191_v48  ;;  %v373_v56 = vpop.f32.mrb[1].mxu1 }
 0x11d   :  { %v246_v53 = vadd.f32 %v2191_v48, %v245_v51  ;;  %v1730_v54 = vpop.f32.mrb[2].mxu0  ;;  %v374_v59 = vadd.f32 %v2191_v48, %v373_v56  ;;  %v1762_v60 = vpop.f32.mrb[2].mxu1 }
 0x11e   :  { %v257_v57 = vadd.f32 %v1730_v54, %v2191_v48  ;;  %v248_v58 = vpop.f32.mrb[3].mxu0  ;;  %v534_v0 = vmax.f32 %v382_v55, 0.0  ;;  %v385_v1 = vadd.f32 %v1762_v60, %v2191_v48  ;;  %v376_v2 = vpop.f32.mrb[3].mxu1  ;;  %v502_v3 = vmax.f32 %v254_v50, 0.0 }
 0x11f   :  { %v249_v63 = vadd.f32 %v2191_v48, %v248_v58  ;;  %v532_v5 = vmax.f32 %v374_v59, 0.0  ;;  %v377_v6 = vadd.f32 %v2191_v48, %v376_v2  ;;  %v500_v7 = vmax.f32 %v246_v53, 0.0  ;;  %v1995_v59 = vld [vmem:[#allocation5 + $0xa8] sm:$0xff]  }
 0x120   :  { %v503_v4 = vmax.f32 %v257_v57, 0.0  ;;  %v535_v9 = vmax.f32 %v385_v1, 0.0  ;;  %1881 = vmatprep.subr.bf16.mxu0 %v1995_v59 }
 0x121   :  { %v501_v8 = vmax.f32 %v249_v63, 0.0  ;;  %v533_v11 = vmax.f32 %v377_v6, 0.0  ;;  %1882 = vmatpush3.bf16.msra.mxu0 %v1995_v59 }
 0x122   :  { %v565_v10 = vpack.c.bf16 %v503_v4, %v502_v3  ;;  %v2201_v15 = vpack.c.bf16 %v535_v9, %v534_v0  ;;  %v1996_v9 = vld [vmem:[#allocation5 + $0xb0] sm:$0xff]  }
 0x123   :  { %v564_v13 = vpack.c.bf16 %v501_v8, %v500_v7  ;;  %v1733_v14 = vpop.f32.mrb[4].mxu0  ;;  %v2204_v18 = vpack.c.bf16 %v533_v11, %v532_v5  ;;  %v1765_v19 = vpop.f32.mrb[4].mxu1  ;;  %1883 = vmatprep.subr.bf16.mxu0 %v1996_v9 }
 0x124   :  { %v270_v16 = vadd.f32 %v1733_v14, %v2191_v48  ;;  %v261_v17 = vpop.f32.mrb[5].mxu0  ;;  %v398_v22 = vadd.f32 %v1765_v19, %v2191_v48  ;;  %v389_v23 = vpop.f32.mrb[5].mxu1 }
 0x125   :  { %v262_v20 = vadd.f32 %v2191_v48, %v261_v17  ;;  %v1734_v21 = vpop.f32.mrb[6].mxu0  ;;  %1807 = vmatprep.mubr.bf16.mxu1 %v564_v13  ;;  %v390_v26 = vadd.f32 %v2191_v48, %v389_v23  ;;  %v1766_v27 = vpop.f32.mrb[6].mxu1  ;;  %1884 = vmatpush3.bf16.msra.mxu0 %v1996_v9 }
 0x126   :  { %v273_v24 = vadd.f32 %v1734_v21, %v2191_v48  ;;  %v264_v25 = vpop.f32.mrb[7].mxu0  ;;  %1808 = vmatmul.mubr.bf16.vlgmr.msra.gmra.mrb[32].mxu1 %v565_v10  ;;  %v538_v30 = vmax.f32 %v398_v22, 0.0  ;;  %v401_v31 = vadd.f32 %v1766_v27, %v2191_v48  ;;  %v392_v32 = vpop.f32.mrb[7].mxu1  ;;  %v506_v33 = vmax.f32 %v270_v16, 0.0 }
 0x127   :  { %v265_v29 = vadd.f32 %v2191_v48, %v264_v25  ;;  %v536_v35 = vmax.f32 %v390_v26, 0.0  ;;  %v393_v36 = vadd.f32 %v2191_v48, %v392_v32  ;;  %v504_v37 = vmax.f32 %v262_v20, 0.0 }
 0x128   :  { %v507_v34 = vmax.f32 %v273_v24, 0.0  ;;  %v539_v39 = vmax.f32 %v401_v31, 0.0 }
 0x129   :  { %v505_v38 = vmax.f32 %v265_v29, 0.0  ;;  %v537_v41 = vmax.f32 %v393_v36, 0.0 }
 0x12a   :  { %v567_v40 = vpack.c.bf16 %v507_v34, %v506_v33  ;;  %v2213_v45 = vpack.c.bf16 %v539_v39, %v538_v30 }
 0x12b   :  { %v566_v43 = vpack.c.bf16 %v505_v38, %v504_v37  ;;  %v1737_v44 = vpop.f32.mrb[8].mxu0  ;;  %v2216_v49 = vpack.c.bf16 %v537_v41, %v536_v35  ;;  %v1769_v50 = vpop.f32.mrb[8].mxu1 }
 0x12c   :  { %v286_v46 = vadd.f32 %v1737_v44, %v2191_v48  ;;  %v277_v47 = vpop.f32.mrb[9].mxu0  ;;  %v414_v53 = vadd.f32 %v1769_v50, %v2191_v48  ;;  %v405_v54 = vpop.f32.mrb[9].mxu1 }
 0x12d   :  { %v278_v51 = vadd.f32 %v2191_v48, %v277_v47  ;;  %v1738_v52 = vpop.f32.mrb[10].mxu0  ;;  %1811 = vmatprep.mubr.bf16.mxu1 %v566_v43  ;;  %v406_v57 = vadd.f32 %v2191_v48, %v405_v54  ;;  %v1770_v58 = vpop.f32.mrb[10].mxu1 }
 0x12e   :  { %v289_v55 = vadd.f32 %v1738_v52, %v2191_v48  ;;  %v280_v56 = vpop.f32.mrb[11].mxu0  ;;  %1812 = vmatmul.mubr.bf16.gmra.mrb[36].mxu1 %v567_v40  ;;  %v542_v61 = vmax.f32 %v414_v53, 0.0  ;;  %v417_v62 = vadd.f32 %v1770_v58, %v2191_v48  ;;  %v408_v63 = vpop.f32.mrb[11].mxu1  ;;  %v510_v0 = vmax.f32 %v286_v46, 0.0 }
 0x12f   :  { %v281_v60 = vadd.f32 %v2191_v48, %v280_v56  ;;  %v540_v2 = vmax.f32 %v406_v57, 0.0  ;;  %v409_v3 = vadd.f32 %v2191_v48, %v408_v63  ;;  %v508_v4 = vmax.f32 %v278_v51, 0.0 }
 0x130   :  { %v511_v1 = vmax.f32 %v289_v55, 0.0  ;;  %v543_v6 = vmax.f32 %v417_v62, 0.0 }
 0x131   :  { %v509_v5 = vmax.f32 %v281_v60, 0.0  ;;  %v541_v8 = vmax.f32 %v409_v3, 0.0 }
 0x132   :  { %v569_v7 = vpack.c.bf16 %v511_v1, %v510_v0  ;;  %v2225_v12 = vpack.c.bf16 %v543_v6, %v542_v61 }
 0x133   :  { %v568_v10 = vpack.c.bf16 %v509_v5, %v508_v4  ;;  %v1741_v11 = vpop.f32.mrb[12].mxu0  ;;  %v2228_v16 = vpack.c.bf16 %v541_v8, %v540_v2  ;;  %v1773_v17 = vpop.f32.mrb[12].mxu1 }
 0x134   :  { %v302_v13 = vadd.f32 %v1741_v11, %v2191_v48  ;;  %v293_v14 = vpop.f32.mrb[13].mxu0  ;;  %v430_v21 = vadd.f32 %v1773_v17, %v2191_v48  ;;  %v421_v22 = vpop.f32.mrb[13].mxu1 }
 0x135   :  { %v294_v19 = vadd.f32 %v2191_v48, %v293_v14  ;;  %v1742_v20 = vpop.f32.mrb[14].mxu0  ;;  %1815 = vmatprep.mubr.bf16.mxu1 %v568_v10  ;;  %v422_v25 = vadd.f32 %v2191_v48, %v421_v22  ;;  %v1774_v26 = vpop.f32.mrb[14].mxu1 }
 0x136   :  { %v305_v23 = vadd.f32 %v1742_v20, %v2191_v48  ;;  %v296_v24 = vpop.f32.mrb[15].mxu0  ;;  %1816 = vmatmul.mubr.bf16.gmra.mrb[40].mxu1 %v569_v7  ;;  %v546_v28 = vmax.f32 %v430_v21, 0.0  ;;  %v433_v29 = vadd.f32 %v1774_v26, %v2191_v48  ;;  %v424_v30 = vpop.f32.mrb[15].mxu1  ;;  %v514_v31 = vmax.f32 %v302_v13, 0.0 }
 0x137   :  { %v297_v27 = vadd.f32 %v2191_v48, %v296_v24  ;;  %v544_v33 = vmax.f32 %v422_v25, 0.0  ;;  %v425_v34 = vadd.f32 %v2191_v48, %v424_v30  ;;  %v512_v35 = vmax.f32 %v294_v19, 0.0 }
 0x138   :  { %v515_v32 = vmax.f32 %v305_v23, 0.0  ;;  %v547_v37 = vmax.f32 %v433_v29, 0.0 }
 0x139   :  { %v513_v36 = vmax.f32 %v297_v27, 0.0  ;;  %v545_v39 = vmax.f32 %v425_v34, 0.0 }
 0x13a   :  { %v571_v38 = vpack.c.bf16 %v515_v32, %v514_v31  ;;  %v2237_v42 = vpack.c.bf16 %v547_v37, %v546_v28 }
 0x13b   :  { %v570_v40 = vpack.c.bf16 %v513_v36, %v512_v35  ;;  %v1745_v41 = vpop.f32.mrb[16].mxu0  ;;  %v2240_v46 = vpack.c.bf16 %v545_v39, %v544_v33  ;;  %v1777_v47 = vpop.f32.mrb[16].mxu1 }
 0x13c   :  { %v318_v43 = vadd.f32 %v1745_v41, %v2191_v48  ;;  %v309_v44 = vpop.f32.mrb[17].mxu0  ;;  %v446_v52 = vadd.f32 %v1777_v47, %v2191_v48  ;;  %v437_v53 = vpop.f32.mrb[17].mxu1 }
 0x13d   :  { %v310_v50 = vadd.f32 %v2191_v48, %v309_v44  ;;  %v1746_v51 = vpop.f32.mrb[18].mxu0  ;;  %1819 = vmatprep.mubr.bf16.mxu1 %v570_v40  ;;  %v438_v56 = vadd.f32 %v2191_v48, %v437_v53  ;;  %v1778_v57 = vpop.f32.mrb[18].mxu1 }
 0x13e   :  { %v321_v54 = vadd.f32 %v1746_v51, %v2191_v48  ;;  %v312_v55 = vpop.f32.mrb[19].mxu0  ;;  %1820 = vmatmul.mubr.bf16.gmra.mrb[44].mxu1 %v571_v38  ;;  %v550_v59 = vmax.f32 %v446_v52, 0.0  ;;  %v449_v60 = vadd.f32 %v1778_v57, %v2191_v48  ;;  %v440_v61 = vpop.f32.mrb[19].mxu1  ;;  %v518_v62 = vmax.f32 %v318_v43, 0.0 }
 0x13f   :  { %v313_v58 = vadd.f32 %v2191_v48, %v312_v55  ;;  %v548_v0 = vmax.f32 %v438_v56, 0.0  ;;  %v441_v1 = vadd.f32 %v2191_v48, %v440_v61  ;;  %v516_v2 = vmax.f32 %v310_v50, 0.0 }
 0x140   :  { %v519_v63 = vmax.f32 %v321_v54, 0.0  ;;  %v551_v4 = vmax.f32 %v449_v60, 0.0 }
 0x141   :  { %v517_v3 = vmax.f32 %v313_v58, 0.0  ;;  %v549_v6 = vmax.f32 %v441_v1, 0.0 }
 0x142   :  { %v573_v5 = vpack.c.bf16 %v519_v63, %v518_v62  ;;  %v2249_v9 = vpack.c.bf16 %v551_v4, %v550_v59 }
 0x143   :  { %v572_v7 = vpack.c.bf16 %v517_v3, %v516_v2  ;;  %v1749_v8 = vpop.f32.mrb[20].mxu0  ;;  %v2252_v13 = vpack.c.bf16 %v549_v6, %v548_v0  ;;  %v1781_v14 = vpop.f32.mrb[20].mxu1 }
 0x144   :  { %v334_v10 = vadd.f32 %v1749_v8, %v2191_v48  ;;  %v325_v11 = vpop.f32.mrb[21].mxu0  ;;  %v462_v20 = vadd.f32 %v1781_v14, %v2191_v48  ;;  %v453_v21 = vpop.f32.mrb[21].mxu1 }
 0x145   :  { %v326_v17 = vadd.f32 %v2191_v48, %v325_v11  ;;  %v1750_v19 = vpop.f32.mrb[22].mxu0  ;;  %1823 = vmatprep.mubr.bf16.mxu1 %v572_v7  ;;  %v454_v24 = vadd.f32 %v2191_v48, %v453_v21  ;;  %v1782_v25 = vpop.f32.mrb[22].mxu1 }
 0x146   :  { %v337_v22 = vadd.f32 %v1750_v19, %v2191_v48  ;;  %v328_v23 = vpop.f32.mrb[23].mxu0  ;;  %1824 = vmatmul.mubr.bf16.gmra.mrb[48].mxu1 %v573_v5  ;;  %v554_v27 = vmax.f32 %v462_v20, 0.0  ;;  %v465_v28 = vadd.f32 %v1782_v25, %v2191_v48  ;;  %v456_v29 = vpop.f32.mrb[23].mxu1  ;;  %v522_v30 = vmax.f32 %v334_v10, 0.0 }
 0x147   :  { %v329_v26 = vadd.f32 %v2191_v48, %v328_v23  ;;  %v552_v32 = vmax.f32 %v454_v24, 0.0  ;;  %v457_v33 = vadd.f32 %v2191_v48, %v456_v29  ;;  %v520_v34 = vmax.f32 %v326_v17, 0.0 }
 0x148   :  { %v523_v31 = vmax.f32 %v337_v22, 0.0  ;;  %v555_v36 = vmax.f32 %v465_v28, 0.0 }
 0x149   :  { %v521_v35 = vmax.f32 %v329_v26, 0.0  ;;  %v553_v38 = vmax.f32 %v457_v33, 0.0 }
 0x14a   :  { %v575_v37 = vpack.c.bf16 %v523_v31, %v522_v30  ;;  %v2261_v41 = vpack.c.bf16 %v555_v36, %v554_v27 }
 0x14b   :  { %v574_v39 = vpack.c.bf16 %v521_v35, %v520_v34  ;;  %v1753_v40 = vpop.f32.mrb[24].mxu0  ;;  %v2264_v47 = vpack.c.bf16 %v553_v38, %v552_v32  ;;  %v1785_v50 = vpop.f32.mrb[24].mxu1 }
 0x14c   :  { %v350_v43 = vadd.f32 %v1753_v40, %v2191_v48  ;;  %v341_v44 = vpop.f32.mrb[25].mxu0  ;;  %v478_v53 = vadd.f32 %v1785_v50, %v2191_v48  ;;  %v469_v54 = vpop.f32.mrb[25].mxu1 }
 0x14d   :  { %v342_v51 = vadd.f32 %v2191_v48, %v341_v44  ;;  %v1754_v52 = vpop.f32.mrb[26].mxu0  ;;  %1827 = vmatprep.mubr.bf16.mxu1 %v574_v39  ;;  %v470_v57 = vadd.f32 %v2191_v48, %v469_v54  ;;  %v1786_v58 = vpop.f32.mrb[26].mxu1 }
 0x14e   :  { %v353_v55 = vadd.f32 %v1754_v52, %v2191_v48  ;;  %v344_v56 = vpop.f32.mrb[27].mxu0  ;;  %1828 = vmatmul.mubr.bf16.gmra.mrb[52].mxu1 %v575_v37  ;;  %v558_v60 = vmax.f32 %v478_v53, 0.0  ;;  %v481_v61 = vadd.f32 %v1786_v58, %v2191_v48  ;;  %v472_v62 = vpop.f32.mrb[27].mxu1  ;;  %v526_v63 = vmax.f32 %v350_v43, 0.0 }
 0x14f   :  { %v345_v59 = vadd.f32 %v2191_v48, %v344_v56  ;;  %v556_v1 = vmax.f32 %v470_v57, 0.0  ;;  %v473_v2 = vadd.f32 %v2191_v48, %v472_v62  ;;  %v524_v3 = vmax.f32 %v342_v51, 0.0 }
 0x150   :  { %v527_v0 = vmax.f32 %v353_v55, 0.0  ;;  %v559_v5 = vmax.f32 %v481_v61, 0.0 }
 0x151   :  { %v525_v4 = vmax.f32 %v345_v59, 0.0  ;;  %v557_v7 = vmax.f32 %v473_v2, 0.0 }
 0x152   :  { %v577_v6 = vpack.c.bf16 %v527_v0, %v526_v63  ;;  %v593_v11 = vpack.c.bf16 %v559_v5, %v558_v60 }
 0x153   :  { %v576_v8 = vpack.c.bf16 %v525_v4, %v524_v3  ;;  %v1757_v10 = vpop.f32.mrb[28].mxu0  ;;  %v592_v19 = vpack.c.bf16 %v557_v7, %v556_v1  ;;  %v1789_v20 = vpop.f32.mrb[28].mxu1 }
 0x154   :  { %v366_v14 = vadd.f32 %v1757_v10, %v2191_v48  ;;  %v357_v17 = vpop.f32.mrb[29].mxu0  ;;  %v494_v23 = vadd.f32 %v1789_v20, %v2191_v48  ;;  %v485_v24 = vpop.f32.mrb[29].mxu1 }
 0x155   :  { %v358_v21 = vadd.f32 %v2191_v48, %v357_v17  ;;  %v1758_v22 = vpop.f32.mrb[30].mxu0  ;;  %1831 = vmatprep.mubr.bf16.mxu1 %v576_v8  ;;  %v486_v27 = vadd.f32 %v2191_v48, %v485_v24  ;;  %v1790_v28 = vpop.f32.mrb[30].mxu1 }
 0x156   :  { %v369_v25 = vadd.f32 %v1758_v22, %v2191_v48  ;;  %v360_v26 = vpop.f32.mrb[31].mxu0  ;;  %1832 = vmatmul.mubr.bf16.gmra.mrb[56].mxu1 %v577_v6  ;;  %v562_v30 = vmax.f32 %v494_v23, 0.0  ;;  %v497_v31 = vadd.f32 %v1790_v28, %v2191_v48  ;;  %v488_v32 = vpop.f32.mrb[31].mxu1  ;;  %v530_v33 = vmax.f32 %v366_v14, 0.0 }
 0x157   :  { %v361_v29 = vadd.f32 %v2191_v48, %v360_v26  ;;  %v560_v35 = vmax.f32 %v486_v27, 0.0  ;;  %v489_v36 = vadd.f32 %v2191_v48, %v488_v32  ;;  %v528_v37 = vmax.f32 %v358_v21, 0.0  ;;  %v1997_v48 = vld [vmem:[#allocation5 + $0xb8] sm:$0xff]  }
 0x158   :  { %v531_v34 = vmax.f32 %v369_v25, 0.0  ;;  %v563_v39 = vmax.f32 %v497_v31, 0.0  ;;  %1885 = vmatprep.subr.bf16.mxu0 %v1997_v48 }
 0x159   :  { %v529_v38 = vmax.f32 %v361_v29, 0.0  ;;  %v561_v43 = vmax.f32 %v489_v36, 0.0  ;;  %1886 = vmatpush3.bf16.msra.mxu0 %v1997_v48 }
 0x15a   :  { %v579_v40 = vpack.c.bf16 %v531_v34, %v530_v33  ;;  %v595_v50 = vpack.c.bf16 %v563_v39, %v562_v30 }
 0x15b   :  { %v578_v44 = vpack.c.bf16 %v529_v38, %v528_v37  ;;  %v594_v51 = vpack.c.bf16 %v561_v43, %v560_v35 }
 0x15d   :  { %1835 = vmatprep.mubr.bf16.mxu1 %v578_v44 }
 0x15e   :  { %1836 = vmatmul.mubr.bf16.gmra.mrb[60].mxu1 %v579_v40 }
 0x15f   :  { %1839 = vmatprep.mubr.bf16.mxu1 %v2204_v18 }
 0x166   :  { %1840 = vmatmul.mubr.bf16.gmra.mrb[64].mxu1 %v2201_v15  ;;  %v2296_v15 = vld [vmem:[%s2448_s2 + $0x1] ss:$0 sm:$0xff] }
 0x167   :  { %1843 = vmatprep.mubr.bf16.mxu1 %v2216_v49 }
 0x16e   :  { %1844 = vmatmul.mubr.bf16.gmra.mrb[68].mxu1 %v2213_v45 }
 0x16f   :  { %1847 = vmatprep.mubr.bf16.mxu1 %v2228_v16 }
 0x176   :  { %1848 = vmatmul.mubr.bf16.gmra.mrb[72].mxu1 %v2225_v12 }
 0x177   :  { %1851 = vmatprep.mubr.bf16.mxu1 %v2240_v46 }
 0x17e   :  { %1852 = vmatmul.mubr.bf16.gmra.mrb[76].mxu1 %v2237_v42 }
 0x17f   :  { %1855 = vmatprep.mubr.bf16.mxu1 %v2252_v13 }
 0x186   :  { %1856 = vmatmul.mubr.bf16.gmra.mrb[80].mxu1 %v2249_v9 }
 0x187   :  { %1859 = vmatprep.mubr.bf16.mxu1 %v2264_v47 }
 0x18e   :  { %1860 = vmatmul.mubr.bf16.gmra.mrb[84].mxu1 %v2261_v41 }
 0x18f   :  { %1863 = vmatprep.mubr.bf16.mxu1 %v592_v19 }
 0x196   :  { %1864 = vmatmul.mubr.bf16.gmra.mrb[88].mxu1 %v593_v11 }
 0x197   :  { %1867 = vmatprep.mubr.bf16.mxu1 %v594_v51 }
 0x19e   :  { %1868 = vmatmul.mubr.bf16.gmra.mrb[92].mxu1 %v595_v50 }
 0x1f9   :  { %v1809_v18 = vpop.f32.mrb[32].mxu1 }
 0x1fa   :  { %v712_v45 = vadd.f32 %v1809_v18, %v2296_v15  ;;  %v703_v49 = vpop.f32.mrb[33].mxu1 }
 0x1fb   :  { %v704_v12 = vadd.f32 %v2296_v15, %v703_v49  ;;  %v1810_v16 = vpop.f32.mrb[34].mxu1 }
 0x1fc   :  { %v715_v42 = vadd.f32 %v1810_v16, %v2296_v15  ;;  %v706_v46 = vpop.f32.mrb[35].mxu1  ;;  %v960_v13 = vmax.f32 %v712_v45, 0.0 }
 0x1fd   :  { %v707_v9 = vadd.f32 %v2296_v15, %v706_v46  ;;  %v958_v47 = vmax.f32 %v704_v12, 0.0 }
 0x1fe   :  { %v961_v41 = vmax.f32 %v715_v42, 0.0 }
 0x1ff   :  { %v959_v52 = vmax.f32 %v707_v9, 0.0 }
 0x200   :  { %v1023_v53 = vpack.c.bf16 %v961_v41, %v960_v13 }
 0x201   :  { %v1022_v54 = vpack.c.bf16 %v959_v52, %v958_v47  ;;  %v1813_v55 = vpop.f32.mrb[36].mxu1 }
 0x202   :  { %v728_v56 = vadd.f32 %v1813_v55, %v2296_v15  ;;  %v719_v57 = vpop.f32.mrb[37].mxu1 }
 0x203   :  { %v720_v58 = vadd.f32 %v2296_v15, %v719_v57  ;;  %v1814_v59 = vpop.f32.mrb[38].mxu1  ;;  %1887 = vmatprep.mubr.bf16.mxu0 %v1022_v54 }
 0x204   :  { %v731_v60 = vadd.f32 %v1814_v59, %v2296_v15  ;;  %v722_v61 = vpop.f32.mrb[39].mxu1  ;;  %1888 = vmatmul.mubr.bf16.vlgmr.msra.gmra.mrb[32].mxu0 %v1023_v53  ;;  %v964_v63 = vmax.f32 %v728_v56, 0.0 }
 0x205   :  { %v723_v62 = vadd.f32 %v2296_v15, %v722_v61  ;;  %v962_v1 = vmax.f32 %v720_v58, 0.0 }
 0x206   :  { %v965_v0 = vmax.f32 %v731_v60, 0.0 }
 0x207   :  { %v963_v2 = vmax.f32 %v723_v62, 0.0 }
 0x208   :  { %v1025_v3 = vpack.c.bf16 %v965_v0, %v964_v63 }
 0x209   :  { %v1024_v4 = vpack.c.bf16 %v963_v2, %v962_v1  ;;  %v1817_v5 = vpop.f32.mrb[40].mxu1 }
 0x20a   :  { %v744_v6 = vadd.f32 %v1817_v5, %v2296_v15  ;;  %v735_v7 = vpop.f32.mrb[41].mxu1 }
 0x20b   :  { %v736_v8 = vadd.f32 %v2296_v15, %v735_v7  ;;  %v1818_v10 = vpop.f32.mrb[42].mxu1  ;;  %1891 = vmatprep.mubr.bf16.mxu0 %v1024_v4 }
 0x20c   :  { %v747_v11 = vadd.f32 %v1818_v10, %v2296_v15  ;;  %v738_v14 = vpop.f32.mrb[43].mxu1  ;;  %1892 = vmatmul.mubr.bf16.gmra.mrb[36].mxu0 %v1025_v3  ;;  %v968_v19 = vmax.f32 %v744_v6, 0.0 }
 0x20d   :  { %v739_v17 = vadd.f32 %v2296_v15, %v738_v14  ;;  %v966_v21 = vmax.f32 %v736_v8, 0.0 }
 0x20e   :  { %v969_v20 = vmax.f32 %v747_v11, 0.0 }
 0x20f   :  { %v967_v22 = vmax.f32 %v739_v17, 0.0 }
 0x210   :  { %v1027_v23 = vpack.c.bf16 %v969_v20, %v968_v19 }
 0x211   :  { %v1026_v24 = vpack.c.bf16 %v967_v22, %v966_v21  ;;  %v1821_v25 = vpop.f32.mrb[44].mxu1 }
 0x212   :  { %v760_v26 = vadd.f32 %v1821_v25, %v2296_v15  ;;  %v751_v27 = vpop.f32.mrb[45].mxu1 }
 0x213   :  { %v752_v28 = vadd.f32 %v2296_v15, %v751_v27  ;;  %v1822_v29 = vpop.f32.mrb[46].mxu1  ;;  %1895 = vmatprep.mubr.bf16.mxu0 %v1026_v24 }
 0x214   :  { %v763_v30 = vadd.f32 %v1822_v29, %v2296_v15  ;;  %v754_v31 = vpop.f32.mrb[47].mxu1  ;;  %1896 = vmatmul.mubr.bf16.gmra.mrb[40].mxu0 %v1027_v23  ;;  %v972_v33 = vmax.f32 %v760_v26, 0.0 }
 0x215   :  { %v755_v32 = vadd.f32 %v2296_v15, %v754_v31  ;;  %v970_v35 = vmax.f32 %v752_v28, 0.0 }
 0x216   :  { %v973_v34 = vmax.f32 %v763_v30, 0.0 }
 0x217   :  { %v971_v36 = vmax.f32 %v755_v32, 0.0 }
 0x218   :  { %v1029_v37 = vpack.c.bf16 %v973_v34, %v972_v33 }
 0x219   :  { %v1028_v38 = vpack.c.bf16 %v971_v36, %v970_v35  ;;  %v1825_v39 = vpop.f32.mrb[48].mxu1 }
 0x21a   :  { %v776_v40 = vadd.f32 %v1825_v39, %v2296_v15  ;;  %v767_v43 = vpop.f32.mrb[49].mxu1 }
 0x21b   :  { %v768_v44 = vadd.f32 %v2296_v15, %v767_v43  ;;  %v1826_v50 = vpop.f32.mrb[50].mxu1  ;;  %1899 = vmatprep.mubr.bf16.mxu0 %v1028_v38 }
 0x21c   :  { %v779_v51 = vadd.f32 %v1826_v50, %v2296_v15  ;;  %v770_v48 = vpop.f32.mrb[51].mxu1  ;;  %1900 = vmatmul.mubr.bf16.gmra.mrb[44].mxu0 %v1029_v37  ;;  %v976_v45 = vmax.f32 %v776_v40, 0.0 }
 0x21d   :  { %v771_v18 = vadd.f32 %v2296_v15, %v770_v48  ;;  %v974_v12 = vmax.f32 %v768_v44, 0.0 }
 0x21e   :  { %v977_v49 = vmax.f32 %v779_v51, 0.0 }
 0x21f   :  { %v975_v16 = vmax.f32 %v771_v18, 0.0 }
 0x220   :  { %v1031_v42 = vpack.c.bf16 %v977_v49, %v976_v45 }
 0x221   :  { %v1030_v46 = vpack.c.bf16 %v975_v16, %v974_v12  ;;  %v1829_v9 = vpop.f32.mrb[52].mxu1 }
 0x222   :  { %v792_v13 = vadd.f32 %v1829_v9, %v2296_v15  ;;  %v783_v41 = vpop.f32.mrb[53].mxu1 }
 0x223   :  { %v784_v47 = vadd.f32 %v2296_v15, %v783_v41  ;;  %v1830_v52 = vpop.f32.mrb[54].mxu1  ;;  %1903 = vmatprep.mubr.bf16.mxu0 %v1030_v46 }
 0x224   :  { %v795_v53 = vadd.f32 %v1830_v52, %v2296_v15  ;;  %v786_v54 = vpop.f32.mrb[55].mxu1  ;;  %1904 = vmatmul.mubr.bf16.gmra.mrb[48].mxu0 %v1031_v42  ;;  %v980_v56 = vmax.f32 %v792_v13, 0.0 }
 0x225   :  { %v787_v55 = vadd.f32 %v2296_v15, %v786_v54  ;;  %v978_v58 = vmax.f32 %v784_v47, 0.0 }
 0x226   :  { %v981_v57 = vmax.f32 %v795_v53, 0.0 }
 0x227   :  { %v979_v59 = vmax.f32 %v787_v55, 0.0 }
 0x228   :  { %v1033_v60 = vpack.c.bf16 %v981_v57, %v980_v56 }
 0x229   :  { %v1032_v61 = vpack.c.bf16 %v979_v59, %v978_v58  ;;  %v1833_v62 = vpop.f32.mrb[56].mxu1 }
 0x22a   :  { %v808_v63 = vadd.f32 %v1833_v62, %v2296_v15  ;;  %v799_v0 = vpop.f32.mrb[57].mxu1 }
 0x22b   :  { %v800_v1 = vadd.f32 %v2296_v15, %v799_v0  ;;  %v1834_v2 = vpop.f32.mrb[58].mxu1  ;;  %1907 = vmatprep.mubr.bf16.mxu0 %v1032_v61 }
 0x22c   :  { %v811_v3 = vadd.f32 %v1834_v2, %v2296_v15  ;;  %v802_v4 = vpop.f32.mrb[59].mxu1  ;;  %1908 = vmatmul.mubr.bf16.gmra.mrb[52].mxu0 %v1033_v60  ;;  %v984_v6 = vmax.f32 %v808_v63, 0.0 }
 0x22d   :  { %v803_v5 = vadd.f32 %v2296_v15, %v802_v4  ;;  %v982_v8 = vmax.f32 %v800_v1, 0.0 }
 0x22e   :  { %v985_v7 = vmax.f32 %v811_v3, 0.0 }
 0x22f   :  { %v983_v10 = vmax.f32 %v803_v5, 0.0 }
 0x230   :  { %v1035_v11 = vpack.c.bf16 %v985_v7, %v984_v6 }
 0x231   :  { %v1034_v14 = vpack.c.bf16 %v983_v10, %v982_v8  ;;  %v1837_v17 = vpop.f32.mrb[60].mxu1 }
 0x232   :  { %v824_v19 = vadd.f32 %v1837_v17, %v2296_v15  ;;  %v815_v20 = vpop.f32.mrb[61].mxu1 }
 0x233   :  { %v816_v21 = vadd.f32 %v2296_v15, %v815_v20  ;;  %v1838_v22 = vpop.f32.mrb[62].mxu1  ;;  %1911 = vmatprep.mubr.bf16.mxu0 %v1034_v14 }
 0x234   :  { %v827_v23 = vadd.f32 %v1838_v22, %v2296_v15  ;;  %v818_v24 = vpop.f32.mrb[63].mxu1  ;;  %1912 = vmatmul.mubr.bf16.gmra.mrb[56].mxu0 %v1035_v11  ;;  %v988_v26 = vmax.f32 %v824_v19, 0.0 }
 0x235   :  { %v819_v25 = vadd.f32 %v2296_v15, %v818_v24  ;;  %v986_v28 = vmax.f32 %v816_v21, 0.0 }
 0x236   :  { %v989_v27 = vmax.f32 %v827_v23, 0.0 }
 0x237   :  { %v987_v29 = vmax.f32 %v819_v25, 0.0 }
 0x238   :  { %v1037_v30 = vpack.c.bf16 %v989_v27, %v988_v26 }
 0x239   :  { %v1036_v31 = vpack.c.bf16 %v987_v29, %v986_v28  ;;  %v1841_v32 = vpop.f32.mrb[64].mxu1 }
 0x23a   :  { %v840_v33 = vadd.f32 %v1841_v32, %v2296_v15  ;;  %v831_v34 = vpop.f32.mrb[65].mxu1 }
 0x23b   :  { %v832_v35 = vadd.f32 %v2296_v15, %v831_v34  ;;  %v1842_v36 = vpop.f32.mrb[66].mxu1  ;;  %1915 = vmatprep.mubr.bf16.mxu0 %v1036_v31 }
 0x23c   :  { %v843_v37 = vadd.f32 %v1842_v36, %v2296_v15  ;;  %v834_v38 = vpop.f32.mrb[67].mxu1  ;;  %1916 = vmatmul.mubr.bf16.gmra.mrb[60].mxu0 %v1037_v30  ;;  %v992_v40 = vmax.f32 %v840_v33, 0.0 }
 0x23d   :  { %v835_v39 = vadd.f32 %v2296_v15, %v834_v38  ;;  %v990_v44 = vmax.f32 %v832_v35, 0.0 }
 0x23e   :  { %v993_v43 = vmax.f32 %v843_v37, 0.0 }
 0x23f   :  { %v991_v50 = vmax.f32 %v835_v39, 0.0 }
 0x240   :  { %v1039_v51 = vpack.c.bf16 %v993_v43, %v992_v40 }
 0x241   :  { %v1038_v48 = vpack.c.bf16 %v991_v50, %v990_v44  ;;  %v1845_v18 = vpop.f32.mrb[68].mxu1 }
 0x242   :  { %v856_v45 = vadd.f32 %v1845_v18, %v2296_v15  ;;  %v847_v49 = vpop.f32.mrb[69].mxu1 }
 0x243   :  { %v848_v12 = vadd.f32 %v2296_v15, %v847_v49  ;;  %v1846_v16 = vpop.f32.mrb[70].mxu1  ;;  %1919 = vmatprep.mubr.bf16.mxu0 %v1038_v48 }
 0x244   :  { %v859_v42 = vadd.f32 %v1846_v16, %v2296_v15  ;;  %v850_v46 = vpop.f32.mrb[71].mxu1  ;;  %1920 = vmatmul.mubr.bf16.gmra.mrb[64].mxu0 %v1039_v51  ;;  %v996_v13 = vmax.f32 %v856_v45, 0.0 }
 0x245   :  { %v851_v9 = vadd.f32 %v2296_v15, %v850_v46  ;;  %v994_v47 = vmax.f32 %v848_v12, 0.0 }
 0x246   :  { %v997_v41 = vmax.f32 %v859_v42, 0.0 }
 0x247   :  { %v995_v52 = vmax.f32 %v851_v9, 0.0 }
 0x248   :  { %v1041_v53 = vpack.c.bf16 %v997_v41, %v996_v13 }
 0x249   :  { %v1040_v54 = vpack.c.bf16 %v995_v52, %v994_v47  ;;  %v1849_v55 = vpop.f32.mrb[72].mxu1 }
 0x24a   :  { %v872_v56 = vadd.f32 %v1849_v55, %v2296_v15  ;;  %v863_v57 = vpop.f32.mrb[73].mxu1 }
 0x24b   :  { %v864_v58 = vadd.f32 %v2296_v15, %v863_v57  ;;  %v1850_v59 = vpop.f32.mrb[74].mxu1  ;;  %1923 = vmatprep.mubr.bf16.mxu0 %v1040_v54 }
 0x24c   :  { %v875_v60 = vadd.f32 %v1850_v59, %v2296_v15  ;;  %v866_v61 = vpop.f32.mrb[75].mxu1  ;;  %1924 = vmatmul.mubr.bf16.gmra.mrb[68].mxu0 %v1041_v53  ;;  %v1000_v63 = vmax.f32 %v872_v56, 0.0 }
 0x24d   :  { %v867_v62 = vadd.f32 %v2296_v15, %v866_v61  ;;  %v998_v1 = vmax.f32 %v864_v58, 0.0 }
 0x24e   :  { %v1001_v0 = vmax.f32 %v875_v60, 0.0 }
 0x24f   :  { %v999_v2 = vmax.f32 %v867_v62, 0.0 }
 0x250   :  { %v1043_v3 = vpack.c.bf16 %v1001_v0, %v1000_v63 }
 0x251   :  { %v1042_v4 = vpack.c.bf16 %v999_v2, %v998_v1  ;;  %v1853_v5 = vpop.f32.mrb[76].mxu1 }
 0x252   :  { %v888_v6 = vadd.f32 %v1853_v5, %v2296_v15  ;;  %v879_v7 = vpop.f32.mrb[77].mxu1 }
 0x253   :  { %v880_v8 = vadd.f32 %v2296_v15, %v879_v7  ;;  %v1854_v10 = vpop.f32.mrb[78].mxu1  ;;  %1927 = vmatprep.mubr.bf16.mxu0 %v1042_v4 }
 0x254   :  { %v891_v11 = vadd.f32 %v1854_v10, %v2296_v15  ;;  %v882_v14 = vpop.f32.mrb[79].mxu1  ;;  %1928 = vmatmul.mubr.bf16.gmra.mrb[72].mxu0 %v1043_v3  ;;  %v1004_v19 = vmax.f32 %v888_v6, 0.0 }
 0x255   :  { %v883_v17 = vadd.f32 %v2296_v15, %v882_v14  ;;  %v1002_v21 = vmax.f32 %v880_v8, 0.0 }
 0x256   :  { %v1005_v20 = vmax.f32 %v891_v11, 0.0 }
 0x257   :  { %v1003_v22 = vmax.f32 %v883_v17, 0.0  ;;  %v2365_v17 = vld [vmem:[%s2448_s2 + $0x2] ss:$0 sm:$0xff]  ;;  %s2140_s2 = smov [#allocation7]  }
 0x258   :  { %v1045_v23 = vpack.c.bf16 %v1005_v20, %v1004_v19  ;;  %s1549_s17 = sshll.u32 %s2140_s2, 4  ;;  %s1550_s17 = int_to_ptr.vmem [resolvable:$true] %s1549_s17 }
 0x259   :  { %v1044_v24 = vpack.c.bf16 %v1003_v22, %v1002_v21  ;;  %v1857_v25 = vpop.f32.mrb[80].mxu1  ;;  %s2106_s18 = scalar_lea.vmem %s1550_s17, 8192  ;;  %p2111_p3 = scmp.lt.s32.totalorder %s1550_s17, %s1550_s17 }
 0x25a   :  { %v904_v26 = vadd.f32 %v1857_v25, %v2296_v15  ;;  %v895_v27 = vpop.f32.mrb[81].mxu1  ;;  %p2107_p2 = scmp.ne.s32.totalorder %s1550_s17, %s2106_s18  ;;  %p2112_p4 = scmp.lt.s32.totalorder %s2106_s18, %s2106_s18 }
 0x25b   :  { %v896_v28 = vadd.f32 %v2296_v15, %v895_v27  ;;  %v1858_v29 = vpop.f32.mrb[82].mxu1  ;;  %1931 = vmatprep.mubr.bf16.mxu0 %v1044_v24  ;;  %v1999_v27 = vld [vmem:[#allocation2] sm:$0xff] }
 0x25c   :  { %v907_v30 = vadd.f32 %v1858_v29, %v2296_v15  ;;  %v898_v31 = vpop.f32.mrb[83].mxu1  ;;  %1932 = vmatmul.mubr.bf16.gmra.mrb[76].mxu0 %v1045_v23  ;;  %v1008_v33 = vmax.f32 %v904_v26, 0.0  ;;  %v1998_v23 = vld [vmem:[#allocation2 + $0x10] sm:$0xff]  ;;  %p2113_p5 = por %p2112_p4, %p2111_p3 }
 0x25d   :  { %v899_v32 = vadd.f32 %v2296_v15, %v898_v31  ;;  %v1006_v35 = vmax.f32 %v896_v28, 0.0 }
 0x25e   :  { %v1009_v34 = vmax.f32 %v907_v30, 0.0  ;;  %v2000_v30 = vld [vmem:[#allocation2 + $0x18] sm:$0xff]  ;;  %p2114_p6 = pnand %p2113_p5, %p2107_p2 }
 0x25f   :  { %v1007_v36 = vmax.f32 %v899_v32, 0.0  ;;  %v2001_v32 = vld [vmem:[#allocation2 + $0x8] sm:$0xff] }
 0x260   :  { %v1047_v37 = vpack.c.bf16 %v1009_v34, %v1008_v33 }
 0x261   :  { %v1046_v38 = vpack.c.bf16 %v1007_v36, %v1006_v35  ;;  %v1861_v39 = vpop.f32.mrb[84].mxu1 }
 0x262   :  { %v920_v40 = vadd.f32 %v1861_v39, %v2296_v15  ;;  %v911_v43 = vpop.f32.mrb[85].mxu1  ;;  %v2002_v39 = vld [vmem:[#allocation2 + $0x30] sm:$0xff] }
 0x263   :  { %v912_v44 = vadd.f32 %v2296_v15, %v911_v43  ;;  %v1862_v50 = vpop.f32.mrb[86].mxu1  ;;  %1935 = vmatprep.mubr.bf16.mxu0 %v1046_v38 }
 0x264   :  { %v923_v51 = vadd.f32 %v1862_v50, %v2296_v15  ;;  %v914_v48 = vpop.f32.mrb[87].mxu1  ;;  %1936 = vmatmul.mubr.bf16.gmra.mrb[80].mxu0 %v1047_v37  ;;  %v1012_v45 = vmax.f32 %v920_v40, 0.0  ;;  %v2003_v50 = vld [vmem:[#allocation2 + $0x20] sm:$0xff] }
 0x265   :  { %v915_v18 = vadd.f32 %v2296_v15, %v914_v48  ;;  %v1010_v12 = vmax.f32 %v912_v44, 0.0 }
 0x266   :  { %v1013_v49 = vmax.f32 %v923_v51, 0.0 }
 0x267   :  { %v1011_v16 = vmax.f32 %v915_v18, 0.0  ;;  %v2004_v18 = vld [vmem:[#allocation2 + $0x38] sm:$0xff] }
 0x268   :  { %v1049_v42 = vpack.c.bf16 %v1013_v49, %v1012_v45  ;;  %v2005_v49 = vld [vmem:[#allocation2 + $0x28] sm:$0xff] }
 0x269   :  { %v1048_v46 = vpack.c.bf16 %v1011_v16, %v1010_v12  ;;  %v1865_v9 = vpop.f32.mrb[88].mxu1 }
 0x26a   :  { %v936_v13 = vadd.f32 %v1865_v9, %v2296_v15  ;;  %v927_v41 = vpop.f32.mrb[89].mxu1 }
 0x26b   :  { %v928_v47 = vadd.f32 %v2296_v15, %v927_v41  ;;  %v1866_v52 = vpop.f32.mrb[90].mxu1  ;;  %1939 = vmatprep.mubr.bf16.mxu0 %v1048_v46  ;;  %v2006_v41 = vld [vmem:[#allocation2 + $0x50] sm:$0xff] }
 0x26c   :  { %v939_v53 = vadd.f32 %v1866_v52, %v2296_v15  ;;  %v930_v54 = vpop.f32.mrb[91].mxu1  ;;  %1940 = vmatmul.mubr.bf16.gmra.mrb[84].mxu0 %v1049_v42  ;;  %v1016_v56 = vmax.f32 %v936_v13, 0.0 }
 0x26d   :  { %v931_v55 = vadd.f32 %v2296_v15, %v930_v54  ;;  %v1014_v58 = vmax.f32 %v928_v47, 0.0  ;;  %v2007_v54 = vld [vmem:[#allocation2 + $0x40] sm:$0xff] }
 0x26e   :  { %v1017_v57 = vmax.f32 %v939_v53, 0.0 }
 0x26f   :  { %v1015_v59 = vmax.f32 %v931_v55, 0.0 }
 0x270   :  { %v1051_v60 = vpack.c.bf16 %v1017_v57, %v1016_v56  ;;  %v2008_v57 = vld [vmem:[#allocation2 + $0x58] sm:$0xff] }
 0x271   :  { %v1050_v61 = vpack.c.bf16 %v1015_v59, %v1014_v58  ;;  %v1869_v62 = vpop.f32.mrb[92].mxu1  ;;  %v2009_v59 = vld [vmem:[#allocation2 + $0x48] sm:$0xff] }
 0x272   :  { %v952_v63 = vadd.f32 %v1869_v62, %v2296_v15  ;;  %v943_v0 = vpop.f32.mrb[93].mxu1 }
 0x273   :  { %v944_v1 = vadd.f32 %v2296_v15, %v943_v0  ;;  %v1870_v2 = vpop.f32.mrb[94].mxu1  ;;  %1943 = vmatprep.mubr.bf16.mxu0 %v1050_v61 }
 0x274   :  { %v955_v3 = vadd.f32 %v1870_v2, %v2296_v15  ;;  %v946_v4 = vpop.f32.mrb[95].mxu1  ;;  %1944 = vmatmul.mubr.bf16.gmra.mrb[88].mxu0 %v1051_v60  ;;  %v1020_v6 = vmax.f32 %v952_v63, 0.0  ;;  %v2010_v2 = vld [vmem:[#allocation2 + $0x70] sm:$0xff] }
 0x275   :  { %v947_v5 = vadd.f32 %v2296_v15, %v946_v4  ;;  %v1018_v8 = vmax.f32 %v944_v1, 0.0 }
 0x276   :  { %v1021_v7 = vmax.f32 %v955_v3, 0.0 }
 0x277   :  { %v1019_v10 = vmax.f32 %v947_v5, 0.0 }
 0x278   :  { %v1053_v11 = vpack.c.bf16 %v1021_v7, %v1020_v6  ;;  %v2011_v6 = vld [vmem:[#allocation2 + $0x60] sm:$0xff] }
 0x279   :  { %v1052_v14 = vpack.c.bf16 %v1019_v10, %v1018_v8  ;;  %v2012_v10 = vld [vmem:[#allocation2 + $0x78] sm:$0xff] }
 0x27b   :  { %1947 = vmatprep.mubr.bf16.mxu0 %v1052_v14  ;;  %v2013_v14 = vld [vmem:[#allocation2 + $0x68] sm:$0xff] }
 0x27c   :  { %1948 = vmatmul.mubr.bf16.gmra.mrb[92].mxu0 %v1053_v11 }
 0x2d7   :  { %v1889_v19 = vpop.f32.mrb[32].mxu0 }
 0x2d8   :  { %v1170_v20 = vadd.f32 %v1889_v19, %v2365_v17  ;;  %v1161_v21 = vpop.f32.mrb[33].mxu0 }
 0x2d9   :  { %v1162_v22 = vadd.f32 %v2365_v17, %v1161_v21  ;;  %v1890_v15 = vpop.f32.mrb[34].mxu0 }
 0x2da   :  { %v1418_v24 = vadd.f32 %v1998_v23, %v1170_v20  ;;  %v1173_v25 = vadd.f32 %v1890_v15, %v2365_v17  ;;  %v1164_v26 = vpop.f32.mrb[35].mxu0 }
 0x2db   :  { %v1416_v28 = vadd.f32 %v1999_v27, %v1162_v22  ;;  %v1165_v29 = vadd.f32 %v2365_v17, %v1164_v26 }
 0x2dc   :  { %1482 = vst [vmem:[#allocation7 + $0x10] sm:$0xff] %v1418_v24  ;;  %v1419_v31 = vadd.f32 %v2000_v30, %v1173_v25  ;;  %v2014_v24 = vld [vmem:[#allocation2 + $0x90] sm:$0xff] }
 0x2dd   :  { %1480 = vst [vmem:[#allocation7] sm:$0xff] %v1416_v28  ;;  %v1417_v33 = vadd.f32 %v2001_v32, %v1165_v29  ;;  %v2015_v28 = vld [vmem:[#allocation2 + $0x80] sm:$0xff] }
 0x2de   :  { %1483 = vst [vmem:[#allocation7 + $0x18] sm:$0xff] %v1419_v31  ;;  %v2016_v31 = vld [vmem:[#allocation2 + $0x98] sm:$0xff] }
 0x2df   :  { %1481 = vst [vmem:[#allocation7 + $0x8] sm:$0xff] %v1417_v33  ;;  %v1893_v34 = vpop.f32.mrb[36].mxu0  ;;  %v2017_v33 = vld [vmem:[#allocation2 + $0x88] sm:$0xff] }
 0x2e0   :  { %v1186_v35 = vadd.f32 %v1893_v34, %v2365_v17  ;;  %v1177_v36 = vpop.f32.mrb[37].mxu0 }
 0x2e1   :  { %v1178_v37 = vadd.f32 %v2365_v17, %v1177_v36  ;;  %v1894_v38 = vpop.f32.mrb[38].mxu0 }
 0x2e2   :  { %v1422_v40 = vadd.f32 %v2002_v39, %v1186_v35  ;;  %v1189_v43 = vadd.f32 %v1894_v38, %v2365_v17  ;;  %v1180_v44 = vpop.f32.mrb[39].mxu0 }
 0x2e3   :  { %v1420_v51 = vadd.f32 %v2003_v50, %v1178_v37  ;;  %v1181_v48 = vadd.f32 %v2365_v17, %v1180_v44 }
 0x2e4   :  { %1486 = vst [vmem:[#allocation7 + $0x30] sm:$0xff] %v1422_v40  ;;  %v1423_v45 = vadd.f32 %v2004_v18, %v1189_v43  ;;  %v2018_v40 = vld [vmem:[#allocation2 + $0xb0] sm:$0xff] }
 0x2e5   :  { %1484 = vst [vmem:[#allocation7 + $0x20] sm:$0xff] %v1420_v51  ;;  %v1421_v12 = vadd.f32 %v2005_v49, %v1181_v48  ;;  %v2019_v51 = vld [vmem:[#allocation2 + $0xa0] sm:$0xff] }
 0x2e6   :  { %1487 = vst [vmem:[#allocation7 + $0x38] sm:$0xff] %v1423_v45  ;;  %v2020_v45 = vld [vmem:[#allocation2 + $0xb8] sm:$0xff] }
 0x2e7   :  { %1485 = vst [vmem:[#allocation7 + $0x28] sm:$0xff] %v1421_v12  ;;  %v1897_v16 = vpop.f32.mrb[40].mxu0  ;;  %v2021_v12 = vld [vmem:[#allocation2 + $0xa8] sm:$0xff] }
 0x2e8   :  { %v1202_v42 = vadd.f32 %v1897_v16, %v2365_v17  ;;  %v1193_v46 = vpop.f32.mrb[41].mxu0 }
 0x2e9   :  { %v1194_v9 = vadd.f32 %v2365_v17, %v1193_v46  ;;  %v1898_v13 = vpop.f32.mrb[42].mxu0 }
 0x2ea   :  { %v1426_v47 = vadd.f32 %v2006_v41, %v1202_v42  ;;  %v1205_v52 = vadd.f32 %v1898_v13, %v2365_v17  ;;  %v1196_v53 = vpop.f32.mrb[43].mxu0 }
 0x2eb   :  { %v1424_v55 = vadd.f32 %v2007_v54, %v1194_v9  ;;  %v1197_v56 = vadd.f32 %v2365_v17, %v1196_v53 }
 0x2ec   :  { %1490 = vst [vmem:[#allocation7 + $0x50] sm:$0xff] %v1426_v47  ;;  %v1427_v58 = vadd.f32 %v2008_v57, %v1205_v52  ;;  %v2022_v47 = vld [vmem:[#allocation2 + $0xd0] sm:$0xff] }
 0x2ed   :  { %1488 = vst [vmem:[#allocation7 + $0x40] sm:$0xff] %v1424_v55  ;;  %v1425_v60 = vadd.f32 %v2009_v59, %v1197_v56  ;;  %v2023_v55 = vld [vmem:[#allocation2 + $0xc0] sm:$0xff] }
 0x2ee   :  { %1491 = vst [vmem:[#allocation7 + $0x58] sm:$0xff] %v1427_v58  ;;  %v2024_v58 = vld [vmem:[#allocation2 + $0xd8] sm:$0xff] }
 0x2ef   :  { %1489 = vst [vmem:[#allocation7 + $0x48] sm:$0xff] %v1425_v60  ;;  %v1901_v61 = vpop.f32.mrb[44].mxu0  ;;  %v2025_v60 = vld [vmem:[#allocation2 + $0xc8] sm:$0xff] }
 0x2f0   :  { %v1218_v62 = vadd.f32 %v1901_v61, %v2365_v17  ;;  %v1209_v63 = vpop.f32.mrb[45].mxu0 }
 0x2f1   :  { %v1210_v0 = vadd.f32 %v2365_v17, %v1209_v63  ;;  %v1902_v1 = vpop.f32.mrb[46].mxu0 }
 0x2f2   :  { %v1430_v3 = vadd.f32 %v2010_v2, %v1218_v62  ;;  %v1221_v4 = vadd.f32 %v1902_v1, %v2365_v17  ;;  %v1212_v5 = vpop.f32.mrb[47].mxu0 }
 0x2f3   :  { %v1428_v7 = vadd.f32 %v2011_v6, %v1210_v0  ;;  %v1213_v8 = vadd.f32 %v2365_v17, %v1212_v5 }
 0x2f4   :  { %1494 = vst [vmem:[#allocation7 + $0x70] sm:$0xff] %v1430_v3  ;;  %v1431_v11 = vadd.f32 %v2012_v10, %v1221_v4  ;;  %v2026_v3 = vld [vmem:[#allocation2 + $0xf0] sm:$0xff] }
 0x2f5   :  { %1492 = vst [vmem:[#allocation7 + $0x60] sm:$0xff] %v1428_v7  ;;  %v1429_v19 = vadd.f32 %v2013_v14, %v1213_v8  ;;  %v2027_v7 = vld [vmem:[#allocation2 + $0xe0] sm:$0xff] }
 0x2f6   :  { %1495 = vst [vmem:[#allocation7 + $0x78] sm:$0xff] %v1431_v11  ;;  %v2028_v11 = vld [vmem:[#allocation2 + $0xf8] sm:$0xff] }
 0x2f7   :  { %1493 = vst [vmem:[#allocation7 + $0x68] sm:$0xff] %v1429_v19  ;;  %v1905_v20 = vpop.f32.mrb[48].mxu0  ;;  %v2029_v19 = vld [vmem:[#allocation2 + $0xe8] sm:$0xff] }
 0x2f8   :  { %v1234_v21 = vadd.f32 %v1905_v20, %v2365_v17  ;;  %v1225_v22 = vpop.f32.mrb[49].mxu0 }
 0x2f9   :  { %v1226_v15 = vadd.f32 %v2365_v17, %v1225_v22  ;;  %v1906_v23 = vpop.f32.mrb[50].mxu0 }
 0x2fa   :  { %v1434_v25 = vadd.f32 %v2014_v24, %v1234_v21  ;;  %v1237_v26 = vadd.f32 %v1906_v23, %v2365_v17  ;;  %v1228_v27 = vpop.f32.mrb[51].mxu0 }
 0x2fb   :  { %v1432_v29 = vadd.f32 %v2015_v28, %v1226_v15  ;;  %v1229_v30 = vadd.f32 %v2365_v17, %v1228_v27 }
 0x2fc   :  { %1498 = vst [vmem:[#allocation7 + $0x90] sm:$0xff] %v1434_v25  ;;  %v1435_v32 = vadd.f32 %v2016_v31, %v1237_v26  ;;  %v2030_v25 = vld [vmem:[#allocation2 + $0x110] sm:$0xff] }
 0x2fd   :  { %1496 = vst [vmem:[#allocation7 + $0x80] sm:$0xff] %v1432_v29  ;;  %v1433_v34 = vadd.f32 %v2017_v33, %v1229_v30  ;;  %v2031_v29 = vld [vmem:[#allocation2 + $0x100] sm:$0xff] }
 0x2fe   :  { %1499 = vst [vmem:[#allocation7 + $0x98] sm:$0xff] %v1435_v32  ;;  %v2032_v32 = vld [vmem:[#allocation2 + $0x118] sm:$0xff] }
 0x2ff   :  { %1497 = vst [vmem:[#allocation7 + $0x88] sm:$0xff] %v1433_v34  ;;  %v1909_v35 = vpop.f32.mrb[52].mxu0  ;;  %v2033_v34 = vld [vmem:[#allocation2 + $0x108] sm:$0xff] }
 0x300   :  { %v1250_v36 = vadd.f32 %v1909_v35, %v2365_v17  ;;  %v1241_v37 = vpop.f32.mrb[53].mxu0 }
 0x301   :  { %v1242_v38 = vadd.f32 %v2365_v17, %v1241_v37  ;;  %v1910_v39 = vpop.f32.mrb[54].mxu0 }
 0x302   :  { %v1438_v43 = vadd.f32 %v2018_v40, %v1250_v36  ;;  %v1253_v44 = vadd.f32 %v1910_v39, %v2365_v17  ;;  %v1244_v50 = vpop.f32.mrb[55].mxu0 }
 0x303   :  { %v1436_v48 = vadd.f32 %v2019_v51, %v1242_v38  ;;  %v1245_v18 = vadd.f32 %v2365_v17, %v1244_v50 }
 0x304   :  { %1502 = vst [vmem:[#allocation7 + $0xb0] sm:$0xff] %v1438_v43  ;;  %v1439_v49 = vadd.f32 %v2020_v45, %v1253_v44  ;;  %v2034_v43 = vld [vmem:[#allocation2 + $0x130] sm:$0xff] }
 0x305   :  { %1500 = vst [vmem:[#allocation7 + $0xa0] sm:$0xff] %v1436_v48  ;;  %v1437_v16 = vadd.f32 %v2021_v12, %v1245_v18  ;;  %v2035_v48 = vld [vmem:[#allocation2 + $0x120] sm:$0xff] }
 0x306   :  { %1503 = vst [vmem:[#allocation7 + $0xb8] sm:$0xff] %v1439_v49  ;;  %v2036_v49 = vld [vmem:[#allocation2 + $0x138] sm:$0xff] }
 0x307   :  { %1501 = vst [vmem:[#allocation7 + $0xa8] sm:$0xff] %v1437_v16  ;;  %v1913_v42 = vpop.f32.mrb[56].mxu0  ;;  %v2037_v16 = vld [vmem:[#allocation2 + $0x128] sm:$0xff] }
 0x308   :  { %v1266_v46 = vadd.f32 %v1913_v42, %v2365_v17  ;;  %v1257_v9 = vpop.f32.mrb[57].mxu0 }
 0x309   :  { %v1258_v13 = vadd.f32 %v2365_v17, %v1257_v9  ;;  %v1914_v41 = vpop.f32.mrb[58].mxu0 }
 0x30a   :  { %v1442_v52 = vadd.f32 %v2022_v47, %v1266_v46  ;;  %v1269_v53 = vadd.f32 %v1914_v41, %v2365_v17  ;;  %v1260_v54 = vpop.f32.mrb[59].mxu0 }
 0x30b   :  { %v1440_v56 = vadd.f32 %v2023_v55, %v1258_v13  ;;  %v1261_v57 = vadd.f32 %v2365_v17, %v1260_v54 }
 0x30c   :  { %1506 = vst [vmem:[#allocation7 + $0xd0] sm:$0xff] %v1442_v52  ;;  %v1443_v59 = vadd.f32 %v2024_v58, %v1269_v53  ;;  %v2038_v52 = vld [vmem:[#allocation2 + $0x150] sm:$0xff] }
 0x30d   :  { %1504 = vst [vmem:[#allocation7 + $0xc0] sm:$0xff] %v1440_v56  ;;  %v1441_v61 = vadd.f32 %v2025_v60, %v1261_v57  ;;  %v2039_v56 = vld [vmem:[#allocation2 + $0x140] sm:$0xff] }
 0x30e   :  { %1507 = vst [vmem:[#allocation7 + $0xd8] sm:$0xff] %v1443_v59  ;;  %v2040_v59 = vld [vmem:[#allocation2 + $0x158] sm:$0xff] }
 0x30f   :  { %1505 = vst [vmem:[#allocation7 + $0xc8] sm:$0xff] %v1441_v61  ;;  %v1917_v62 = vpop.f32.mrb[60].mxu0  ;;  %v2041_v61 = vld [vmem:[#allocation2 + $0x148] sm:$0xff] }
 0x310   :  { %v1282_v63 = vadd.f32 %v1917_v62, %v2365_v17  ;;  %v1273_v0 = vpop.f32.mrb[61].mxu0 }
 0x311   :  { %v1274_v1 = vadd.f32 %v2365_v17, %v1273_v0  ;;  %v1918_v2 = vpop.f32.mrb[62].mxu0 }
 0x312   :  { %v1446_v4 = vadd.f32 %v2026_v3, %v1282_v63  ;;  %v1285_v5 = vadd.f32 %v1918_v2, %v2365_v17  ;;  %v1276_v6 = vpop.f32.mrb[63].mxu0 }
 0x313   :  { %v1444_v8 = vadd.f32 %v2027_v7, %v1274_v1  ;;  %v1277_v10 = vadd.f32 %v2365_v17, %v1276_v6 }
 0x314   :  { %1510 = vst [vmem:[#allocation7 + $0xf0] sm:$0xff] %v1446_v4  ;;  %v1447_v14 = vadd.f32 %v2028_v11, %v1285_v5  ;;  %v2042_v4 = vld [vmem:[#allocation2 + $0x170] sm:$0xff] }
 0x315   :  { %1508 = vst [vmem:[#allocation7 + $0xe0] sm:$0xff] %v1444_v8  ;;  %v1445_v20 = vadd.f32 %v2029_v19, %v1277_v10  ;;  %v2043_v8 = vld [vmem:[#allocation2 + $0x160] sm:$0xff] }
 0x316   :  { %1511 = vst [vmem:[#allocation7 + $0xf8] sm:$0xff] %v1447_v14  ;;  %v2044_v14 = vld [vmem:[#allocation2 + $0x178] sm:$0xff] }
 0x317   :  { %1509 = vst [vmem:[#allocation7 + $0xe8] sm:$0xff] %v1445_v20  ;;  %v1921_v21 = vpop.f32.mrb[64].mxu0  ;;  %v2045_v20 = vld [vmem:[#allocation2 + $0x168] sm:$0xff] }
 0x318   :  { %v1298_v22 = vadd.f32 %v1921_v21, %v2365_v17  ;;  %v1289_v15 = vpop.f32.mrb[65].mxu0 }
 0x319   :  { %v1290_v23 = vadd.f32 %v2365_v17, %v1289_v15  ;;  %v1922_v24 = vpop.f32.mrb[66].mxu0 }
 0x31a   :  { %v1450_v26 = vadd.f32 %v2030_v25, %v1298_v22  ;;  %v1301_v27 = vadd.f32 %v1922_v24, %v2365_v17  ;;  %v1292_v28 = vpop.f32.mrb[67].mxu0 }
 0x31b   :  { %v1448_v30 = vadd.f32 %v2031_v29, %v1290_v23  ;;  %v1293_v31 = vadd.f32 %v2365_v17, %v1292_v28 }
 0x31c   :  { %1514 = vst [vmem:[#allocation7 + $0x110] sm:$0xff] %v1450_v26  ;;  %v1451_v33 = vadd.f32 %v2032_v32, %v1301_v27  ;;  %v2046_v26 = vld [vmem:[#allocation2 + $0x190] sm:$0xff] }
 0x31d   :  { %1512 = vst [vmem:[#allocation7 + $0x100] sm:$0xff] %v1448_v30  ;;  %v1449_v35 = vadd.f32 %v2033_v34, %v1293_v31  ;;  %v2047_v30 = vld [vmem:[#allocation2 + $0x180] sm:$0xff] }
 0x31e   :  { %1515 = vst [vmem:[#allocation7 + $0x118] sm:$0xff] %v1451_v33  ;;  %v2048_v33 = vld [vmem:[#allocation2 + $0x198] sm:$0xff] }
 0x31f   :  { %1513 = vst [vmem:[#allocation7 + $0x108] sm:$0xff] %v1449_v35  ;;  %v1925_v36 = vpop.f32.mrb[68].mxu0  ;;  %v2049_v35 = vld [vmem:[#allocation2 + $0x188] sm:$0xff] }
 0x320   :  { %v1314_v37 = vadd.f32 %v1925_v36, %v2365_v17  ;;  %v1305_v38 = vpop.f32.mrb[69].mxu0 }
 0x321   :  { %v1306_v39 = vadd.f32 %v2365_v17, %v1305_v38  ;;  %v1926_v40 = vpop.f32.mrb[70].mxu0 }
 0x322   :  { %v1454_v44 = vadd.f32 %v2034_v43, %v1314_v37  ;;  %v1317_v50 = vadd.f32 %v1926_v40, %v2365_v17  ;;  %v1308_v51 = vpop.f32.mrb[71].mxu0 }
 0x323   :  { %v1452_v18 = vadd.f32 %v2035_v48, %v1306_v39  ;;  %v1309_v45 = vadd.f32 %v2365_v17, %v1308_v51 }
 0x324   :  { %1518 = vst [vmem:[#allocation7 + $0x130] sm:$0xff] %v1454_v44  ;;  %v1455_v12 = vadd.f32 %v2036_v49, %v1317_v50  ;;  %v2050_v44 = vld [vmem:[#allocation2 + $0x1b0] sm:$0xff] }
 0x325   :  { %1516 = vst [vmem:[#allocation7 + $0x120] sm:$0xff] %v1452_v18  ;;  %v1453_v42 = vadd.f32 %v2037_v16, %v1309_v45  ;;  %v2051_v18 = vld [vmem:[#allocation2 + $0x1a0] sm:$0xff] }
 0x326   :  { %1519 = vst [vmem:[#allocation7 + $0x138] sm:$0xff] %v1455_v12  ;;  %v2052_v12 = vld [vmem:[#allocation2 + $0x1b8] sm:$0xff] }
 0x327   :  { %1517 = vst [vmem:[#allocation7 + $0x128] sm:$0xff] %v1453_v42  ;;  %v1929_v46 = vpop.f32.mrb[72].mxu0  ;;  %v2053_v42 = vld [vmem:[#allocation2 + $0x1a8] sm:$0xff] }
 0x328   :  { %v1330_v9 = vadd.f32 %v1929_v46, %v2365_v17  ;;  %v1321_v13 = vpop.f32.mrb[73].mxu0 }
 0x329   :  { %v1322_v41 = vadd.f32 %v2365_v17, %v1321_v13  ;;  %v1930_v47 = vpop.f32.mrb[74].mxu0 }
 0x32a   :  { %v1458_v53 = vadd.f32 %v2038_v52, %v1330_v9  ;;  %v1333_v54 = vadd.f32 %v1930_v47, %v2365_v17  ;;  %v1324_v55 = vpop.f32.mrb[75].mxu0 }
 0x32b   :  { %v1456_v57 = vadd.f32 %v2039_v56, %v1322_v41  ;;  %v1325_v58 = vadd.f32 %v2365_v17, %v1324_v55 }
 0x32c   :  { %1522 = vst [vmem:[#allocation7 + $0x150] sm:$0xff] %v1458_v53  ;;  %v1459_v60 = vadd.f32 %v2040_v59, %v1333_v54  ;;  %v2054_v53 = vld [vmem:[#allocation2 + $0x1d0] sm:$0xff] }
 0x32d   :  { %1520 = vst [vmem:[#allocation7 + $0x140] sm:$0xff] %v1456_v57  ;;  %v1457_v62 = vadd.f32 %v2041_v61, %v1325_v58  ;;  %v2055_v57 = vld [vmem:[#allocation2 + $0x1c0] sm:$0xff] }
 0x32e   :  { %1523 = vst [vmem:[#allocation7 + $0x158] sm:$0xff] %v1459_v60  ;;  %v2056_v60 = vld [vmem:[#allocation2 + $0x1d8] sm:$0xff] }
 0x32f   :  { %1521 = vst [vmem:[#allocation7 + $0x148] sm:$0xff] %v1457_v62  ;;  %v1933_v63 = vpop.f32.mrb[76].mxu0  ;;  %v2057_v62 = vld [vmem:[#allocation2 + $0x1c8] sm:$0xff] }
 0x330   :  { %v1346_v0 = vadd.f32 %v1933_v63, %v2365_v17  ;;  %v1337_v1 = vpop.f32.mrb[77].mxu0 }
 0x331   :  { %v1338_v2 = vadd.f32 %v2365_v17, %v1337_v1  ;;  %v1934_v3 = vpop.f32.mrb[78].mxu0 }
 0x332   :  { %v1462_v5 = vadd.f32 %v2042_v4, %v1346_v0  ;;  %v1349_v6 = vadd.f32 %v1934_v3, %v2365_v17  ;;  %v1340_v7 = vpop.f32.mrb[79].mxu0 }
 0x333   :  { %v1460_v10 = vadd.f32 %v2043_v8, %v1338_v2  ;;  %v1341_v11 = vadd.f32 %v2365_v17, %v1340_v7 }
 0x334   :  { %1526 = vst [vmem:[#allocation7 + $0x170] sm:$0xff] %v1462_v5  ;;  %v1463_v19 = vadd.f32 %v2044_v14, %v1349_v6  ;;  %v2058_v5 = vld [vmem:[#allocation2 + $0x1f0] sm:$0xff] }
 0x335   :  { %1524 = vst [vmem:[#allocation7 + $0x160] sm:$0xff] %v1460_v10  ;;  %v1461_v21 = vadd.f32 %v2045_v20, %v1341_v11  ;;  %v2059_v10 = vld [vmem:[#allocation2 + $0x1e0] sm:$0xff] }
 0x336   :  { %1527 = vst [vmem:[#allocation7 + $0x178] sm:$0xff] %v1463_v19  ;;  %v2060_v19 = vld [vmem:[#allocation2 + $0x1f8] sm:$0xff] }
 0x337   :  { %1525 = vst [vmem:[#allocation7 + $0x168] sm:$0xff] %v1461_v21  ;;  %v1937_v22 = vpop.f32.mrb[80].mxu0  ;;  %v2061_v21 = vld [vmem:[#allocation2 + $0x1e8] sm:$0xff] }
 0x338   :  { %v1362_v15 = vadd.f32 %v1937_v22, %v2365_v17  ;;  %v1353_v23 = vpop.f32.mrb[81].mxu0 }
 0x339   :  { %v1354_v24 = vadd.f32 %v2365_v17, %v1353_v23  ;;  %v1938_v25 = vpop.f32.mrb[82].mxu0 }
 0x33a   :  { %v1466_v27 = vadd.f32 %v2046_v26, %v1362_v15  ;;  %v1365_v28 = vadd.f32 %v1938_v25, %v2365_v17  ;;  %v1356_v29 = vpop.f32.mrb[83].mxu0 }
 0x33b   :  { %v1464_v31 = vadd.f32 %v2047_v30, %v1354_v24  ;;  %v1357_v32 = vadd.f32 %v2365_v17, %v1356_v29 }
 0x33c   :  { %1530 = vst [vmem:[#allocation7 + $0x190] sm:$0xff] %v1466_v27  ;;  %v1467_v34 = vadd.f32 %v2048_v33, %v1365_v28 }
 0x33d   :  { %1528 = vst [vmem:[#allocation7 + $0x180] sm:$0xff] %v1464_v31  ;;  %v1465_v36 = vadd.f32 %v2049_v35, %v1357_v32 }
 0x33e   :  { %1531 = vst [vmem:[#allocation7 + $0x198] sm:$0xff] %v1467_v34 }
 0x33f   :  { %1529 = vst [vmem:[#allocation7 + $0x188] sm:$0xff] %v1465_v36  ;;  %v1941_v37 = vpop.f32.mrb[84].mxu0 }
 0x340   :  { %v1378_v38 = vadd.f32 %v1941_v37, %v2365_v17  ;;  %v1369_v39 = vpop.f32.mrb[85].mxu0 }
 0x341   :  { %v1370_v40 = vadd.f32 %v2365_v17, %v1369_v39  ;;  %v1942_v43 = vpop.f32.mrb[86].mxu0 }
 0x342   :  { %v1470_v50 = vadd.f32 %v2050_v44, %v1378_v38  ;;  %v1381_v51 = vadd.f32 %v1942_v43, %v2365_v17  ;;  %v1372_v48 = vpop.f32.mrb[87].mxu0 }
 0x343   :  { %v1468_v45 = vadd.f32 %v2051_v18, %v1370_v40  ;;  %v1373_v49 = vadd.f32 %v2365_v17, %v1372_v48 }
 0x344   :  { %1534 = vst [vmem:[#allocation7 + $0x1b0] sm:$0xff] %v1470_v50  ;;  %v1471_v16 = vadd.f32 %v2052_v12, %v1381_v51 }
 0x345   :  { %1532 = vst [vmem:[#allocation7 + $0x1a0] sm:$0xff] %v1468_v45  ;;  %v1469_v46 = vadd.f32 %v2053_v42, %v1373_v49 }
 0x346   :  { %1535 = vst [vmem:[#allocation7 + $0x1b8] sm:$0xff] %v1471_v16 }
 0x347   :  { %1533 = vst [vmem:[#allocation7 + $0x1a8] sm:$0xff] %v1469_v46  ;;  %v1945_v9 = vpop.f32.mrb[88].mxu0 }
 0x348   :  { %v1394_v13 = vadd.f32 %v1945_v9, %v2365_v17  ;;  %v1385_v41 = vpop.f32.mrb[89].mxu0 }
 0x349   :  { %v1386_v47 = vadd.f32 %v2365_v17, %v1385_v41  ;;  %v1946_v52 = vpop.f32.mrb[90].mxu0 }
 0x34a   :  { %v1474_v54 = vadd.f32 %v2054_v53, %v1394_v13  ;;  %v1397_v55 = vadd.f32 %v1946_v52, %v2365_v17  ;;  %v1388_v56 = vpop.f32.mrb[91].mxu0 }
 0x34b   :  { %v1472_v58 = vadd.f32 %v2055_v57, %v1386_v47  ;;  %v1389_v59 = vadd.f32 %v2365_v17, %v1388_v56 }
 0x34c   :  { %1538 = vst [vmem:[#allocation7 + $0x1d0] sm:$0xff] %v1474_v54  ;;  %v1475_v61 = vadd.f32 %v2056_v60, %v1397_v55 }
 0x34d   :  { %1536 = vst [vmem:[#allocation7 + $0x1c0] sm:$0xff] %v1472_v58  ;;  %v1473_v63 = vadd.f32 %v2057_v62, %v1389_v59 }
 0x34e   :  { %1539 = vst [vmem:[#allocation7 + $0x1d8] sm:$0xff] %v1475_v61 }
 0x34f   :  { %1537 = vst [vmem:[#allocation7 + $0x1c8] sm:$0xff] %v1473_v63  ;;  %v1949_v0 = vpop.f32.mrb[92].mxu0 }
 0x350   :  { %v1410_v1 = vadd.f32 %v1949_v0, %v2365_v17  ;;  %v1401_v2 = vpop.f32.mrb[93].mxu0 }
 0x351   :  { %v1402_v3 = vadd.f32 %v2365_v17, %v1401_v2  ;;  %v1950_v4 = vpop.f32.mrb[94].mxu0 }
 0x352   :  { %v1478_v6 = vadd.f32 %v2058_v5, %v1410_v1  ;;  %v1413_v7 = vadd.f32 %v1950_v4, %v2365_v17  ;;  %v1404_v8 = vpop.f32.mrb[95].mxu0 }
 0x353   :  { %v1476_v11 = vadd.f32 %v2059_v10, %v1402_v3  ;;  %v1405_v14 = vadd.f32 %v2365_v17, %v1404_v8 }
 0x354   :  { %1542 = vst [vmem:[#allocation7 + $0x1f0] sm:$0xff] %v1478_v6  ;;  %v1479_v20 = vadd.f32 %v2060_v19, %v1413_v7 }
 0x355   :  { %1540 = vst [vmem:[#allocation7 + $0x1e0] sm:$0xff] %v1476_v11  ;;  %v1477_v22 = vadd.f32 %v2061_v21, %v1405_v14 }
 0x356   :  { %1543 = vst [vmem:[#allocation7 + $0x1f8] sm:$0xff] %v1479_v20 }
 0x357   :  { %1541 = vst [vmem:[#allocation7 + $0x1e8] sm:$0xff] %v1477_v22 }
 0x358   :  { %2117 = shalt.err (!%p2114_p6)
}
 0x359   :  { %s2118_s21 = scalar_lea.hbm %s2449_s3, 8192 }
 0x35a   :  { %p2119_p7 = scmp.ne.s32.totalorder %s2449_s3, %s2118_s21  ;;  %p2122_p8 = scmp.lt.u32.totalorder %s2118_s21, %s2449_s3 }
 0x35c   :  { %p2124_p9 = pnand %p2122_p8, %p2119_p7 }
 0x35e   :  { %2127 = shalt.err (!%p2124_p9)
}
 0x35f   :  { %1555 = dma.vmem_to_hbm [thread:$0]  %s1550_s17, 8192, %s2449_s3, [#allocation4], %s2135_s22, %s2135_s22, %s2136_s23  }
 0x360   :  { %2132 = dma.done.wait [#allocation4], 8192  }
 0x361   :  { %2133 = vsyncadd [#allocation4], 4294959104 }
 0x362   :  { %1559 = vsyncpa [#allocation3], 1 }
 0x363   :  { %1560 = vsyncpa [#allocation6], 1 }
 0x364   :  { %1561 = vsyncpa [#allocation4], 1 }

// kernel: tpu_custom_call.1
= control target key start
LH: loop header
LB: loop body
LE: loop exit
PB: predicated region body
PF: predicated region fallthrough
CT: control target
= control target key end

     0   :  { %8 = vsyncpa [#allocation3], 0  ;;  %s2446_s0 = inlined_call_operand.hbm [shape: f32[512,128], index: 0, kind: input, shape index: {}]   ;;  %s2447_s1 = inlined_call_operand.hbm [shape: bf16[3,128,128], index: 1, kind: input, shape index: {}]   ;;  %s2448_s2 = inlined_call_operand.vmem [shape: f32[3,1,128], index: 2, kind: input, shape index: {}]   ;;  %s2449_s3 = inlined_call_operand.hbm [shape: f32[512,128], index: 3, kind: output, shape index: {}]  }
   0x1   :  { %9 = vsyncpa [#allocation6], 0 }
   0x2   :  { %10 = vsyncpa [#allocation4], 0  ;;  %s2134_s12 = smov [#allocation2]   ;;  %s2062_s16 = scalar_lea.hbm %s2446_s0, 8192 }
   0x3   :  { %s16_s13 = sshll.u32 %s2134_s12, 4  ;;  %p2063_p0 = scmp.ne.s32.totalorder %s2446_s0, %s2062_s16  ;;  %s17_s13 = int_to_ptr.vmem [resolvable:$true] %s16_s13 }
   0x4   :  { %p2066_p1 = scmp.lt.u32.totalorder %s2062_s16, %s2446_s0 }
   0x6   :  { %p2068_p2 = pnand %p2066_p1, %p2063_p0 }
   0x8   :  { %2071 = shalt.err (!%p2068_p2)
}
   0x9   :  { %s2072_s21 = scalar_lea.vmem %s17_s13, 8192  ;;  %p2077_p4 = scmp.lt.s32.totalorder %s17_s13, %s17_s13 }
   0xa   :  { %p2073_p3 = scmp.ne.s32.totalorder %s17_s13, %s2072_s21  ;;  %p2078_p5 = scmp.lt.s32.totalorder %s2072_s21, %s2072_s21 }
   0xc   :  { %p2079_p6 = por %p2078_p5, %p2077_p4 }
   0xe   :  { %p2080_p7 = pnand %p2079_p6, %p2073_p3 }
  0x10   :  { %2083 = shalt.err (!%p2080_p7)
}
  0x11   :  { %s2135_s22 = smov 128   ;;  %s2136_s23 = smov 8  }
  0x12   :  { %22 = dma.hbm_to_vmem [thread:$0]  %s2446_s0, 8192, %s17_s13, [#allocation3], %s2135_s22, %s2135_s22, %s2136_s23  }
  0x13   :  { %s2137_s26 = smov [#allocation5]   ;;  %s2084_s30 = scalar_lea.hbm %s2447_s1, 3072 }
  0x14   :  { %s28_s27 = sshll.u32 %s2137_s26, 4  ;;  %p2085_p8 = scmp.ne.s32.totalorder %s2447_s1, %s2084_s30  ;;  %s29_s27 = int_to_ptr.vmem [resolvable:$true] %s28_s27 }
  0x15   :  { %p2088_p9 = scmp.lt.u32.totalorder %s2084_s30, %s2447_s1 }
  0x17   :  { %p2090_p10 = pnand %p2088_p9, %p2085_p8 }
  0x19   :  { %2093 = shalt.err (!%p2090_p10)
}
  0x1a   :  { %s2094_s8 = scalar_lea.vmem %s29_s27, 3072  ;;  %p2099_p12 = scmp.lt.s32.totalorder %s29_s27, %s29_s27 }
  0x1b   :  { %p2095_p11 = scmp.ne.s32.totalorder %s29_s27, %s2094_s8  ;;  %p2100_p13 = scmp.lt.s32.totalorder %s2094_s8, %s2094_s8 }
  0x1d   :  { %p2101_p0 = por %p2100_p13, %p2099_p12 }
  0x1f   :  { %p2102_p1 = pnand %p2101_p0, %p2095_p11 }
  0x21   :  { %2105 = shalt.err (!%p2102_p1)
}
  0x22   :  { %s2138_s0 = smov 64   ;;  %s2139_s9 = smov 4  }
  0x23   :  { %34 = dma.hbm_to_vmem [thread:$0]  %s2447_s1, 3072, %s29_s27, [#allocation6], %s2138_s0, %s2138_s0, %s2139_s9  }
  0x24   :  { %2128 = dma.done.wait [#allocation3], 8192  }
  0x25   :  { %2129 = vsyncadd [#allocation3], 4294959104 }
  0x26   :  { %2130 = dma.done.wait [#allocation6], 3072  }
  0x27   :  { %2131 = vsyncadd [#allocation6], 4294964224  ;;  %v1974_v0 = vld [vmem:[#allocation5] sm:$0xff]   ;;  %v1975_v1 = vld [vmem:[#allocation5 + $0x8] sm:$0xff]  }
  0x28   :  { %1711 = vmatprep.subr.bf16.mxu0 %v1974_v0  ;;  %1951 = vmatprep.subr.bf16.mxu1 %v1974_v0  ;;  %v1976_v2 = vld [vmem:[#allocation5 + $0x10] sm:$0xff]   ;;  %v1977_v3 = vld [vmem:[#allocation5 + $0x18] sm:$0xff]   ;;  %v44_v4 = vld [vmem:[#allocation2] sm:$0xff] }
  0x29   :  { %1712 = vmatpush3.bf16.msra.mxu0 %v1974_v0  ;;  %1959 = vmatpush3.bf16.msra.mxu1 %v1974_v0  ;;  %v45_v5 = vld [vmem:[#allocation2 + $0x8] sm:$0xff]  ;;  %v1978_v7 = vld [vmem:[#allocation5 + $0x20] sm:$0xff]   ;;  %v1980_v11 = vld [vmem:[#allocation5 + $0x30] sm:$0xff]  }
  0x2a   :  { %1713 = vmatprep.subr.bf16.mxu0 %v1975_v1  ;;  %1952 = vmatprep.subr.bf16.mxu1 %v1975_v1  ;;  %v108_v6 = vpack.c.bf16 %v45_v5, %v44_v4  ;;  %v1979_v8 = vld [vmem:[#allocation5 + $0x28] sm:$0xff]   ;;  %v76_v9 = vld [vmem:[#allocation2 + $0x100] sm:$0xff]  ;;  %v1981_v13 = vld [vmem:[#allocation5 + $0x38] sm:$0xff]  }
  0x2b   :  { %v77_v10 = vld [vmem:[#allocation2 + $0x108] sm:$0xff]  ;;  %v46_v14 = vld [vmem:[#allocation2 + $0x10] sm:$0xff]  ;;  %v47_v15 = vld [vmem:[#allocation2 + $0x18] sm:$0xff] }
  0x2c   :  { %1727 = vmatprep.mubr.bf16.mxu0 %v108_v6  ;;  %v124_v12 = vpack.c.bf16 %v77_v10, %v76_v9  ;;  %v48_v16 = vld [vmem:[#allocation2 + $0x20] sm:$0xff]  ;;  %v49_v17 = vld [vmem:[#allocation2 + $0x28] sm:$0xff]  ;;  %v78_v18 = vld [vmem:[#allocation2 + $0x110] sm:$0xff]  ;;  %v109_v22 = vpack.c.bf16 %v47_v15, %v46_v14 }
  0x2d   :  { %1714 = vmatpush3.bf16.msra.mxu0 %v1975_v1  ;;  %1960 = vmatpush3.bf16.msra.mxu1 %v1975_v1  ;;  %v79_v19 = vld [vmem:[#allocation2 + $0x118] sm:$0xff]  ;;  %v80_v20 = vld [vmem:[#allocation2 + $0x120] sm:$0xff]  ;;  %v81_v21 = vld [vmem:[#allocation2 + $0x128] sm:$0xff]  ;;  %v110_v24 = vpack.c.bf16 %v49_v17, %v48_v16 }
  0x2e   :  { %1715 = vmatprep.subr.bf16.mxu0 %v1976_v2  ;;  %1953 = vmatprep.subr.bf16.mxu1 %v1976_v2  ;;  %v1982_v23 = vld [vmem:[#allocation5 + $0x40] sm:$0xff]   ;;  %v125_v25 = vpack.c.bf16 %v79_v19, %v78_v18  ;;  %v126_v26 = vpack.c.bf16 %v81_v21, %v80_v20  ;;  %v50_v27 = vld [vmem:[#allocation2 + $0x30] sm:$0xff]  ;;  %v51_v28 = vld [vmem:[#allocation2 + $0x38] sm:$0xff] }
  0x2f   :  { %1759 = vmatprep.mubr.bf16.mxu1 %v124_v12  ;;  %v1983_v29 = vld [vmem:[#allocation5 + $0x48] sm:$0xff]   ;;  %v52_v30 = vld [vmem:[#allocation2 + $0x40] sm:$0xff]  ;;  %v82_v32 = vld [vmem:[#allocation2 + $0x130] sm:$0xff]  ;;  %v111_v37 = vpack.c.bf16 %v51_v28, %v50_v27 }
  0x30   :  { %v53_v31 = vld [vmem:[#allocation2 + $0x48] sm:$0xff]  ;;  %v83_v33 = vld [vmem:[#allocation2 + $0x138] sm:$0xff]  ;;  %v84_v34 = vld [vmem:[#allocation2 + $0x140] sm:$0xff] }
  0x31   :  { %1716 = vmatpush3.bf16.msra.mxu0 %v1976_v2  ;;  %1961 = vmatpush3.bf16.msra.mxu1 %v1976_v2  ;;  %v85_v35 = vld [vmem:[#allocation2 + $0x148] sm:$0xff]  ;;  %v1984_v36 = vld [vmem:[#allocation5 + $0x50] sm:$0xff]   ;;  %v112_v38 = vpack.c.bf16 %v53_v31, %v52_v30  ;;  %v127_v39 = vpack.c.bf16 %v83_v33, %v82_v32  ;;  %v1985_v40 = vld [vmem:[#allocation5 + $0x58] sm:$0xff]  }
  0x32   :  { %1717 = vmatprep.subr.bf16.mxu0 %v1977_v3  ;;  %1954 = vmatprep.subr.bf16.mxu1 %v1977_v3  ;;  %v128_v41 = vpack.c.bf16 %v85_v35, %v84_v34  ;;  %v54_v42 = vld [vmem:[#allocation2 + $0x50] sm:$0xff]  ;;  %v55_v43 = vld [vmem:[#allocation2 + $0x58] sm:$0xff]  ;;  %v56_v44 = vld [vmem:[#allocation2 + $0x60] sm:$0xff] }
  0x33   :  { %v57_v45 = vld [vmem:[#allocation2 + $0x68] sm:$0xff]  ;;  %v86_v46 = vld [vmem:[#allocation2 + $0x150] sm:$0xff]  ;;  %v87_v47 = vld [vmem:[#allocation2 + $0x158] sm:$0xff]  ;;  %v113_v51 = vpack.c.bf16 %v55_v43, %v54_v42 }
  0x34   :  { %v88_v48 = vld [vmem:[#allocation2 + $0x160] sm:$0xff]  ;;  %v89_v49 = vld [vmem:[#allocation2 + $0x168] sm:$0xff]  ;;  %v114_v52 = vpack.c.bf16 %v57_v45, %v56_v44  ;;  %v129_v53 = vpack.c.bf16 %v87_v47, %v86_v46  ;;  %v58_v56 = vld [vmem:[#allocation2 + $0x70] sm:$0xff] }
  0x35   :  { %1718 = vmatpush3.bf16.msra.mxu0 %v1977_v3  ;;  %1962 = vmatpush3.bf16.msra.mxu1 %v1977_v3  ;;  %v1986_v50 = vld [vmem:[#allocation5 + $0x60] sm:$0xff]   ;;  %v130_v54 = vpack.c.bf16 %v89_v49, %v88_v48  ;;  %v1987_v55 = vld [vmem:[#allocation5 + $0x68] sm:$0xff]   ;;  %v59_v57 = vld [vmem:[#allocation2 + $0x78] sm:$0xff] }
  0x36   :  { %1719 = vmatprep.subr.bf16.mxu0 %v1978_v7  ;;  %1955 = vmatprep.subr.bf16.mxu1 %v1978_v7  ;;  %v60_v58 = vld [vmem:[#allocation2 + $0x80] sm:$0xff]  ;;  %v61_v59 = vld [vmem:[#allocation2 + $0x88] sm:$0xff]  ;;  %v90_v60 = vld [vmem:[#allocation2 + $0x170] sm:$0xff]  ;;  %v115_v1 = vpack.c.bf16 %v59_v57, %v58_v56 }
  0x37   :  { %v91_v61 = vld [vmem:[#allocation2 + $0x178] sm:$0xff]  ;;  %v92_v62 = vld [vmem:[#allocation2 + $0x180] sm:$0xff]  ;;  %v93_v63 = vld [vmem:[#allocation2 + $0x188] sm:$0xff]  ;;  %v116_v2 = vpack.c.bf16 %v61_v59, %v60_v58 }
  0x38   :  { %v1988_v0 = vld [vmem:[#allocation5 + $0x70] sm:$0xff]   ;;  %v131_v3 = vpack.c.bf16 %v91_v61, %v90_v60  ;;  %v132_v4 = vpack.c.bf16 %v93_v63, %v92_v62  ;;  %v63_v6 = vld [vmem:[#allocation2 + $0x98] sm:$0xff]  ;;  %v97_v12 = vld [vmem:[#allocation2 + $0x1a8] sm:$0xff] }
  0x39   :  { %1720 = vmatpush3.bf16.msra.mxu0 %v1978_v7  ;;  %1963 = vmatpush3.bf16.msra.mxu1 %v1978_v7  ;;  %v62_v5 = vld [vmem:[#allocation2 + $0x90] sm:$0xff]  ;;  %v64_v7 = vld [vmem:[#allocation2 + $0xa0] sm:$0xff]  ;;  %v95_v10 = vld [vmem:[#allocation2 + $0x198] sm:$0xff] }
  0x3a   :  { %1721 = vmatprep.subr.bf16.mxu0 %v1979_v8  ;;  %1956 = vmatprep.subr.bf16.mxu1 %v1979_v8  ;;  %v94_v9 = vld [vmem:[#allocation2 + $0x190] sm:$0xff]  ;;  %v67_v18 = vld [vmem:[#allocation2 + $0xb8] sm:$0xff]  ;;  %v68_v19 = vld [vmem:[#allocation2 + $0xc0] sm:$0xff] }
  0x3b   :  { %v133_v15 = vpack.c.bf16 %v95_v10, %v94_v9  ;;  %v66_v17 = vld [vmem:[#allocation2 + $0xb0] sm:$0xff]  ;;  %v69_v20 = vld [vmem:[#allocation2 + $0xc8] sm:$0xff]  ;;  %v71_v30 = vld [vmem:[#allocation2 + $0xd8] sm:$0xff] }
  0x3c   :  { %v98_v21 = vld [vmem:[#allocation2 + $0x1b0] sm:$0xff]  ;;  %v72_v31 = vld [vmem:[#allocation2 + $0xe0] sm:$0xff]  ;;  %v73_v32 = vld [vmem:[#allocation2 + $0xe8] sm:$0xff] }
  0x3d   :  { %1722 = vmatpush3.bf16.msra.mxu0 %v1979_v8  ;;  %1964 = vmatpush3.bf16.msra.mxu1 %v1979_v8  ;;  %v65_v8 = vld [vmem:[#allocation2 + $0xa8] sm:$0xff]  ;;  %v102_v33 = vld [vmem:[#allocation2 + $0x1d0] sm:$0xff]  ;;  %v103_v34 = vld [vmem:[#allocation2 + $0x1d8] sm:$0xff] }
  0x3e   :  { %1723 = vmatprep.subr.bf16.mxu0 %v1980_v11  ;;  %1957 = vmatprep.subr.bf16.mxu1 %v1980_v11  ;;  %v118_v14 = vpack.c.bf16 %v65_v8, %v64_v7  ;;  %v104_v35 = vld [vmem:[#allocation2 + $0x1e0] sm:$0xff]  ;;  %v75_v42 = vld [vmem:[#allocation2 + $0xf8] sm:$0xff]  ;;  %v106_v43 = vld [vmem:[#allocation2 + $0x1f0] sm:$0xff] }
  0x3f   :  { %v107_v44 = vld [vmem:[#allocation2 + $0x1f8] sm:$0xff]  ;;  %v2191_v48 = vld [vmem:[%s2448_s2] ss:$0 sm:$0xff]  ;;  %v1991_v62 = vld [vmem:[#allocation5 + $0x88] sm:$0xff]  }
  0x40   :  { %v139_v46 = vpack.c.bf16 %v107_v44, %v106_v43  ;;  %v1989_v47 = vld [vmem:[#allocation5 + $0x78] sm:$0xff]   ;;  %v1990_v61 = vld [vmem:[#allocation5 + $0x80] sm:$0xff]  }
  0x41   :  { %1724 = vmatpush3.bf16.msra.mxu0 %v1980_v11  ;;  %1965 = vmatpush3.bf16.msra.mxu1 %v1980_v11  ;;  %v96_v11 = vld [vmem:[#allocation2 + $0x1a0] sm:$0xff] }
  0x42   :  { %1725 = vmatprep.subr.bf16.mxu0 %v1981_v13  ;;  %1958 = vmatprep.subr.bf16.mxu1 %v1981_v13  ;;  %v134_v16 = vpack.c.bf16 %v97_v12, %v96_v11  ;;  %v1992_v12 = vld [vmem:[#allocation5 + $0x90] sm:$0xff]  }
  0x45   :  { %1726 = vmatpush3.bf16.msra.mxu0 %v1981_v13  ;;  %1966 = vmatpush3.bf16.msra.mxu1 %v1981_v13  ;;  %v117_v13 = vpack.c.bf16 %v63_v6, %v62_v5 }
  0x46   :  { %1791 = vmatprep.subr.bf16.mxu1 %v1982_v23  ;;  %1871 = vmatprep.subr.bf16.mxu0 %v1990_v61 }
  0x48   :  { %1728 = vmatmul.mubr.bf16.vlgmr.msra.gmra.mrb[0].mxu0 %v109_v22  ;;  %1760 = vmatmul.mubr.bf16.vlgmr.msra.gmra.mrb[0].mxu1 %v125_v25  ;;  %v99_v22 = vld [vmem:[#allocation2 + $0x1b8] sm:$0xff]  ;;  %v119_v25 = vpack.c.bf16 %v67_v18, %v66_v17 }
  0x49   :  { %1731 = vmatprep.mubr.bf16.mxu0 %v110_v24  ;;  %1763 = vmatprep.mubr.bf16.mxu1 %v126_v26  ;;  %v101_v24 = vld [vmem:[#allocation2 + $0x1c8] sm:$0xff]  ;;  %v120_v26 = vpack.c.bf16 %v69_v20, %v68_v19  ;;  %v135_v27 = vpack.c.bf16 %v99_v22, %v98_v21 }
  0x4a   :  { %1792 = vmatpush3.bf16.msra.mxu1 %v1982_v23  ;;  %v100_v23 = vld [vmem:[#allocation2 + $0x1c0] sm:$0xff]  ;;  %1872 = vmatpush3.bf16.msra.mxu0 %v1990_v61 }
  0x4b   :  { %1793 = vmatprep.subr.bf16.mxu1 %v1983_v29  ;;  %v136_v28 = vpack.c.bf16 %v101_v24, %v100_v23  ;;  %1873 = vmatprep.subr.bf16.mxu0 %v1991_v62 }
  0x4e   :  { %1794 = vmatpush3.bf16.msra.mxu1 %v1983_v29  ;;  %v70_v29 = vld [vmem:[#allocation2 + $0xd0] sm:$0xff]  ;;  %1874 = vmatpush3.bf16.msra.mxu0 %v1991_v62 }
  0x4f   :  { %1795 = vmatprep.subr.bf16.mxu1 %v1984_v36  ;;  %1875 = vmatprep.subr.bf16.mxu0 %v1992_v12 }
  0x50   :  { %1732 = vmatmul.mubr.bf16.gmra.mrb[4].mxu0 %v111_v37  ;;  %1764 = vmatmul.mubr.bf16.gmra.mrb[4].mxu1 %v127_v39  ;;  %v121_v37 = vpack.c.bf16 %v71_v30, %v70_v29  ;;  %v137_v39 = vpack.c.bf16 %v103_v34, %v102_v33 }
  0x51   :  { %1735 = vmatprep.mubr.bf16.mxu0 %v112_v38  ;;  %1767 = vmatprep.mubr.bf16.mxu1 %v128_v41  ;;  %v122_v38 = vpack.c.bf16 %v73_v32, %v72_v31  ;;  %v74_v41 = vld [vmem:[#allocation2 + $0xf0] sm:$0xff] }
  0x52   :  { %1796 = vmatpush3.bf16.msra.mxu1 %v1984_v36  ;;  %v105_v36 = vld [vmem:[#allocation2 + $0x1e8] sm:$0xff]  ;;  %v123_v45 = vpack.c.bf16 %v75_v42, %v74_v41  ;;  %1876 = vmatpush3.bf16.msra.mxu0 %v1992_v12  ;;  %v1994_v42 = vld [vmem:[#allocation5 + $0xa0] sm:$0xff]  }
  0x53   :  { %1797 = vmatprep.subr.bf16.mxu1 %v1985_v40 }
  0x56   :  { %1798 = vmatpush3.bf16.msra.mxu1 %v1985_v40  ;;  %v138_v40 = vpack.c.bf16 %v105_v36, %v104_v35 }
  0x57   :  { %1799 = vmatprep.subr.bf16.mxu1 %v1986_v50 }
  0x58   :  { %1736 = vmatmul.mubr.bf16.gmra.mrb[8].mxu0 %v113_v51  ;;  %1768 = vmatmul.mubr.bf16.gmra.mrb[8].mxu1 %v129_v53 }
  0x59   :  { %1739 = vmatprep.mubr.bf16.mxu0 %v114_v52  ;;  %1771 = vmatprep.mubr.bf16.mxu1 %v130_v54 }
  0x5a   :  { %1800 = vmatpush3.bf16.msra.mxu1 %v1986_v50 }
  0x5b   :  { %1801 = vmatprep.subr.bf16.mxu1 %v1987_v55 }
  0x5e   :  { %1802 = vmatpush3.bf16.msra.mxu1 %v1987_v55 }
  0x5f   :  { %1803 = vmatprep.subr.bf16.mxu1 %v1988_v0 }
  0x60   :  { %1740 = vmatmul.mubr.bf16.gmra.mrb[12].mxu0 %v115_v1  ;;  %1772 = vmatmul.mubr.bf16.gmra.mrb[12].mxu1 %v131_v3 }
  0x61   :  { %1743 = vmatprep.mubr.bf16.mxu0 %v116_v2  ;;  %1775 = vmatprep.mubr.bf16.mxu1 %v132_v4 }
  0x62   :  { %1804 = vmatpush3.bf16.msra.mxu1 %v1988_v0 }
  0x63   :  { %1805 = vmatprep.subr.bf16.mxu1 %v1989_v47 }
  0x66   :  { %1806 = vmatpush3.bf16.msra.mxu1 %v1989_v47 }
  0x68   :  { %1744 = vmatmul.mubr.bf16.gmra.mrb[16].mxu0 %v117_v13  ;;  %1776 = vmatmul.mubr.bf16.gmra.mrb[16].mxu1 %v133_v15 }
  0x69   :  { %1747 = vmatprep.mubr.bf16.mxu0 %v118_v14  ;;  %1779 = vmatprep.mubr.bf16.mxu1 %v134_v16 }
  0x70   :  { %1748 = vmatmul.mubr.bf16.gmra.mrb[20].mxu0 %v119_v25  ;;  %1780 = vmatmul.mubr.bf16.gmra.mrb[20].mxu1 %v135_v27 }
  0x71   :  { %1751 = vmatprep.mubr.bf16.mxu0 %v120_v26  ;;  %1783 = vmatprep.mubr.bf16.mxu1 %v136_v28  ;;  %v1993_v28 = vld [vmem:[#allocation5 + $0x98] sm:$0xff]  }
  0x72   :  { %1877 = vmatprep.subr.bf16.mxu0 %v1993_v28 }
  0x73   :  { %1878 = vmatpush3.bf16.msra.mxu0 %v1993_v28 }
  0x74   :  { %1879 = vmatprep.subr.bf16.mxu0 %v1994_v42 }
  0x77   :  { %1880 = vmatpush3.bf16.msra.mxu0 %v1994_v42 }
  0x78   :  { %1752 = vmatmul.mubr.bf16.gmra.mrb[24].mxu0 %v121_v37  ;;  %1784 = vmatmul.mubr.bf16.gmra.mrb[24].mxu1 %v137_v39 }
  0x79   :  { %1755 = vmatprep.mubr.bf16.mxu0 %v122_v38  ;;  %1787 = vmatprep.mubr.bf16.mxu1 %v138_v40 }
  0x80   :  { %1756 = vmatmul.mubr.bf16.gmra.mrb[28].mxu0 %v123_v45  ;;  %1788 = vmatmul.mubr.bf16.gmra.mrb[28].mxu1 %v139_v46 }
 0x11b   :  { %v1729_v49 = vpop.f32.mrb[0].mxu0  ;;  %v1761_v52 = vpop.f32.mrb[0].mxu1 }
 0x11c   :  { %v254_v50 = vadd.f32 %v1729_v49, %v2191_v48  ;;  %v245_v51 = vpop.f32.mrb[1].mxu0  ;;  %v382_v55 = vadd.f32 %v1761_v52, %v2191_v48  ;;  %v373_v56 = vpop.f32.mrb[1].mxu1 }
 0x11d   :  { %v246_v53 = vadd.f32 %v2191_v48, %v245_v51  ;;  %v1730_v54 = vpop.f32.mrb[2].mxu0  ;;  %v374_v59 = vadd.f32 %v2191_v48, %v373_v56  ;;  %v1762_v60 = vpop.f32.mrb[2].mxu1 }
 0x11e   :  { %v257_v57 = vadd.f32 %v1730_v54, %v2191_v48  ;;  %v248_v58 = vpop.f32.mrb[3].mxu0  ;;  %v534_v0 = vmax.f32 %v382_v55, 0.0  ;;  %v385_v1 = vadd.f32 %v1762_v60, %v2191_v48  ;;  %v376_v2 = vpop.f32.mrb[3].mxu1  ;;  %v502_v3 = vmax.f32 %v254_v50, 0.0 }
 0x11f   :  { %v249_v63 = vadd.f32 %v2191_v48, %v248_v58  ;;  %v532_v5 = vmax.f32 %v374_v59, 0.0  ;;  %v377_v6 = vadd.f32 %v2191_v48, %v376_v2  ;;  %v500_v7 = vmax.f32 %v246_v53, 0.0  ;;  %v1995_v59 = vld [vmem:[#allocation5 + $0xa8] sm:$0xff]  }
 0x120   :  { %v503_v4 = vmax.f32 %v257_v57, 0.0  ;;  %v535_v9 = vmax.f32 %v385_v1, 0.0  ;;  %1881 = vmatprep.subr.bf16.mxu0 %v1995_v59 }
 0x121   :  { %v501_v8 = vmax.f32 %v249_v63, 0.0  ;;  %v533_v11 = vmax.f32 %v377_v6, 0.0  ;;  %1882 = vmatpush3.bf16.msra.mxu0 %v1995_v59 }
 0x122   :  { %v565_v10 = vpack.c.bf16 %v503_v4, %v502_v3  ;;  %v2201_v15 = vpack.c.bf16 %v535_v9, %v534_v0  ;;  %v1996_v9 = vld [vmem:[#allocation5 + $0xb0] sm:$0xff]  }
 0x123   :  { %v564_v13 = vpack.c.bf16 %v501_v8, %v500_v7  ;;  %v1733_v14 = vpop.f32.mrb[4].mxu0  ;;  %v2204_v18 = vpack.c.bf16 %v533_v11, %v532_v5  ;;  %v1765_v19 = vpop.f32.mrb[4].mxu1  ;;  %1883 = vmatprep.subr.bf16.mxu0 %v1996_v9 }
 0x124   :  { %v270_v16 = vadd.f32 %v1733_v14, %v2191_v48  ;;  %v261_v17 = vpop.f32.mrb[5].mxu0  ;;  %v398_v22 = vadd.f32 %v1765_v19, %v2191_v48  ;;  %v389_v23 = vpop.f32.mrb[5].mxu1 }
 0x125   :  { %v262_v20 = vadd.f32 %v2191_v48, %v261_v17  ;;  %v1734_v21 = vpop.f32.mrb[6].mxu0  ;;  %1807 = vmatprep.mubr.bf16.mxu1 %v564_v13  ;;  %v390_v26 = vadd.f32 %v2191_v48, %v389_v23  ;;  %v1766_v27 = vpop.f32.mrb[6].mxu1  ;;  %1884 = vmatpush3.bf16.msra.mxu0 %v1996_v9 }
 0x126   :  { %v273_v24 = vadd.f32 %v1734_v21, %v2191_v48  ;;  %v264_v25 = vpop.f32.mrb[7].mxu0  ;;  %1808 = vmatmul.mubr.bf16.vlgmr.msra.gmra.mrb[32].mxu1 %v565_v10  ;;  %v538_v30 = vmax.f32 %v398_v22, 0.0  ;;  %v401_v31 = vadd.f32 %v1766_v27, %v2191_v48  ;;  %v392_v32 = vpop.f32.mrb[7].mxu1  ;;  %v506_v33 = vmax.f32 %v270_v16, 0.0 }
 0x127   :  { %v265_v29 = vadd.f32 %v2191_v48, %v264_v25  ;;  %v536_v35 = vmax.f32 %v390_v26, 0.0  ;;  %v393_v36 = vadd.f32 %v2191_v48, %v392_v32  ;;  %v504_v37 = vmax.f32 %v262_v20, 0.0 }
 0x128   :  { %v507_v34 = vmax.f32 %v273_v24, 0.0  ;;  %v539_v39 = vmax.f32 %v401_v31, 0.0 }
 0x129   :  { %v505_v38 = vmax.f32 %v265_v29, 0.0  ;;  %v537_v41 = vmax.f32 %v393_v36, 0.0 }
 0x12a   :  { %v567_v40 = vpack.c.bf16 %v507_v34, %v506_v33  ;;  %v2213_v45 = vpack.c.bf16 %v539_v39, %v538_v30 }
 0x12b   :  { %v566_v43 = vpack.c.bf16 %v505_v38, %v504_v37  ;;  %v1737_v44 = vpop.f32.mrb[8].mxu0  ;;  %v2216_v49 = vpack.c.bf16 %v537_v41, %v536_v35  ;;  %v1769_v50 = vpop.f32.mrb[8].mxu1 }
 0x12c   :  { %v286_v46 = vadd.f32 %v1737_v44, %v2191_v48  ;;  %v277_v47 = vpop.f32.mrb[9].mxu0  ;;  %v414_v53 = vadd.f32 %v1769_v50, %v2191_v48  ;;  %v405_v54 = vpop.f32.mrb[9].mxu1 }
 0x12d   :  { %v278_v51 = vadd.f32 %v2191_v48, %v277_v47  ;;  %v1738_v52 = vpop.f32.mrb[10].mxu0  ;;  %1811 = vmatprep.mubr.bf16.mxu1 %v566_v43  ;;  %v406_v57 = vadd.f32 %v2191_v48, %v405_v54  ;;  %v1770_v58 = vpop.f32.mrb[10].mxu1 }
 0x12e   :  { %v289_v55 = vadd.f32 %v1738_v52, %v2191_v48  ;;  %v280_v56 = vpop.f32.mrb[11].mxu0  ;;  %1812 = vmatmul.mubr.bf16.gmra.mrb[36].mxu1 %v567_v40  ;;  %v542_v61 = vmax.f32 %v414_v53, 0.0  ;;  %v417_v62 = vadd.f32 %v1770_v58, %v2191_v48  ;;  %v408_v63 = vpop.f32.mrb[11].mxu1  ;;  %v510_v0 = vmax.f32 %v286_v46, 0.0 }
 0x12f   :  { %v281_v60 = vadd.f32 %v2191_v48, %v280_v56  ;;  %v540_v2 = vmax.f32 %v406_v57, 0.0  ;;  %v409_v3 = vadd.f32 %v2191_v48, %v408_v63  ;;  %v508_v4 = vmax.f32 %v278_v51, 0.0 }
 0x130   :  { %v511_v1 = vmax.f32 %v289_v55, 0.0  ;;  %v543_v6 = vmax.f32 %v417_v62, 0.0 }
 0x131   :  { %v509_v5 = vmax.f32 %v281_v60, 0.0  ;;  %v541_v8 = vmax.f32 %v409_v3, 0.0 }
 0x132   :  { %v569_v7 = vpack.c.bf16 %v511_v1, %v510_v0  ;;  %v2225_v12 = vpack.c.bf16 %v543_v6, %v542_v61 }
 0x133   :  { %v568_v10 = vpack.c.bf16 %v509_v5, %v508_v4  ;;  %v1741_v11 = vpop.f32.mrb[12].mxu0  ;;  %v2228_v16 = vpack.c.bf16 %v541_v8, %v540_v2  ;;  %v1773_v17 = vpop.f32.mrb[12].mxu1 }
 0x134   :  { %v302_v13 = vadd.f32 %v1741_v11, %v2191_v48  ;;  %v293_v14 = vpop.f32.mrb[13].mxu0  ;;  %v430_v21 = vadd.f32 %v1773_v17, %v2191_v48  ;;  %v421_v22 = vpop.f32.mrb[13].mxu1 }
 0x135   :  { %v294_v19 = vadd.f32 %v2191_v48, %v293_v14  ;;  %v1742_v20 = vpop.f32.mrb[14].mxu0  ;;  %1815 = vmatprep.mubr.bf16.mxu1 %v568_v10  ;;  %v422_v25 = vadd.f32 %v2191_v48, %v421_v22  ;;  %v1774_v26 = vpop.f32.mrb[14].mxu1 }
 0x136   :  { %v305_v23 = vadd.f32 %v1742_v20, %v2191_v48  ;;  %v296_v24 = vpop.f32.mrb[15].mxu0  ;;  %1816 = vmatmul.mubr.bf16.gmra.mrb[40].mxu1 %v569_v7  ;;  %v546_v28 = vmax.f32 %v430_v21, 0.0  ;;  %v433_v29 = vadd.f32 %v1774_v26, %v2191_v48  ;;  %v424_v30 = vpop.f32.mrb[15].mxu1  ;;  %v514_v31 = vmax.f32 %v302_v13, 0.0 }
 0x137   :  { %v297_v27 = vadd.f32 %v2191_v48, %v296_v24  ;;  %v544_v33 = vmax.f32 %v422_v25, 0.0  ;;  %v425_v34 = vadd.f32 %v2191_v48, %v424_v30  ;;  %v512_v35 = vmax.f32 %v294_v19, 0.0 }
 0x138   :  { %v515_v32 = vmax.f32 %v305_v23, 0.0  ;;  %v547_v37 = vmax.f32 %v433_v29, 0.0 }
 0x139   :  { %v513_v36 = vmax.f32 %v297_v27, 0.0  ;;  %v545_v39 = vmax.f32 %v425_v34, 0.0 }
 0x13a   :  { %v571_v38 = vpack.c.bf16 %v515_v32, %v514_v31  ;;  %v2237_v42 = vpack.c.bf16 %v547_v37, %v546_v28 }
 0x13b   :  { %v570_v40 = vpack.c.bf16 %v513_v36, %v512_v35  ;;  %v1745_v41 = vpop.f32.mrb[16].mxu0  ;;  %v2240_v46 = vpack.c.bf16 %v545_v39, %v544_v33  ;;  %v1777_v47 = vpop.f32.mrb[16].mxu1 }
 0x13c   :  { %v318_v43 = vadd.f32 %v1745_v41, %v2191_v48  ;;  %v309_v44 = vpop.f32.mrb[17].mxu0  ;;  %v446_v52 = vadd.f32 %v1777_v47, %v2191_v48  ;;  %v437_v53 = vpop.f32.mrb[17].mxu1 }
 0x13d   :  { %v310_v50 = vadd.f32 %v2191_v48, %v309_v44  ;;  %v1746_v51 = vpop.f32.mrb[18].mxu0  ;;  %1819 = vmatprep.mubr.bf16.mxu1 %v570_v40  ;;  %v438_v56 = vadd.f32 %v2191_v48, %v437_v53  ;;  %v1778_v57 = vpop.f32.mrb[18].mxu1 }
 0x13e   :  { %v321_v54 = vadd.f32 %v1746_v51, %v2191_v48  ;;  %v312_v55 = vpop.f32.mrb[19].mxu0  ;;  %1820 = vmatmul.mubr.bf16.gmra.mrb[44].mxu1 %v571_v38  ;;  %v550_v59 = vmax.f32 %v446_v52, 0.0  ;;  %v449_v60 = vadd.f32 %v1778_v57, %v2191_v48  ;;  %v440_v61 = vpop.f32.mrb[19].mxu1  ;;  %v518_v62 = vmax.f32 %v318_v43, 0.0 }
 0x13f   :  { %v313_v58 = vadd.f32 %v2191_v48, %v312_v55  ;;  %v548_v0 = vmax.f32 %v438_v56, 0.0  ;;  %v441_v1 = vadd.f32 %v2191_v48, %v440_v61  ;;  %v516_v2 = vmax.f32 %v310_v50, 0.0 }
 0x140   :  { %v519_v63 = vmax.f32 %v321_v54, 0.0  ;;  %v551_v4 = vmax.f32 %v449_v60, 0.0 }
 0x141   :  { %v517_v3 = vmax.f32 %v313_v58, 0.0  ;;  %v549_v6 = vmax.f32 %v441_v1, 0.0 }
 0x142   :  { %v573_v5 = vpack.c.bf16 %v519_v63, %v518_v62  ;;  %v2249_v9 = vpack.c.bf16 %v551_v4, %v550_v59 }
 0x143   :  { %v572_v7 = vpack.c.bf16 %v517_v3, %v516_v2  ;;  %v1749_v8 = vpop.f32.mrb[20].mxu0  ;;  %v2252_v13 = vpack.c.bf16 %v549_v6, %v548_v0  ;;  %v1781_v14 = vpop.f32.mrb[20].mxu1 }
 0x144   :  { %v334_v10 = vadd.f32 %v1749_v8, %v2191_v48  ;;  %v325_v11 = vpop.f32.mrb[21].mxu0  ;;  %v462_v20 = vadd.f32 %v1781_v14, %v2191_v48  ;;  %v453_v21 = vpop.f32.mrb[21].mxu1 }
 0x145   :  { %v326_v17 = vadd.f32 %v2191_v48, %v325_v11  ;;  %v1750_v19 = vpop.f32.mrb[22].mxu0  ;;  %1823 = vmatprep.mubr.bf16.mxu1 %v572_v7  ;;  %v454_v24 = vadd.f32 %v2191_v48, %v453_v21  ;;  %v1782_v25 = vpop.f32.mrb[22].mxu1 }
 0x146   :  { %v337_v22 = vadd.f32 %v1750_v19, %v2191_v48  ;;  %v328_v23 = vpop.f32.mrb[23].mxu0  ;;  %1824 = vmatmul.mubr.bf16.gmra.mrb[48].mxu1 %v573_v5  ;;  %v554_v27 = vmax.f32 %v462_v20, 0.0  ;;  %v465_v28 = vadd.f32 %v1782_v25, %v2191_v48  ;;  %v456_v29 = vpop.f32.mrb[23].mxu1  ;;  %v522_v30 = vmax.f32 %v334_v10, 0.0 }
 0x147   :  { %v329_v26 = vadd.f32 %v2191_v48, %v328_v23  ;;  %v552_v32 = vmax.f32 %v454_v24, 0.0  ;;  %v457_v33 = vadd.f32 %v2191_v48, %v456_v29  ;;  %v520_v34 = vmax.f32 %v326_v17, 0.0 }
 0x148   :  { %v523_v31 = vmax.f32 %v337_v22, 0.0  ;;  %v555_v36 = vmax.f32 %v465_v28, 0.0 }
 0x149   :  { %v521_v35 = vmax.f32 %v329_v26, 0.0  ;;  %v553_v38 = vmax.f32 %v457_v33, 0.0 }
 0x14a   :  { %v575_v37 = vpack.c.bf16 %v523_v31, %v522_v30  ;;  %v2261_v41 = vpack.c.bf16 %v555_v36, %v554_v27 }
 0x14b   :  { %v574_v39 = vpack.c.bf16 %v521_v35, %v520_v34  ;;  %v1753_v40 = vpop.f32.mrb[24].mxu0  ;;  %v2264_v47 = vpack.c.bf16 %v553_v38, %v552_v32  ;;  %v1785_v50 = vpop.f32.mrb[24].mxu1 }
 0x14c   :  { %v350_v43 = vadd.f32 %v1753_v40, %v2191_v48  ;;  %v341_v44 = vpop.f32.mrb[25].mxu0  ;;  %v478_v53 = vadd.f32 %v1785_v50, %v2191_v48  ;;  %v469_v54 = vpop.f32.mrb[25].mxu1 }
 0x14d   :  { %v342_v51 = vadd.f32 %v2191_v48, %v341_v44  ;;  %v1754_v52 = vpop.f32.mrb[26].mxu0  ;;  %1827 = vmatprep.mubr.bf16.mxu1 %v574_v39  ;;  %v470_v57 = vadd.f32 %v2191_v48, %v469_v54  ;;  %v1786_v58 = vpop.f32.mrb[26].mxu1 }
 0x14e   :  { %v353_v55 = vadd.f32 %v1754_v52, %v2191_v48  ;;  %v344_v56 = vpop.f32.mrb[27].mxu0  ;;  %1828 = vmatmul.mubr.bf16.gmra.mrb[52].mxu1 %v575_v37  ;;  %v558_v60 = vmax.f32 %v478_v53, 0.0  ;;  %v481_v61 = vadd.f32 %v1786_v58, %v2191_v48  ;;  %v472_v62 = vpop.f32.mrb[27].mxu1  ;;  %v526_v63 = vmax.f32 %v350_v43, 0.0 }
 0x14f   :  { %v345_v59 = vadd.f32 %v2191_v48, %v344_v56  ;;  %v556_v1 = vmax.f32 %v470_v57, 0.0  ;;  %v473_v2 = vadd.f32 %v2191_v48, %v472_v62  ;;  %v524_v3 = vmax.f32 %v342_v51, 0.0 }
 0x150   :  { %v527_v0 = vmax.f32 %v353_v55, 0.0  ;;  %v559_v5 = vmax.f32 %v481_v61, 0.0 }
 0x151   :  { %v525_v4 = vmax.f32 %v345_v59, 0.0  ;;  %v557_v7 = vmax.f32 %v473_v2, 0.0 }
 0x152   :  { %v577_v6 = vpack.c.bf16 %v527_v0, %v526_v63  ;;  %v593_v11 = vpack.c.bf16 %v559_v5, %v558_v60 }
 0x153   :  { %v576_v8 = vpack.c.bf16 %v525_v4, %v524_v3  ;;  %v1757_v10 = vpop.f32.mrb[28].mxu0  ;;  %v592_v19 = vpack.c.bf16 %v557_v7, %v556_v1  ;;  %v1789_v20 = vpop.f32.mrb[28].mxu1 }
 0x154   :  { %v366_v14 = vadd.f32 %v1757_v10, %v2191_v48  ;;  %v357_v17 = vpop.f32.mrb[29].mxu0  ;;  %v494_v23 = vadd.f32 %v1789_v20, %v2191_v48  ;;  %v485_v24 = vpop.f32.mrb[29].mxu1 }
 0x155   :  { %v358_v21 = vadd.f32 %v2191_v48, %v357_v17  ;;  %v1758_v22 = vpop.f32.mrb[30].mxu0  ;;  %1831 = vmatprep.mubr.bf16.mxu1 %v576_v8  ;;  %v486_v27 = vadd.f32 %v2191_v48, %v485_v24  ;;  %v1790_v28 = vpop.f32.mrb[30].mxu1 }
 0x156   :  { %v369_v25 = vadd.f32 %v1758_v22, %v2191_v48  ;;  %v360_v26 = vpop.f32.mrb[31].mxu0  ;;  %1832 = vmatmul.mubr.bf16.gmra.mrb[56].mxu1 %v577_v6  ;;  %v562_v30 = vmax.f32 %v494_v23, 0.0  ;;  %v497_v31 = vadd.f32 %v1790_v28, %v2191_v48  ;;  %v488_v32 = vpop.f32.mrb[31].mxu1  ;;  %v530_v33 = vmax.f32 %v366_v14, 0.0 }
 0x157   :  { %v361_v29 = vadd.f32 %v2191_v48, %v360_v26  ;;  %v560_v35 = vmax.f32 %v486_v27, 0.0  ;;  %v489_v36 = vadd.f32 %v2191_v48, %v488_v32  ;;  %v528_v37 = vmax.f32 %v358_v21, 0.0  ;;  %v1997_v48 = vld [vmem:[#allocation5 + $0xb8] sm:$0xff]  }
 0x158   :  { %v531_v34 = vmax.f32 %v369_v25, 0.0  ;;  %v563_v39 = vmax.f32 %v497_v31, 0.0  ;;  %1885 = vmatprep.subr.bf16.mxu0 %v1997_v48 }
 0x159   :  { %v529_v38 = vmax.f32 %v361_v29, 0.0  ;;  %v561_v43 = vmax.f32 %v489_v36, 0.0  ;;  %1886 = vmatpush3.bf16.msra.mxu0 %v1997_v48 }
 0x15a   :  { %v579_v40 = vpack.c.bf16 %v531_v34, %v530_v33  ;;  %v595_v50 = vpack.c.bf16 %v563_v39, %v562_v30 }
 0x15b   :  { %v578_v44 = vpack.c.bf16 %v529_v38, %v528_v37  ;;  %v594_v51 = vpack.c.bf16 %v561_v43, %v560_v35 }
 0x15d   :  { %1835 = vmatprep.mubr.bf16.mxu1 %v578_v44 }
 0x15e   :  { %1836 = vmatmul.mubr.bf16.gmra.mrb[60].mxu1 %v579_v40 }
 0x15f   :  { %1839 = vmatprep.mubr.bf16.mxu1 %v2204_v18 }
 0x166   :  { %1840 = vmatmul.mubr.bf16.gmra.mrb[64].mxu1 %v2201_v15  ;;  %v2296_v15 = vld [vmem:[%s2448_s2 + $0x1] ss:$0 sm:$0xff] }
 0x167   :  { %1843 = vmatprep.mubr.bf16.mxu1 %v2216_v49 }
 0x16e   :  { %1844 = vmatmul.mubr.bf16.gmra.mrb[68].mxu1 %v2213_v45 }
 0x16f   :  { %1847 = vmatprep.mubr.bf16.mxu1 %v2228_v16 }
 0x176   :  { %1848 = vmatmul.mubr.bf16.gmra.mrb[72].mxu1 %v2225_v12 }
 0x177   :  { %1851 = vmatprep.mubr.bf16.mxu1 %v2240_v46 }
 0x17e   :  { %1852 = vmatmul.mubr.bf16.gmra.mrb[76].mxu1 %v2237_v42 }
 0x17f   :  { %1855 = vmatprep.mubr.bf16.mxu1 %v2252_v13 }
 0x186   :  { %1856 = vmatmul.mubr.bf16.gmra.mrb[80].mxu1 %v2249_v9 }
 0x187   :  { %1859 = vmatprep.mubr.bf16.mxu1 %v2264_v47 }
 0x18e   :  { %1860 = vmatmul.mubr.bf16.gmra.mrb[84].mxu1 %v2261_v41 }
 0x18f   :  { %1863 = vmatprep.mubr.bf16.mxu1 %v592_v19 }
 0x196   :  { %1864 = vmatmul.mubr.bf16.gmra.mrb[88].mxu1 %v593_v11 }
 0x197   :  { %1867 = vmatprep.mubr.bf16.mxu1 %v594_v51 }
 0x19e   :  { %1868 = vmatmul.mubr.bf16.gmra.mrb[92].mxu1 %v595_v50 }
 0x1f9   :  { %v1809_v18 = vpop.f32.mrb[32].mxu1 }
 0x1fa   :  { %v712_v45 = vadd.f32 %v1809_v18, %v2296_v15  ;;  %v703_v49 = vpop.f32.mrb[33].mxu1 }
 0x1fb   :  { %v704_v12 = vadd.f32 %v2296_v15, %v703_v49  ;;  %v1810_v16 = vpop.f32.mrb[34].mxu1 }
 0x1fc   :  { %v715_v42 = vadd.f32 %v1810_v16, %v2296_v15  ;;  %v706_v46 = vpop.f32.mrb[35].mxu1  ;;  %v960_v13 = vmax.f32 %v712_v45, 0.0 }
 0x1fd   :  { %v707_v9 = vadd.f32 %v2296_v15, %v706_v46  ;;  %v958_v47 = vmax.f32 %v704_v12, 0.0 }
 0x1fe   :  { %v961_v41 = vmax.f32 %v715_v42, 0.0 }
 0x1ff   :  { %v959_v52 = vmax.f32 %v707_v9, 0.0 }
 0x200   :  { %v1023_v53 = vpack.c.bf16 %v961_v41, %v960_v13 }
 0x201   :  { %v1022_v54 = vpack.c.bf16 %v959_v52, %v958_v47  ;;  %v1813_v55 = vpop.f32.mrb[36].mxu1 }
 0x202   :  { %v728_v56 = vadd.f32 %v1813_v55, %v2296_v15  ;;  %v719_v57 = vpop.f32.mrb[37].mxu1 }
 0x203   :  { %v720_v58 = vadd.f32 %v2296_v15, %v719_v57  ;;  %v1814_v59 = vpop.f32.mrb[38].mxu1  ;;  %1887 = vmatprep.mubr.bf16.mxu0 %v1022_v54 }
 0x204   :  { %v731_v60 = vadd.f32 %v1814_v59, %v2296_v15  ;;  %v722_v61 = vpop.f32.mrb[39].mxu1  ;;  %1888 = vmatmul.mubr.bf16.vlgmr.msra.gmra.mrb[32].mxu0 %v1023_v53  ;;  %v964_v63 = vmax.f32 %v728_v56, 0.0 }
 0x205   :  { %v723_v62 = vadd.f32 %v2296_v15, %v722_v61  ;;  %v962_v1 = vmax.f32 %v720_v58, 0.0 }
 0x206   :  { %v965_v0 = vmax.f32 %v731_v60, 0.0 }
 0x207   :  { %v963_v2 = vmax.f32 %v723_v62, 0.0 }
 0x208   :  { %v1025_v3 = vpack.c.bf16 %v965_v0, %v964_v63 }
 0x209   :  { %v1024_v4 = vpack.c.bf16 %v963_v2, %v962_v1  ;;  %v1817_v5 = vpop.f32.mrb[40].mxu1 }
 0x20a   :  { %v744_v6 = vadd.f32 %v1817_v5, %v2296_v15  ;;  %v735_v7 = vpop.f32.mrb[41].mxu1 }
 0x20b   :  { %v736_v8 = vadd.f32 %v2296_v15, %v735_v7  ;;  %v1818_v10 = vpop.f32.mrb[42].mxu1  ;;  %1891 = vmatprep.mubr.bf16.mxu0 %v1024_v4 }
 0x20c   :  { %v747_v11 = vadd.f32 %v1818_v10, %v2296_v15  ;;  %v738_v14 = vpop.f32.mrb[43].mxu1  ;;  %1892 = vmatmul.mubr.bf16.gmra.mrb[36].mxu0 %v1025_v3  ;;  %v968_v19 = vmax.f32 %v744_v6, 0.0 }
 0x20d   :  { %v739_v17 = vadd.f32 %v2296_v15, %v738_v14  ;;  %v966_v21 = vmax.f32 %v736_v8, 0.0 }
 0x20e   :  { %v969_v20 = vmax.f32 %v747_v11, 0.0 }
 0x20f   :  { %v967_v22 = vmax.f32 %v739_v17, 0.0 }
 0x210   :  { %v1027_v23 = vpack.c.bf16 %v969_v20, %v968_v19 }
 0x211   :  { %v1026_v24 = vpack.c.bf16 %v967_v22, %v966_v21  ;;  %v1821_v25 = vpop.f32.mrb[44].mxu1 }
 0x212   :  { %v760_v26 = vadd.f32 %v1821_v25, %v2296_v15  ;;  %v751_v27 = vpop.f32.mrb[45].mxu1 }
 0x213   :  { %v752_v28 = vadd.f32 %v2296_v15, %v751_v27  ;;  %v1822_v29 = vpop.f32.mrb[46].mxu1  ;;  %1895 = vmatprep.mubr.bf16.mxu0 %v1026_v24 }
 0x214   :  { %v763_v30 = vadd.f32 %v1822_v29, %v2296_v15  ;;  %v754_v31 = vpop.f32.mrb[47].mxu1  ;;  %1896 = vmatmul.mubr.bf16.gmra.mrb[40].mxu0 %v1027_v23  ;;  %v972_v33 = vmax.f32 %v760_v26, 0.0 }
 0x215   :  { %v755_v32 = vadd.f32 %v2296_v15, %v754_v31  ;;  %v970_v35 = vmax.f32 %v752_v28, 0.0 }
 0x216   :  { %v973_v34 = vmax.f32 %v763_v30, 0.0 }
 0x217   :  { %v971_v36 = vmax.f32 %v755_v32, 0.0 }
 0x218   :  { %v1029_v37 = vpack.c.bf16 %v973_v34, %v972_v33 }
 0x219   :  { %v1028_v38 = vpack.c.bf16 %v971_v36, %v970_v35  ;;  %v1825_v39 = vpop.f32.mrb[48].mxu1 }
 0x21a   :  { %v776_v40 = vadd.f32 %v1825_v39, %v2296_v15  ;;  %v767_v43 = vpop.f32.mrb[49].mxu1 }
 0x21b   :  { %v768_v44 = vadd.f32 %v2296_v15, %v767_v43  ;;  %v1826_v50 = vpop.f32.mrb[50].mxu1  ;;  %1899 = vmatprep.mubr.bf16.mxu0 %v1028_v38 }
 0x21c   :  { %v779_v51 = vadd.f32 %v1826_v50, %v2296_v15  ;;  %v770_v48 = vpop.f32.mrb[51].mxu1  ;;  %1900 = vmatmul.mubr.bf16.gmra.mrb[44].mxu0 %v1029_v37  ;;  %v976_v45 = vmax.f32 %v776_v40, 0.0 }
 0x21d   :  { %v771_v18 = vadd.f32 %v2296_v15, %v770_v48  ;;  %v974_v12 = vmax.f32 %v768_v44, 0.0 }
 0x21e   :  { %v977_v49 = vmax.f32 %v779_v51, 0.0 }
 0x21f   :  { %v975_v16 = vmax.f32 %v771_v18, 0.0 }
 0x220   :  { %v1031_v42 = vpack.c.bf16 %v977_v49, %v976_v45 }
 0x221   :  { %v1030_v46 = vpack.c.bf16 %v975_v16, %v974_v12  ;;  %v1829_v9 = vpop.f32.mrb[52].mxu1 }
 0x222   :  { %v792_v13 = vadd.f32 %v1829_v9, %v2296_v15  ;;  %v783_v41 = vpop.f32.mrb[53].mxu1 }
 0x223   :  { %v784_v47 = vadd.f32 %v2296_v15, %v783_v41  ;;  %v1830_v52 = vpop.f32.mrb[54].mxu1  ;;  %1903 = vmatprep.mubr.bf16.mxu0 %v1030_v46 }
 0x224   :  { %v795_v53 = vadd.f32 %v1830_v52, %v2296_v15  ;;  %v786_v54 = vpop.f32.mrb[55].mxu1  ;;  %1904 = vmatmul.mubr.bf16.gmra.mrb[48].mxu0 %v1031_v42  ;;  %v980_v56 = vmax.f32 %v792_v13, 0.0 }
 0x225   :  { %v787_v55 = vadd.f32 %v2296_v15, %v786_v54  ;;  %v978_v58 = vmax.f32 %v784_v47, 0.0 }
 0x226   :  { %v981_v57 = vmax.f32 %v795_v53, 0.0 }
 0x227   :  { %v979_v59 = vmax.f32 %v787_v55, 0.0 }
 0x228   :  { %v1033_v60 = vpack.c.bf16 %v981_v57, %v980_v56 }
 0x229   :  { %v1032_v61 = vpack.c.bf16 %v979_v59, %v978_v58  ;;  %v1833_v62 = vpop.f32.mrb[56].mxu1 }
 0x22a   :  { %v808_v63 = vadd.f32 %v1833_v62, %v2296_v15  ;;  %v799_v0 = vpop.f32.mrb[57].mxu1 }
 0x22b   :  { %v800_v1 = vadd.f32 %v2296_v15, %v799_v0  ;;  %v1834_v2 = vpop.f32.mrb[58].mxu1  ;;  %1907 = vmatprep.mubr.bf16.mxu0 %v1032_v61 }
 0x22c   :  { %v811_v3 = vadd.f32 %v1834_v2, %v2296_v15  ;;  %v802_v4 = vpop.f32.mrb[59].mxu1  ;;  %1908 = vmatmul.mubr.bf16.gmra.mrb[52].mxu0 %v1033_v60  ;;  %v984_v6 = vmax.f32 %v808_v63, 0.0 }
 0x22d   :  { %v803_v5 = vadd.f32 %v2296_v15, %v802_v4  ;;  %v982_v8 = vmax.f32 %v800_v1, 0.0 }
 0x22e   :  { %v985_v7 = vmax.f32 %v811_v3, 0.0 }
 0x22f   :  { %v983_v10 = vmax.f32 %v803_v5, 0.0 }
 0x230   :  { %v1035_v11 = vpack.c.bf16 %v985_v7, %v984_v6 }
 0x231   :  { %v1034_v14 = vpack.c.bf16 %v983_v10, %v982_v8  ;;  %v1837_v17 = vpop.f32.mrb[60].mxu1 }
 0x232   :  { %v824_v19 = vadd.f32 %v1837_v17, %v2296_v15  ;;  %v815_v20 = vpop.f32.mrb[61].mxu1 }
 0x233   :  { %v816_v21 = vadd.f32 %v2296_v15, %v815_v20  ;;  %v1838_v22 = vpop.f32.mrb[62].mxu1  ;;  %1911 = vmatprep.mubr.bf16.mxu0 %v1034_v14 }
 0x234   :  { %v827_v23 = vadd.f32 %v1838_v22, %v2296_v15  ;;  %v818_v24 = vpop.f32.mrb[63].mxu1  ;;  %1912 = vmatmul.mubr.bf16.gmra.mrb[56].mxu0 %v1035_v11  ;;  %v988_v26 = vmax.f32 %v824_v19, 0.0 }
 0x235   :  { %v819_v25 = vadd.f32 %v2296_v15, %v818_v24  ;;  %v986_v28 = vmax.f32 %v816_v21, 0.0 }
 0x236   :  { %v989_v27 = vmax.f32 %v827_v23, 0.0 }
 0x237   :  { %v987_v29 = vmax.f32 %v819_v25, 0.0 }
 0x238   :  { %v1037_v30 = vpack.c.bf16 %v989_v27, %v988_v26 }
 0x239   :  { %v1036_v31 = vpack.c.bf16 %v987_v29, %v986_v28  ;;  %v1841_v32 = vpop.f32.mrb[64].mxu1 }
 0x23a   :  { %v840_v33 = vadd.f32 %v1841_v32, %v2296_v15  ;;  %v831_v34 = vpop.f32.mrb[65].mxu1 }
 0x23b   :  { %v832_v35 = vadd.f32 %v2296_v15, %v831_v34  ;;  %v1842_v36 = vpop.f32.mrb[66].mxu1  ;;  %1915 = vmatprep.mubr.bf16.mxu0 %v1036_v31 }
 0x23c   :  { %v843_v37 = vadd.f32 %v1842_v36, %v2296_v15  ;;  %v834_v38 = vpop.f32.mrb[67].mxu1  ;;  %1916 = vmatmul.mubr.bf16.gmra.mrb[60].mxu0 %v1037_v30  ;;  %v992_v40 = vmax.f32 %v840_v33, 0.0 }
 0x23d   :  { %v835_v39 = vadd.f32 %v2296_v15, %v834_v38  ;;  %v990_v44 = vmax.f32 %v832_v35, 0.0 }
 0x23e   :  { %v993_v43 = vmax.f32 %v843_v37, 0.0 }
 0x23f   :  { %v991_v50 = vmax.f32 %v835_v39, 0.0 }
 0x240   :  { %v1039_v51 = vpack.c.bf16 %v993_v43, %v992_v40 }
 0x241   :  { %v1038_v48 = vpack.c.bf16 %v991_v50, %v990_v44  ;;  %v1845_v18 = vpop.f32.mrb[68].mxu1 }
 0x242   :  { %v856_v45 = vadd.f32 %v1845_v18, %v2296_v15  ;;  %v847_v49 = vpop.f32.mrb[69].mxu1 }
 0x243   :  { %v848_v12 = vadd.f32 %v2296_v15, %v847_v49  ;;  %v1846_v16 = vpop.f32.mrb[70].mxu1  ;;  %1919 = vmatprep.mubr.bf16.mxu0 %v1038_v48 }
 0x244   :  { %v859_v42 = vadd.f32 %v1846_v16, %v2296_v15  ;;  %v850_v46 = vpop.f32.mrb[71].mxu1  ;;  %1920 = vmatmul.mubr.bf16.gmra.mrb[64].mxu0 %v1039_v51  ;;  %v996_v13 = vmax.f32 %v856_v45, 0.0 }
 0x245   :  { %v851_v9 = vadd.f32 %v2296_v15, %v850_v46  ;;  %v994_v47 = vmax.f32 %v848_v12, 0.0 }
 0x246   :  { %v997_v41 = vmax.f32 %v859_v42, 0.0 }
 0x247   :  { %v995_v52 = vmax.f32 %v851_v9, 0.0 }
 0x248   :  { %v1041_v53 = vpack.c.bf16 %v997_v41, %v996_v13 }
 0x249   :  { %v1040_v54 = vpack.c.bf16 %v995_v52, %v994_v47  ;;  %v1849_v55 = vpop.f32.mrb[72].mxu1 }
 0x24a   :  { %v872_v56 = vadd.f32 %v1849_v55, %v2296_v15  ;;  %v863_v57 = vpop.f32.mrb[73].mxu1 }
 0x24b   :  { %v864_v58 = vadd.f32 %v2296_v15, %v863_v57  ;;  %v1850_v59 = vpop.f32.mrb[74].mxu1  ;;  %1923 = vmatprep.mubr.bf16.mxu0 %v1040_v54 }
 0x24c   :  { %v875_v60 = vadd.f32 %v1850_v59, %v2296_v15  ;;  %v866_v61 = vpop.f32.mrb[75].mxu1  ;;  %1924 = vmatmul.mubr.bf16.gmra.mrb[68].mxu0 %v1041_v53  ;;  %v1000_v63 = vmax.f32 %v872_v56, 0.0 }
 0x24d   :  { %v867_v62 = vadd.f32 %v2296_v15, %v866_v61  ;;  %v998_v1 = vmax.f32 %v864_v58, 0.0 }
 0x24e   :  { %v1001_v0 = vmax.f32 %v875_v60, 0.0 }
 0x24f   :  { %v999_v2 = vmax.f32 %v867_v62, 0.0 }
 0x250   :  { %v1043_v3 = vpack.c.bf16 %v1001_v0, %v1000_v63 }
 0x251   :  { %v1042_v4 = vpack.c.bf16 %v999_v2, %v998_v1  ;;  %v1853_v5 = vpop.f32.mrb[76].mxu1 }
 0x252   :  { %v888_v6 = vadd.f32 %v1853_v5, %v2296_v15  ;;  %v879_v7 = vpop.f32.mrb[77].mxu1 }
 0x253   :  { %v880_v8 = vadd.f32 %v2296_v15, %v879_v7  ;;  %v1854_v10 = vpop.f32.mrb[78].mxu1  ;;  %1927 = vmatprep.mubr.bf16.mxu0 %v1042_v4 }
 0x254   :  { %v891_v11 = vadd.f32 %v1854_v10, %v2296_v15  ;;  %v882_v14 = vpop.f32.mrb[79].mxu1  ;;  %1928 = vmatmul.mubr.bf16.gmra.mrb[72].mxu0 %v1043_v3  ;;  %v1004_v19 = vmax.f32 %v888_v6, 0.0 }
 0x255   :  { %v883_v17 = vadd.f32 %v2296_v15, %v882_v14  ;;  %v1002_v21 = vmax.f32 %v880_v8, 0.0 }
 0x256   :  { %v1005_v20 = vmax.f32 %v891_v11, 0.0 }
 0x257   :  { %v1003_v22 = vmax.f32 %v883_v17, 0.0  ;;  %v2365_v17 = vld [vmem:[%s2448_s2 + $0x2] ss:$0 sm:$0xff]  ;;  %s2140_s2 = smov [#allocation7]  }
 0x258   :  { %v1045_v23 = vpack.c.bf16 %v1005_v20, %v1004_v19  ;;  %s1549_s17 = sshll.u32 %s2140_s2, 4  ;;  %s1550_s17 = int_to_ptr.vmem [resolvable:$true] %s1549_s17 }
 0x259   :  { %v1044_v24 = vpack.c.bf16 %v1003_v22, %v1002_v21  ;;  %v1857_v25 = vpop.f32.mrb[80].mxu1  ;;  %s2106_s18 = scalar_lea.vmem %s1550_s17, 8192  ;;  %p2111_p3 = scmp.lt.s32.totalorder %s1550_s17, %s1550_s17 }
 0x25a   :  { %v904_v26 = vadd.f32 %v1857_v25, %v2296_v15  ;;  %v895_v27 = vpop.f32.mrb[81].mxu1  ;;  %p2107_p2 = scmp.ne.s32.totalorder %s1550_s17, %s2106_s18  ;;  %p2112_p4 = scmp.lt.s32.totalorder %s2106_s18, %s2106_s18 }
 0x25b   :  { %v896_v28 = vadd.f32 %v2296_v15, %v895_v27  ;;  %v1858_v29 = vpop.f32.mrb[82].mxu1  ;;  %1931 = vmatprep.mubr.bf16.mxu0 %v1044_v24  ;;  %v1999_v27 = vld [vmem:[#allocation2] sm:$0xff] }
 0x25c   :  { %v907_v30 = vadd.f32 %v1858_v29, %v2296_v15  ;;  %v898_v31 = vpop.f32.mrb[83].mxu1  ;;  %1932 = vmatmul.mubr.bf16.gmra.mrb[76].mxu0 %v1045_v23  ;;  %v1008_v33 = vmax.f32 %v904_v26, 0.0  ;;  %v1998_v23 = vld [vmem:[#allocation2 + $0x10] sm:$0xff]  ;;  %p2113_p5 = por %p2112_p4, %p2111_p3 }
 0x25d   :  { %v899_v32 = vadd.f32 %v2296_v15, %v898_v31  ;;  %v1006_v35 = vmax.f32 %v896_v28, 0.0 }
 0x25e   :  { %v1009_v34 = vmax.f32 %v907_v30, 0.0  ;;  %v2000_v30 = vld [vmem:[#allocation2 + $0x18] sm:$0xff]  ;;  %p2114_p6 = pnand %p2113_p5, %p2107_p2 }
 0x25f   :  { %v1007_v36 = vmax.f32 %v899_v32, 0.0  ;;  %v2001_v32 = vld [vmem:[#allocation2 + $0x8] sm:$0xff] }
 0x260   :  { %v1047_v37 = vpack.c.bf16 %v1009_v34, %v1008_v33 }
 0x261   :  { %v1046_v38 = vpack.c.bf16 %v1007_v36, %v1006_v35  ;;  %v1861_v39 = vpop.f32.mrb[84].mxu1 }
 0x262   :  { %v920_v40 = vadd.f32 %v1861_v39, %v2296_v15  ;;  %v911_v43 = vpop.f32.mrb[85].mxu1  ;;  %v2002_v39 = vld [vmem:[#allocation2 + $0x30] sm:$0xff] }
 0x263   :  { %v912_v44 = vadd.f32 %v2296_v15, %v911_v43  ;;  %v1862_v50 = vpop.f32.mrb[86].mxu1  ;;  %1935 = vmatprep.mubr.bf16.mxu0 %v1046_v38 }
 0x264   :  { %v923_v51 = vadd.f32 %v1862_v50, %v2296_v15  ;;  %v914_v48 = vpop.f32.mrb[87].mxu1  ;;  %1936 = vmatmul.mubr.bf16.gmra.mrb[80].mxu0 %v1047_v37  ;;  %v1012_v45 = vmax.f32 %v920_v40, 0.0  ;;  %v2003_v50 = vld [vmem:[#allocation2 + $0x20] sm:$0xff] }
 0x265   :  { %v915_v18 = vadd.f32 %v2296_v15, %v914_v48  ;;  %v1010_v12 = vmax.f32 %v912_v44, 0.0 }
 0x266   :  { %v1013_v49 = vmax.f32 %v923_v51, 0.0 }
 0x267   :  { %v1011_v16 = vmax.f32 %v915_v18, 0.0  ;;  %v2004_v18 = vld [vmem:[#allocation2 + $0x38] sm:$0xff] }
 0x268   :  { %v1049_v42 = vpack.c.bf16 %v1013_v49, %v1012_v45  ;;  %v2005_v49 = vld [vmem:[#allocation2 + $0x28] sm:$0xff] }
 0x269   :  { %v1048_v46 = vpack.c.bf16 %v1011_v16, %v1010_v12  ;;  %v1865_v9 = vpop.f32.mrb[88].mxu1 }
 0x26a   :  { %v936_v13 = vadd.f32 %v1865_v9, %v2296_v15  ;;  %v927_v41 = vpop.f32.mrb[89].mxu1 }
 0x26b   :  { %v928_v47 = vadd.f32 %v2296_v15, %v927_v41  ;;  %v1866_v52 = vpop.f32.mrb[90].mxu1  ;;  %1939 = vmatprep.mubr.bf16.mxu0 %v1048_v46  ;;  %v2006_v41 = vld [vmem:[#allocation2 + $0x50] sm:$0xff] }
 0x26c   :  { %v939_v53 = vadd.f32 %v1866_v52, %v2296_v15  ;;  %v930_v54 = vpop.f32.mrb[91].mxu1  ;;  %1940 = vmatmul.mubr.bf16.gmra.mrb[84].mxu0 %v1049_v42  ;;  %v1016_v56 = vmax.f32 %v936_v13, 0.0 }
 0x26d   :  { %v931_v55 = vadd.f32 %v2296_v15, %v930_v54  ;;  %v1014_v58 = vmax.f32 %v928_v47, 0.0  ;;  %v2007_v54 = vld [vmem:[#allocation2 + $0x40] sm:$0xff] }
 0x26e   :  { %v1017_v57 = vmax.f32 %v939_v53, 0.0 }
 0x26f   :  { %v1015_v59 = vmax.f32 %v931_v55, 0.0 }
 0x270   :  { %v1051_v60 = vpack.c.bf16 %v1017_v57, %v1016_v56  ;;  %v2008_v57 = vld [vmem:[#allocation2 + $0x58] sm:$0xff] }
 0x271   :  { %v1050_v61 = vpack.c.bf16 %v1015_v59, %v1014_v58  ;;  %v1869_v62 = vpop.f32.mrb[92].mxu1  ;;  %v2009_v59 = vld [vmem:[#allocation2 + $0x48] sm:$0xff] }
 0x272   :  { %v952_v63 = vadd.f32 %v1869_v62, %v2296_v15  ;;  %v943_v0 = vpop.f32.mrb[93].mxu1 }
 0x273   :  { %v944_v1 = vadd.f32 %v2296_v15, %v943_v0  ;;  %v1870_v2 = vpop.f32.mrb[94].mxu1  ;;  %1943 = vmatprep.mubr.bf16.mxu0 %v1050_v61 }
 0x274   :  { %v955_v3 = vadd.f32 %v1870_v2, %v2296_v15  ;;  %v946_v4 = vpop.f32.mrb[95].mxu1  ;;  %1944 = vmatmul.mubr.bf16.gmra.mrb[88].mxu0 %v1051_v60  ;;  %v1020_v6 = vmax.f32 %v952_v63, 0.0  ;;  %v2010_v2 = vld [vmem:[#allocation2 + $0x70] sm:$0xff] }
 0x275   :  { %v947_v5 = vadd.f32 %v2296_v15, %v946_v4  ;;  %v1018_v8 = vmax.f32 %v944_v1, 0.0 }
 0x276   :  { %v1021_v7 = vmax.f32 %v955_v3, 0.0 }
 0x277   :  { %v1019_v10 = vmax.f32 %v947_v5, 0.0 }
 0x278   :  { %v1053_v11 = vpack.c.bf16 %v1021_v7, %v1020_v6  ;;  %v2011_v6 = vld [vmem:[#allocation2 + $0x60] sm:$0xff] }
 0x279   :  { %v1052_v14 = vpack.c.bf16 %v1019_v10, %v1018_v8  ;;  %v2012_v10 = vld [vmem:[#allocation2 + $0x78] sm:$0xff] }
 0x27b   :  { %1947 = vmatprep.mubr.bf16.mxu0 %v1052_v14  ;;  %v2013_v14 = vld [vmem:[#allocation2 + $0x68] sm:$0xff] }
 0x27c   :  { %1948 = vmatmul.mubr.bf16.gmra.mrb[92].mxu0 %v1053_v11 }
 0x2d7   :  { %v1889_v19 = vpop.f32.mrb[32].mxu0 }
 0x2d8   :  { %v1170_v20 = vadd.f32 %v1889_v19, %v2365_v17  ;;  %v1161_v21 = vpop.f32.mrb[33].mxu0 }
 0x2d9   :  { %v1162_v22 = vadd.f32 %v2365_v17, %v1161_v21  ;;  %v1890_v15 = vpop.f32.mrb[34].mxu0 }
 0x2da   :  { %v1418_v24 = vadd.f32 %v1998_v23, %v1170_v20  ;;  %v1173_v25 = vadd.f32 %v1890_v15, %v2365_v17  ;;  %v1164_v26 = vpop.f32.mrb[35].mxu0 }
 0x2db   :  { %v1416_v28 = vadd.f32 %v1999_v27, %v1162_v22  ;;  %v1165_v29 = vadd.f32 %v2365_v17, %v1164_v26 }
 0x2dc   :  { %1482 = vst [vmem:[#allocation7 + $0x10] sm:$0xff] %v1418_v24  ;;  %v1419_v31 = vadd.f32 %v2000_v30, %v1173_v25  ;;  %v2014_v24 = vld [vmem:[#allocation2 + $0x90] sm:$0xff] }
 0x2dd   :  { %1480 = vst [vmem:[#allocation7] sm:$0xff] %v1416_v28  ;;  %v1417_v33 = vadd.f32 %v2001_v32, %v1165_v29  ;;  %v2015_v28 = vld [vmem:[#allocation2 + $0x80] sm:$0xff] }
 0x2de   :  { %1483 = vst [vmem:[#allocation7 + $0x18] sm:$0xff] %v1419_v31  ;;  %v2016_v31 = vld [vmem:[#allocation2 + $0x98] sm:$0xff] }
 0x2df   :  { %1481 = vst [vmem:[#allocation7 + $0x8] sm:$0xff] %v1417_v33  ;;  %v1893_v34 = vpop.f32.mrb[36].mxu0  ;;  %v2017_v33 = vld [vmem:[#allocation2 + $0x88] sm:$0xff] }
 0x2e0   :  { %v1186_v35 = vadd.f32 %v1893_v34, %v2365_v17  ;;  %v1177_v36 = vpop.f32.mrb[37].mxu0 }
 0x2e1   :  { %v1178_v37 = vadd.f32 %v2365_v17, %v1177_v36  ;;  %v1894_v38 = vpop.f32.mrb[38].mxu0 }
 0x2e2   :  { %v1422_v40 = vadd.f32 %v2002_v39, %v1186_v35  ;;  %v1189_v43 = vadd.f32 %v1894_v38, %v2365_v17  ;;  %v1180_v44 = vpop.f32.mrb[39].mxu0 }
 0x2e3   :  { %v1420_v51 = vadd.f32 %v2003_v50, %v1178_v37  ;;  %v1181_v48 = vadd.f32 %v2365_v17, %v1180_v44 }
 0x2e4   :  { %1486 = vst [vmem:[#allocation7 + $0x30] sm:$0xff] %v1422_v40  ;;  %v1423_v45 = vadd.f32 %v2004_v18, %v1189_v43  ;;  %v2018_v40 = vld [vmem:[#allocation2 + $0xb0] sm:$0xff] }
 0x2e5   :  { %1484 = vst [vmem:[#allocation7 + $0x20] sm:$0xff] %v1420_v51  ;;  %v1421_v12 = vadd.f32 %v2005_v49, %v1181_v48  ;;  %v2019_v51 = vld [vmem:[#allocation2 + $0xa0] sm:$0xff] }
 0x2e6   :  { %1487 = vst [vmem:[#allocation7 + $0x38] sm:$0xff] %v1423_v45  ;;  %v2020_v45 = vld [vmem:[#allocation2 + $0xb8] sm:$0xff] }
 0x2e7   :  { %1485 = vst [vmem:[#allocation7 + $0x28] sm:$0xff] %v1421_v12  ;;  %v1897_v16 = vpop.f32.mrb[40].mxu0  ;;  %v2021_v12 = vld [vmem:[#allocation2 + $0xa8] sm:$0xff] }
 0x2e8   :  { %v1202_v42 = vadd.f32 %v1897_v16, %v2365_v17  ;;  %v1193_v46 = vpop.f32.mrb[41].mxu0 }
 0x2e9   :  { %v1194_v9 = vadd.f32 %v2365_v17, %v1193_v46  ;;  %v1898_v13 = vpop.f32.mrb[42].mxu0 }
 0x2ea   :  { %v1426_v47 = vadd.f32 %v2006_v41, %v1202_v42  ;;  %v1205_v52 = vadd.f32 %v1898_v13, %v2365_v17  ;;  %v1196_v53 = vpop.f32.mrb[43].mxu0 }
 0x2eb   :  { %v1424_v55 = vadd.f32 %v2007_v54, %v1194_v9  ;;  %v1197_v56 = vadd.f32 %v2365_v17, %v1196_v53 }
 0x2ec   :  { %1490 = vst [vmem:[#allocation7 + $0x50] sm:$0xff] %v1426_v47  ;;  %v1427_v58 = vadd.f32 %v2008_v57, %v1205_v52  ;;  %v2022_v47 = vld [vmem:[#allocation2 + $0xd0] sm:$0xff] }
 0x2ed   :  { %1488 = vst [vmem:[#allocation7 + $0x40] sm:$0xff] %v1424_v55  ;;  %v1425_v60 = vadd.f32 %v2009_v59, %v1197_v56  ;;  %v2023_v55 = vld [vmem:[#allocation2 + $0xc0] sm:$0xff] }
 0x2ee   :  { %1491 = vst [vmem:[#allocation7 + $0x58] sm:$0xff] %v1427_v58  ;;  %v2024_v58 = vld [vmem:[#allocation2 + $0xd8] sm:$0xff] }
 0x2ef   :  { %1489 = vst [vmem:[#allocation7 + $0x48] sm:$0xff] %v1425_v60  ;;  %v1901_v61 = vpop.f32.mrb[44].mxu0  ;;  %v2025_v60 = vld [vmem:[#allocation2 + $0xc8] sm:$0xff] }
 0x2f0   :  { %v1218_v62 = vadd.f32 %v1901_v61, %v2365_v17  ;;  %v1209_v63 = vpop.f32.mrb[45].mxu0 }
 0x2f1   :  { %v1210_v0 = vadd.f32 %v2365_v17, %v1209_v63  ;;  %v1902_v1 = vpop.f32.mrb[46].mxu0 }
 0x2f2   :  { %v1430_v3 = vadd.f32 %v2010_v2, %v1218_v62  ;;  %v1221_v4 = vadd.f32 %v1902_v1, %v2365_v17  ;;  %v1212_v5 = vpop.f32.mrb[47].mxu0 }
 0x2f3   :  { %v1428_v7 = vadd.f32 %v2011_v6, %v1210_v0  ;;  %v1213_v8 = vadd.f32 %v2365_v17, %v1212_v5 }
 0x2f4   :  { %1494 = vst [vmem:[#allocation7 + $0x70] sm:$0xff] %v1430_v3  ;;  %v1431_v11 = vadd.f32 %v2012_v10, %v1221_v4  ;;  %v2026_v3 = vld [vmem:[#allocation2 + $0xf0] sm:$0xff] }
 0x2f5   :  { %1492 = vst [vmem:[#allocation7 + $0x60] sm:$0xff] %v1428_v7  ;;  %v1429_v19 = vadd.f32 %v2013_v14, %v1213_v8  ;;  %v2027_v7 = vld [vmem:[#allocation2 + $0xe0] sm:$0xff] }
 0x2f6   :  { %1495 = vst [vmem:[#allocation7 + $0x78] sm:$0xff] %v1431_v11  ;;  %v2028_v11 = vld [vmem:[#allocation2 + $0xf8] sm:$0xff] }
 0x2f7   :  { %1493 = vst [vmem:[#allocation7 + $0x68] sm:$0xff] %v1429_v19  ;;  %v1905_v20 = vpop.f32.mrb[48].mxu0  ;;  %v2029_v19 = vld [vmem:[#allocation2 + $0xe8] sm:$0xff] }
 0x2f8   :  { %v1234_v21 = vadd.f32 %v1905_v20, %v2365_v17  ;;  %v1225_v22 = vpop.f32.mrb[49].mxu0 }
 0x2f9   :  { %v1226_v15 = vadd.f32 %v2365_v17, %v1225_v22  ;;  %v1906_v23 = vpop.f32.mrb[50].mxu0 }
 0x2fa   :  { %v1434_v25 = vadd.f32 %v2014_v24, %v1234_v21  ;;  %v1237_v26 = vadd.f32 %v1906_v23, %v2365_v17  ;;  %v1228_v27 = vpop.f32.mrb[51].mxu0 }
 0x2fb   :  { %v1432_v29 = vadd.f32 %v2015_v28, %v1226_v15  ;;  %v1229_v30 = vadd.f32 %v2365_v17, %v1228_v27 }
 0x2fc   :  { %1498 = vst [vmem:[#allocation7 + $0x90] sm:$0xff] %v1434_v25  ;;  %v1435_v32 = vadd.f32 %v2016_v31, %v1237_v26  ;;  %v2030_v25 = vld [vmem:[#allocation2 + $0x110] sm:$0xff] }
 0x2fd   :  { %1496 = vst [vmem:[#allocation7 + $0x80] sm:$0xff] %v1432_v29  ;;  %v1433_v34 = vadd.f32 %v2017_v33, %v1229_v30  ;;  %v2031_v29 = vld [vmem:[#allocation2 + $0x100] sm:$0xff] }
 0x2fe   :  { %1499 = vst [vmem:[#allocation7 + $0x98] sm:$0xff] %v1435_v32  ;;  %v2032_v32 = vld [vmem:[#allocation2 + $0x118] sm:$0xff] }
 0x2ff   :  { %1497 = vst [vmem:[#allocation7 + $0x88] sm:$0xff] %v1433_v34  ;;  %v1909_v35 = vpop.f32.mrb[52].mxu0  ;;  %v2033_v34 = vld [vmem:[#allocation2 + $0x108] sm:$0xff] }
 0x300   :  { %v1250_v36 = vadd.f32 %v1909_v35, %v2365_v17  ;;  %v1241_v37 = vpop.f32.mrb[53].mxu0 }
 0x301   :  { %v1242_v38 = vadd.f32 %v2365_v17, %v1241_v37  ;;  %v1910_v39 = vpop.f32.mrb[54].mxu0 }
 0x302   :  { %v1438_v43 = vadd.f32 %v2018_v40, %v1250_v36  ;;  %v1253_v44 = vadd.f32 %v1910_v39, %v2365_v17  ;;  %v1244_v50 = vpop.f32.mrb[55].mxu0 }
 0x303   :  { %v1436_v48 = vadd.f32 %v2019_v51, %v1242_v38  ;;  %v1245_v18 = vadd.f32 %v2365_v17, %v1244_v50 }
 0x304   :  { %1502 = vst [vmem:[#allocation7 + $0xb0] sm:$0xff] %v1438_v43  ;;  %v1439_v49 = vadd.f32 %v2020_v45, %v1253_v44  ;;  %v2034_v43 = vld [vmem:[#allocation2 + $0x130] sm:$0xff] }
 0x305   :  { %1500 = vst [vmem:[#allocation7 + $0xa0] sm:$0xff] %v1436_v48  ;;  %v1437_v16 = vadd.f32 %v2021_v12, %v1245_v18  ;;  %v2035_v48 = vld [vmem:[#allocation2 + $0x120] sm:$0xff] }
 0x306   :  { %1503 = vst [vmem:[#allocation7 + $0xb8] sm:$0xff] %v1439_v49  ;;  %v2036_v49 = vld [vmem:[#allocation2 + $0x138] sm:$0xff] }
 0x307   :  { %1501 = vst [vmem:[#allocation7 + $0xa8] sm:$0xff] %v1437_v16  ;;  %v1913_v42 = vpop.f32.mrb[56].mxu0  ;;  %v2037_v16 = vld [vmem:[#allocation2 + $0x128] sm:$0xff] }
 0x308   :  { %v1266_v46 = vadd.f32 %v1913_v42, %v2365_v17  ;;  %v1257_v9 = vpop.f32.mrb[57].mxu0 }
 0x309   :  { %v1258_v13 = vadd.f32 %v2365_v17, %v1257_v9  ;;  %v1914_v41 = vpop.f32.mrb[58].mxu0 }
 0x30a   :  { %v1442_v52 = vadd.f32 %v2022_v47, %v1266_v46  ;;  %v1269_v53 = vadd.f32 %v1914_v41, %v2365_v17  ;;  %v1260_v54 = vpop.f32.mrb[59].mxu0 }
 0x30b   :  { %v1440_v56 = vadd.f32 %v2023_v55, %v1258_v13  ;;  %v1261_v57 = vadd.f32 %v2365_v17, %v1260_v54 }
 0x30c   :  { %1506 = vst [vmem:[#allocation7 + $0xd0] sm:$0xff] %v1442_v52  ;;  %v1443_v59 = vadd.f32 %v2024_v58, %v1269_v53  ;;  %v2038_v52 = vld [vmem:[#allocation2 + $0x150] sm:$0xff] }
 0x30d   :  { %1504 = vst [vmem:[#allocation7 + $0xc0] sm:$0xff] %v1440_v56  ;;  %v1441_v61 = vadd.f32 %v2025_v60, %v1261_v57  ;;  %v2039_v56 = vld [vmem:[#allocation2 + $0x140] sm:$0xff] }
 0x30e   :  { %1507 = vst [vmem:[#allocation7 + $0xd8] sm:$0xff] %v1443_v59  ;;  %v2040_v59 = vld [vmem:[#allocation2 + $0x158] sm:$0xff] }
 0x30f   :  { %1505 = vst [vmem:[#allocation7 + $0xc8] sm:$0xff] %v1441_v61  ;;  %v1917_v62 = vpop.f32.mrb[60].mxu0  ;;  %v2041_v61 = vld [vmem:[#allocation2 + $0x148] sm:$0xff] }
 0x310   :  { %v1282_v63 = vadd.f32 %v1917_v62, %v2365_v17  ;;  %v1273_v0 = vpop.f32.mrb[61].mxu0 }
 0x311   :  { %v1274_v1 = vadd.f32 %v2365_v17, %v1273_v0  ;;  %v1918_v2 = vpop.f32.mrb[62].mxu0 }
 0x312   :  { %v1446_v4 = vadd.f32 %v2026_v3, %v1282_v63  ;;  %v1285_v5 = vadd.f32 %v1918_v2, %v2365_v17  ;;  %v1276_v6 = vpop.f32.mrb[63].mxu0 }
 0x313   :  { %v1444_v8 = vadd.f32 %v2027_v7, %v1274_v1  ;;  %v1277_v10 = vadd.f32 %v2365_v17, %v1276_v6 }
 0x314   :  { %1510 = vst [vmem:[#allocation7 + $0xf0] sm:$0xff] %v1446_v4  ;;  %v1447_v14 = vadd.f32 %v2028_v11, %v1285_v5  ;;  %v2042_v4 = vld [vmem:[#allocation2 + $0x170] sm:$0xff] }
 0x315   :  { %1508 = vst [vmem:[#allocation7 + $0xe0] sm:$0xff] %v1444_v8  ;;  %v1445_v20 = vadd.f32 %v2029_v19, %v1277_v10  ;;  %v2043_v8 = vld [vmem:[#allocation2 + $0x160] sm:$0xff] }
 0x316   :  { %1511 = vst [vmem:[#allocation7 + $0xf8] sm:$0xff] %v1447_v14  ;;  %v2044_v14 = vld [vmem:[#allocation2 + $0x178] sm:$0xff] }
 0x317   :  { %1509 = vst [vmem:[#allocation7 + $0xe8] sm:$0xff] %v1445_v20  ;;  %v1921_v21 = vpop.f32.mrb[64].mxu0  ;;  %v2045_v20 = vld [vmem:[#allocation2 + $0x168] sm:$0xff] }
 0x318   :  { %v1298_v22 = vadd.f32 %v1921_v21, %v2365_v17  ;;  %v1289_v15 = vpop.f32.mrb[65].mxu0 }
 0x319   :  { %v1290_v23 = vadd.f32 %v2365_v17, %v1289_v15  ;;  %v1922_v24 = vpop.f32.mrb[66].mxu0 }
 0x31a   :  { %v1450_v26 = vadd.f32 %v2030_v25, %v1298_v22  ;;  %v1301_v27 = vadd.f32 %v1922_v24, %v2365_v17  ;;  %v1292_v28 = vpop.f32.mrb[67].mxu0 }
 0x31b   :  { %v1448_v30 = vadd.f32 %v2031_v29, %v1290_v23  ;;  %v1293_v31 = vadd.f32 %v2365_v17, %v1292_v28 }
 0x31c   :  { %1514 = vst [vmem:[#allocation7 + $0x110] sm:$0xff] %v1450_v26  ;;  %v1451_v33 = vadd.f32 %v2032_v32, %v1301_v27  ;;  %v2046_v26 = vld [vmem:[#allocation2 + $0x190] sm:$0xff] }
 0x31d   :  { %1512 = vst [vmem:[#allocation7 + $0x100] sm:$0xff] %v1448_v30  ;;  %v1449_v35 = vadd.f32 %v2033_v34, %v1293_v31  ;;  %v2047_v30 = vld [vmem:[#allocation2 + $0x180] sm:$0xff] }
 0x31e   :  { %1515 = vst [vmem:[#allocation7 + $0x118] sm:$0xff] %v1451_v33  ;;  %v2048_v33 = vld [vmem:[#allocation2 + $0x198] sm:$0xff] }
 0x31f   :  { %1513 = vst [vmem:[#allocation7 + $0x108] sm:$0xff] %v1449_v35  ;;  %v1925_v36 = vpop.f32.mrb[68].mxu0  ;;  %v2049_v35 = vld [vmem:[#allocation2 + $0x188] sm:$0xff] }
 0x320   :  { %v1314_v37 = vadd.f32 %v1925_v36, %v2365_v17  ;;  %v1305_v38 = vpop.f32.mrb[69].mxu0 }
 0x321   :  { %v1306_v39 = vadd.f32 %v2365_v17, %v1305_v38  ;;  %v1926_v40 = vpop.f32.mrb[70].mxu0 }
 0x322   :  { %v1454_v44 = vadd.f32 %v2034_v43, %v1314_v37  ;;  %v1317_v50 = vadd.f32 %v1926_v40, %v2365_v17  ;;  %v1308_v51 = vpop.f32.mrb[71].mxu0 }
 0x323   :  { %v1452_v18 = vadd.f32 %v2035_v48, %v1306_v39  ;;  %v1309_v45 = vadd.f32 %v2365_v17, %v1308_v51 }
 0x324   :  { %1518 = vst [vmem:[#allocation7 + $0x130] sm:$0xff] %v1454_v44  ;;  %v1455_v12 = vadd.f32 %v2036_v49, %v1317_v50  ;;  %v2050_v44 = vld [vmem:[#allocation2 + $0x1b0] sm:$0xff] }
 0x325   :  { %1516 = vst [vmem:[#allocation7 + $0x120] sm:$0xff] %v1452_v18  ;;  %v1453_v42 = vadd.f32 %v2037_v16, %v1309_v45  ;;  %v2051_v18 = vld [vmem:[#allocation2 + $0x1a0] sm:$0xff] }
 0x326   :  { %1519 = vst [vmem:[#allocation7 + $0x138] sm:$0xff] %v1455_v12  ;;  %v2052_v12 = vld [vmem:[#allocation2 + $0x1b8] sm:$0xff] }
 0x327   :  { %1517 = vst [vmem:[#allocation7 + $0x128] sm:$0xff] %v1453_v42  ;;  %v1929_v46 = vpop.f32.mrb[72].mxu0  ;;  %v2053_v42 = vld [vmem:[#allocation2 + $0x1a8] sm:$0xff] }
 0x328   :  { %v1330_v9 = vadd.f32 %v1929_v46, %v2365_v17  ;;  %v1321_v13 = vpop.f32.mrb[73].mxu0 }
 0x329   :  { %v1322_v41 = vadd.f32 %v2365_v17, %v1321_v13  ;;  %v1930_v47 = vpop.f32.mrb[74].mxu0 }
 0x32a   :  { %v1458_v53 = vadd.f32 %v2038_v52, %v1330_v9  ;;  %v1333_v54 = vadd.f32 %v1930_v47, %v2365_v17  ;;  %v1324_v55 = vpop.f32.mrb[75].mxu0 }
 0x32b   :  { %v1456_v57 = vadd.f32 %v2039_v56, %v1322_v41  ;;  %v1325_v58 = vadd.f32 %v2365_v17, %v1324_v55 }
 0x32c   :  { %1522 = vst [vmem:[#allocation7 + $0x150] sm:$0xff] %v1458_v53  ;;  %v1459_v60 = vadd.f32 %v2040_v59, %v1333_v54  ;;  %v2054_v53 = vld [vmem:[#allocation2 + $0x1d0] sm:$0xff] }
 0x32d   :  { %1520 = vst [vmem:[#allocation7 + $0x140] sm:$0xff] %v1456_v57  ;;  %v1457_v62 = vadd.f32 %v2041_v61, %v1325_v58  ;;  %v2055_v57 = vld [vmem:[#allocation2 + $0x1c0] sm:$0xff] }
 0x32e   :  { %1523 = vst [vmem:[#allocation7 + $0x158] sm:$0xff] %v1459_v60  ;;  %v2056_v60 = vld [vmem:[#allocation2 + $0x1d8] sm:$0xff] }
 0x32f   :  { %1521 = vst [vmem:[#allocation7 + $0x148] sm:$0xff] %v1457_v62  ;;  %v1933_v63 = vpop.f32.mrb[76].mxu0  ;;  %v2057_v62 = vld [vmem:[#allocation2 + $0x1c8] sm:$0xff] }
 0x330   :  { %v1346_v0 = vadd.f32 %v1933_v63, %v2365_v17  ;;  %v1337_v1 = vpop.f32.mrb[77].mxu0 }
 0x331   :  { %v1338_v2 = vadd.f32 %v2365_v17, %v1337_v1  ;;  %v1934_v3 = vpop.f32.mrb[78].mxu0 }
 0x332   :  { %v1462_v5 = vadd.f32 %v2042_v4, %v1346_v0  ;;  %v1349_v6 = vadd.f32 %v1934_v3, %v2365_v17  ;;  %v1340_v7 = vpop.f32.mrb[79].mxu0 }
 0x333   :  { %v1460_v10 = vadd.f32 %v2043_v8, %v1338_v2  ;;  %v1341_v11 = vadd.f32 %v2365_v17, %v1340_v7 }
 0x334   :  { %1526 = vst [vmem:[#allocation7 + $0x170] sm:$0xff] %v1462_v5  ;;  %v1463_v19 = vadd.f32 %v2044_v14, %v1349_v6  ;;  %v2058_v5 = vld [vmem:[#allocation2 + $0x1f0] sm:$0xff] }
 0x335   :  { %1524 = vst [vmem:[#allocation7 + $0x160] sm:$0xff] %v1460_v10  ;;  %v1461_v21 = vadd.f32 %v2045_v20, %v1341_v11  ;;  %v2059_v10 = vld [vmem:[#allocation2 + $0x1e0] sm:$0xff] }
 0x336   :  { %1527 = vst [vmem:[#allocation7 + $0x178] sm:$0xff] %v1463_v19  ;;  %v2060_v19 = vld [vmem:[#allocation2 + $0x1f8] sm:$0xff] }
 0x337   :  { %1525 = vst [vmem:[#allocation7 + $0x168] sm:$0xff] %v1461_v21  ;;  %v1937_v22 = vpop.f32.mrb[80].mxu0  ;;  %v2061_v21 = vld [vmem:[#allocation2 + $0x1e8] sm:$0xff] }
 0x338   :  { %v1362_v15 = vadd.f32 %v1937_v22, %v2365_v17  ;;  %v1353_v23 = vpop.f32.mrb[81].mxu0 }
 0x339   :  { %v1354_v24 = vadd.f32 %v2365_v17, %v1353_v23  ;;  %v1938_v25 = vpop.f32.mrb[82].mxu0 }
 0x33a   :  { %v1466_v27 = vadd.f32 %v2046_v26, %v1362_v15  ;;  %v1365_v28 = vadd.f32 %v1938_v25, %v2365_v17  ;;  %v1356_v29 = vpop.f32.mrb[83].mxu0 }
 0x33b   :  { %v1464_v31 = vadd.f32 %v2047_v30, %v1354_v24  ;;  %v1357_v32 = vadd.f32 %v2365_v17, %v1356_v29 }
 0x33c   :  { %1530 = vst [vmem:[#allocation7 + $0x190] sm:$0xff] %v1466_v27  ;;  %v1467_v34 = vadd.f32 %v2048_v33, %v1365_v28 }
 0x33d   :  { %1528 = vst [vmem:[#allocation7 + $0x180] sm:$0xff] %v1464_v31  ;;  %v1465_v36 = vadd.f32 %v2049_v35, %v1357_v32 }
 0x33e   :  { %1531 = vst [vmem:[#allocation7 + $0x198] sm:$0xff] %v1467_v34 }
 0x33f   :  { %1529 = vst [vmem:[#allocation7 + $0x188] sm:$0xff] %v1465_v36  ;;  %v1941_v37 = vpop.f32.mrb[84].mxu0 }
 0x340   :  { %v1378_v38 = vadd.f32 %v1941_v37, %v2365_v17  ;;  %v1369_v39 = vpop.f32.mrb[85].mxu0 }
 0x341   :  { %v1370_v40 = vadd.f32 %v2365_v17, %v1369_v39  ;;  %v1942_v43 = vpop.f32.mrb[86].mxu0 }
 0x342   :  { %v1470_v50 = vadd.f32 %v2050_v44, %v1378_v38  ;;  %v1381_v51 = vadd.f32 %v1942_v43, %v2365_v17  ;;  %v1372_v48 = vpop.f32.mrb[87].mxu0 }
 0x343   :  { %v1468_v45 = vadd.f32 %v2051_v18, %v1370_v40  ;;  %v1373_v49 = vadd.f32 %v2365_v17, %v1372_v48 }
 0x344   :  { %1534 = vst [vmem:[#allocation7 + $0x1b0] sm:$0xff] %v1470_v50  ;;  %v1471_v16 = vadd.f32 %v2052_v12, %v1381_v51 }
 0x345   :  { %1532 = vst [vmem:[#allocation7 + $0x1a0] sm:$0xff] %v1468_v45  ;;  %v1469_v46 = vadd.f32 %v2053_v42, %v1373_v49 }
 0x346   :  { %1535 = vst [vmem:[#allocation7 + $0x1b8] sm:$0xff] %v1471_v16 }
 0x347   :  { %1533 = vst [vmem:[#allocation7 + $0x1a8] sm:$0xff] %v1469_v46  ;;  %v1945_v9 = vpop.f32.mrb[88].mxu0 }
 0x348   :  { %v1394_v13 = vadd.f32 %v1945_v9, %v2365_v17  ;;  %v1385_v41 = vpop.f32.mrb[89].mxu0 }
 0x349   :  { %v1386_v47 = vadd.f32 %v2365_v17, %v1385_v41  ;;  %v1946_v52 = vpop.f32.mrb[90].mxu0 }
 0x34a   :  { %v1474_v54 = vadd.f32 %v2054_v53, %v1394_v13  ;;  %v1397_v55 = vadd.f32 %v1946_v52, %v2365_v17  ;;  %v1388_v56 = vpop.f32.mrb[91].mxu0 }
 0x34b   :  { %v1472_v58 = vadd.f32 %v2055_v57, %v1386_v47  ;;  %v1389_v59 = vadd.f32 %v2365_v17, %v1388_v56 }
 0x34c   :  { %1538 = vst [vmem:[#allocation7 + $0x1d0] sm:$0xff] %v1474_v54  ;;  %v1475_v61 = vadd.f32 %v2056_v60, %v1397_v55 }
 0x34d   :  { %1536 = vst [vmem:[#allocation7 + $0x1c0] sm:$0xff] %v1472_v58  ;;  %v1473_v63 = vadd.f32 %v2057_v62, %v1389_v59 }
 0x34e   :  { %1539 = vst [vmem:[#allocation7 + $0x1d8] sm:$0xff] %v1475_v61 }
 0x34f   :  { %1537 = vst [vmem:[#allocation7 + $0x1c8] sm:$0xff] %v1473_v63  ;;  %v1949_v0 = vpop.f32.mrb[92].mxu0 }
 0x350   :  { %v1410_v1 = vadd.f32 %v1949_v0, %v2365_v17  ;;  %v1401_v2 = vpop.f32.mrb[93].mxu0 }
 0x351   :  { %v1402_v3 = vadd.f32 %v2365_v17, %v1401_v2  ;;  %v1950_v4 = vpop.f32.mrb[94].mxu0 }
 0x352   :  { %v1478_v6 = vadd.f32 %v2058_v5, %v1410_v1  ;;  %v1413_v7 = vadd.f32 %v1950_v4, %v2365_v17  ;;  %v1404_v8 = vpop.f32.mrb[95].mxu0 }
 0x353   :  { %v1476_v11 = vadd.f32 %v2059_v10, %v1402_v3  ;;  %v1405_v14 = vadd.f32 %v2365_v17, %v1404_v8 }
 0x354   :  { %1542 = vst [vmem:[#allocation7 + $0x1f0] sm:$0xff] %v1478_v6  ;;  %v1479_v20 = vadd.f32 %v2060_v19, %v1413_v7 }
 0x355   :  { %1540 = vst [vmem:[#allocation7 + $0x1e0] sm:$0xff] %v1476_v11  ;;  %v1477_v22 = vadd.f32 %v2061_v21, %v1405_v14 }
 0x356   :  { %1543 = vst [vmem:[#allocation7 + $0x1f8] sm:$0xff] %v1479_v20 }
 0x357   :  { %1541 = vst [vmem:[#allocation7 + $0x1e8] sm:$0xff] %v1477_v22 }
 0x358   :  { %2117 = shalt.err (!%p2114_p6)
}
 0x359   :  { %s2118_s21 = scalar_lea.hbm %s2449_s3, 8192 }
 0x35a   :  { %p2119_p7 = scmp.ne.s32.totalorder %s2449_s3, %s2118_s21  ;;  %p2122_p8 = scmp.lt.u32.totalorder %s2118_s21, %s2449_s3 }
 0x35c   :  { %p2124_p9 = pnand %p2122_p8, %p2119_p7 }
 0x35e   :  { %2127 = shalt.err (!%p2124_p9)
}
 0x35f   :  { %1555 = dma.vmem_to_hbm [thread:$0]  %s1550_s17, 8192, %s2449_s3, [#allocation4], %s2135_s22, %s2135_s22, %s2136_s23  }
 0x360   :  { %2132 = dma.done.wait [#allocation4], 8192  }
 0x361   :  { %2133 = vsyncadd [#allocation4], 4294959104 }
 0x362   :  { %1559 = vsyncpa [#allocation3], 1 }
 0x363   :  { %1560 = vsyncpa [#allocation6], 1 }
 0x364   :  { %1561 = vsyncpa [#allocation4], 1 }

</bundles_post_ra>
